<compile_context>
chip_gen: v6e
topology: v6e:2x2x1
jax: 0.10.0
libtpu: 0.0.40
codegen_flags: <defaults>
</compile_context>

<pallas_src>
import functools

import jax
import jax.numpy as jnp
from jax import lax
from jax.experimental import pallas as pl
from jax.experimental.pallas import tpu as pltpu


def _round_up(x, m):
    return ((x + m - 1) // m) * m


def _focus_conv_kernel(w_ref, x_ref, h_ref, o_ref, *, C, Th, Wpad, sub_rows):
    """One (batch, row-tile) block of the fused space-to-depth + 3x3 conv.

    w_ref: SMEM (C*9,) f32            -- conv weights, flattened c*9 + kh*3 + kw.
    x_ref: VMEM (1, C, Th, Wpad)      -- padded s2d rows [t*Th, t*Th+Th), lane-dense.
    h_ref: VMEM (1, C, 1, 2, Wpad)    -- 2-row bottom halo: padded rows [t*Th+Th, +2).
    o_ref: VMEM (1, 1, Th, Wpad) f32  -- output rows; cols >= Wh / rows >= Hh are scratch.
    """
    n_sub = -(-Th // sub_rows)
    for s in range(n_sub):                       # static: sub-tiles bound the vreg working set
        r0 = s * sub_rows
        rows = min(sub_rows, Th - r0)
        last = s == n_sub - 1
        acc = jnp.zeros((rows, Wpad), jnp.float32)   # register accumulator (no o_ref RMW)
        for c in range(C):                       # fully unrolled: static, aligned addressing
            if last:
                # Last sub-tile needs the 2 halo rows below this tile's main block.
                slab = jnp.concatenate(
                    [x_ref[0, c, pl.ds(r0, rows), :], h_ref[0, c, 0, :, :]], axis=0)
            else:
                slab = x_ref[0, c, pl.ds(r0, rows + 2), :]   # single aligned slab load
            slab = slab.astype(jnp.float32)      # one cast per channel slab
            for kw in range(3):
                # Lane shift on the (otherwise idle) XLU; wraparound lands in cols >= Wh
                # (Wpad >= Wh + 2), which the wrapper crops off.
                sk = slab if kw == 0 else pltpu.roll(slab, Wpad - kw, axis=1)
                for kh in range(3):
                    acc = acc + w_ref[c * 9 + kh * 3 + kw] * sk[kh:kh + rows, :]
        # Single full-lane-width (unmasked) store per sub-tile, sublane-aligned offset.
        o_ref[0, 0, pl.ds(r0, rows), :] = acc


def focus_forward(x, weight, *, row_tile=256, sub_rows=64):
    """Focus forward. x: (N, c1, H, W); weight: (1, 4*c1, 3, 3) -> (N, 1, H//2, W//2)."""
    N, c1, H, W = x.shape
    assert H % 2 == 0 and W % 2 == 0
    Hh, Wh = H // 2, W // 2
    C = 4 * c1
    assert weight.shape == (1, C, 3, 3)

    itemsize = jnp.dtype(x.dtype).itemsize
    Wpad = _round_up(Wh + 2, 128)                     # lane-dense minor dim

    # Row tile: multiple of 8 (BlockSpec (8,128) rule), VMEM-budgeted (~4 MiB input block).
    # Note: on v6e/v5e bigger tiles (up to whole Hh) are strictly better; on v7x keep
    # N * row_tiles >= 2 so both TensorCores get work.
    th_cap = max(8, ((4 * 1024 * 1024) // (C * Wpad * itemsize)) // 8 * 8)
    Th = max(8, min(_round_up(Hh, 8), _round_up(row_tile, 8), th_cap))
    T = int(pl.cdiv(Hh, Th))
    # Sub-tile rows: multiple of 8, keep the f32 register accumulator around ~8 vregs.
    sub_cap = max(8, ((8 * 8 * 128) // Wpad) // 8 * 8)
    sub = max(8, min(Th, _round_up(sub_rows, 8), sub_cap))

    # --- space-to-depth + zero pad: a single fused re-layout pass feeding the kernel ---
    s2d = jnp.concatenate(
        [x[..., ::2, ::2], x[..., 1::2, ::2], x[..., ::2, 1::2], x[..., 1::2, 1::2]],
        axis=1,
    )  # (N, C, Hh, Wh)
    rows_total = T * Th + 2                           # 1 top halo + Hh rows + bottom pad
    xp = jnp.pad(s2d, ((0, 0), (0, 0), (1, rows_total - Hh - 1), (1, Wpad - Wh - 1)))

    # Tiny per-tile bottom halo (2 rows below each tile's main block); ~2/Th of the input.
    halo = jnp.stack(
        [xp[:, :, t * Th + Th: t * Th + Th + 2, :] for t in range(T)], axis=2
    )  # (N, C, T, 2, Wpad)

    w_flat = weight.astype(jnp.float32).reshape(C * 9)   # 1-D SMEM scalar table

    in_block = C * Th * Wpad * itemsize
    halo_block = C * 2 * Wpad * itemsize
    out_block = Th * Wpad * 4
    vmem_limit = int(min(48 * 2**20, max(16 * 2**20, 4 * (in_block + halo_block + out_block))))

    kernel = functools.partial(_focus_conv_kernel, C=C, Th=Th, Wpad=Wpad, sub_rows=sub)
    out = pl.pallas_call(
        kernel,
        out_shape=jax.ShapeDtypeStruct((N, 1, T * Th, Wpad), jnp.float32),
        grid_spec=pltpu.PrefetchScalarGridSpec(
            num_scalar_prefetch=0,
            grid=(N, T),
            in_specs=[
                pl.BlockSpec(memory_space=pltpu.MemorySpace.SMEM),               # weights
                pl.BlockSpec((1, C, Th, Wpad), lambda n, t: (n, 0, t, 0)),       # main rows
                pl.BlockSpec((1, C, 1, 2, Wpad), lambda n, t: (n, 0, t, 0, 0)),  # halo rows
            ],
            out_specs=pl.BlockSpec((1, 1, Th, Wpad), lambda n, t: (n, 0, t, 0)),
        ),
        compiler_params=pltpu.CompilerParams(
            dimension_semantics=("parallel", "parallel"),
            vmem_limit_bytes=vmem_limit,
        ),
    )(w_flat, xp, halo)

    # Drop lane / row padding and restore dtype.
    return out[:, :, :Hh, :Wh].astype(x.dtype)


def _reference(x, weight):
    # Pure-JAX reference (NCHW conv, pad=1, stride 1, no bias) for verification.
    s2d = jnp.concatenate(
        [x[..., ::2, ::2], x[..., 1::2, ::2], x[..., ::2, 1::2], x[..., 1::2, 1::2]],
        axis=1,
    )
    return lax.conv_general_dilated(
        s2d, weight, window_strides=(1, 1), padding=((1, 1), (1, 1)),
        dimension_numbers=("NCHW", "OIHW", "NCHW"),
    )


if __name__ == "__main__":
    key = jax.random.PRNGKey(0)
    kx, kw, kx2 = jax.random.split(key, 3)

    # Small config consistent with the module: N=2, c1=4 (C=16), 16x16 spatial.
    N, c1, H, W = 2, 4, 16, 16
    x = jax.random.normal(kx, (N, c1, H, W), dtype=jnp.float32)
    weight = jax.random.normal(kw, (1, 4 * c1, 3, 3), dtype=jnp.float32) * 0.1

    ref = jax.block_until_ready(_reference(x, weight))
    out = jax.block_until_ready(focus_forward(x, weight))       # T=1, single sub-tile
    assert out.shape == (N, 1, H // 2, W // 2)
    assert jnp.allclose(out, ref, atol=2e-5, rtol=1e-5)

    # Slightly taller input to exercise (a) multiple row tiles and (b) multiple sub-tiles.
    x2 = jax.random.normal(kx2, (N, c1, 32, 32), dtype=jnp.float32)
    ref2 = jax.block_until_ready(_reference(x2, weight))
    out2 = jax.block_until_ready(focus_forward(x2, weight, row_tile=8, sub_rows=8))   # T=2
    assert jnp.allclose(out2, ref2, atol=2e-5, rtol=1e-5)
    out3 = jax.block_until_ready(focus_forward(x2, weight, row_tile=16, sub_rows=8))  # n_sub=2
    assert jnp.allclose(out3, ref2, atol=2e-5, rtol=1e-5)

    print("KERNEL_OK")
</pallas_src>

<mosaic_0001>
module attributes {stable_mosaic.version = 11 : i64} {
  func.func @_focus_conv_kernel(%arg0: i32, %arg1: i32, %arg2: memref<144xf32, #tpu.memory_space<smem>>, %arg3: memref<1x16x8x128xf32, #tpu.memory_space<vmem>>, %arg4: memref<1x16x1x2x128xf32, #tpu.memory_space<vmem>>, %arg5: memref<1x1x8x128xf32, #tpu.memory_space<vmem>>) attributes {dimension_semantics = [#tpu.dimension_semantics<parallel>, #tpu.dimension_semantics<parallel>], iteration_bounds = array<i64: 2, 1>, scalar_prefetch = 0 : i64, scratch_operands = 0 : i64, tpu.core_type = #tpu.core_type<tc>, window_params = [{transform_indices = @transform_0, window_bounds = array<i64: 144>}, {transform_indices = @transform_1, window_bounds = array<i64: 1, 16, 8, 128>}, {transform_indices = @transform_2, window_bounds = array<i64: 1, 16, 1, 2, 128>}, {transform_indices = @transform_3, window_bounds = array<i64: 1, 1, 8, 128>}]} {
    %cst = arith.constant 0.000000e+00 : f32
    %0 = vector.broadcast %cst : f32 to vector<8x128xf32>
    %c0 = arith.constant 0 : index
    %c0_0 = arith.constant 0 : index
    %c0_1 = arith.constant 0 : index
    %c0_2 = arith.constant 0 : index
    %1 = vector.load %arg3[%c0, %c0_0, %c0_1, %c0_2] : memref<1x16x8x128xf32, #tpu.memory_space<vmem>>, vector<1x1x8x128xf32>
    %2 = vector.shape_cast %1 : vector<1x1x8x128xf32> to vector<8x128xf32>
    %c0_3 = arith.constant 0 : index
    %c0_4 = arith.constant 0 : index
    %c0_5 = arith.constant 0 : index
    %c0_6 = arith.constant 0 : index
    %c0_7 = arith.constant 0 : index
    %3 = vector.load %arg4[%c0_3, %c0_4, %c0_5, %c0_6, %c0_7] : memref<1x16x1x2x128xf32, #tpu.memory_space<vmem>>, vector<1x1x1x2x128xf32>
    %4 = vector.shape_cast %3 : vector<1x1x1x2x128xf32> to vector<2x128xf32>
    %5 = tpu.concatenate %2, %4 in 0 : vector<8x128xf32>, vector<2x128xf32> -> vector<10x128xf32>
    %c0_8 = arith.constant 0 : index
    %6 = memref.load %arg2[%c0_8] : memref<144xf32, #tpu.memory_space<smem>>
    %7 = vector.extract_strided_slice %5 {offsets = [0, 0], sizes = [8, 128], strides = [1, 1]} : vector<10x128xf32> to vector<8x128xf32>
    %8 = vector.broadcast %6 : f32 to vector<8x128xf32>
    %9 = arith.mulf %8, %7 : vector<8x128xf32>
    %10 = arith.addf %0, %9 : vector<8x128xf32>
    %c3 = arith.constant 3 : index
    %11 = memref.load %arg2[%c3] : memref<144xf32, #tpu.memory_space<smem>>
    %12 = vector.extract_strided_slice %5 {offsets = [1, 0], sizes = [8, 128], strides = [1, 1]} : vector<10x128xf32> to vector<8x128xf32>
    %13 = vector.broadcast %11 : f32 to vector<8x128xf32>
    %14 = arith.mulf %13, %12 : vector<8x128xf32>
    %15 = arith.addf %10, %14 : vector<8x128xf32>
    %c6 = arith.constant 6 : index
    %16 = memref.load %arg2[%c6] : memref<144xf32, #tpu.memory_space<smem>>
    %17 = vector.extract_strided_slice %5 {offsets = [2, 0], sizes = [8, 128], strides = [1, 1]} : vector<10x128xf32> to vector<8x128xf32>
    %18 = vector.broadcast %16 : f32 to vector<8x128xf32>
    %19 = arith.mulf %18, %17 : vector<8x128xf32>
    %20 = arith.addf %15, %19 : vector<8x128xf32>
    %c127_i32 = arith.constant 127 : i32
    %21 = tpu.dynamic_rotate %5 by %c127_i32 dim 1 : vector<10x128xf32>, i32 -> vector<10x128xf32>
    %c1 = arith.constant 1 : index
    %22 = memref.load %arg2[%c1] : memref<144xf32, #tpu.memory_space<smem>>
    %23 = vector.extract_strided_slice %21 {offsets = [0, 0], sizes = [8, 128], strides = [1, 1]} : vector<10x128xf32> to vector<8x128xf32>
    %24 = vector.broadcast %22 : f32 to vector<8x128xf32>
    %25 = arith.mulf %24, %23 : vector<8x128xf32>
    %26 = arith.addf %20, %25 : vector<8x128xf32>
    %c4 = arith.constant 4 : index
    %27 = memref.load %arg2[%c4] : memref<144xf32, #tpu.memory_space<smem>>
    %28 = vector.extract_strided_slice %21 {offsets = [1, 0], sizes = [8, 128], strides = [1, 1]} : vector<10x128xf32> to vector<8x128xf32>
    %29 = vector.broadcast %27 : f32 to vector<8x128xf32>
    %30 = arith.mulf %29, %28 : vector<8x128xf32>
    %31 = arith.addf %26, %30 : vector<8x128xf32>
    %c7 = arith.constant 7 : index
    %32 = memref.load %arg2[%c7] : memref<144xf32, #tpu.memory_space<smem>>
    %33 = vector.extract_strided_slice %21 {offsets = [2, 0], sizes = [8, 128], strides = [1, 1]} : vector<10x128xf32> to vector<8x128xf32>
    %34 = vector.broadcast %32 : f32 to vector<8x128xf32>
    %35 = arith.mulf %34, %33 : vector<8x128xf32>
    %36 = arith.addf %31, %35 : vector<8x128xf32>
    %c126_i32 = arith.constant 126 : i32
    %37 = tpu.dynamic_rotate %5 by %c126_i32 dim 1 : vector<10x128xf32>, i32 -> vector<10x128xf32>
    %c2 = arith.constant 2 : index
    %38 = memref.load %arg2[%c2] : memref<144xf32, #tpu.memory_space<smem>>
    %39 = vector.extract_strided_slice %37 {offsets = [0, 0], sizes = [8, 128], strides = [1, 1]} : vector<10x128xf32> to vector<8x128xf32>
    %40 = vector.broadcast %38 : f32 to vector<8x128xf32>
    %41 = arith.mulf %40, %39 : vector<8x128xf32>
    %42 = arith.addf %36, %41 : vector<8x128xf32>
    %c5 = arith.constant 5 : index
    %43 = memref.load %arg2[%c5] : memref<144xf32, #tpu.memory_space<smem>>
    %44 = vector.extract_strided_slice %37 {offsets = [1, 0], sizes = [8, 128], strides = [1, 1]} : vector<10x128xf32> to vector<8x128xf32>
    %45 = vector.broadcast %43 : f32 to vector<8x128xf32>
    %46 = arith.mulf %45, %44 : vector<8x128xf32>
    %47 = arith.addf %42, %46 : vector<8x128xf32>
    %c8 = arith.constant 8 : index
    %48 = memref.load %arg2[%c8] : memref<144xf32, #tpu.memory_space<smem>>
    %49 = vector.extract_strided_slice %37 {offsets = [2, 0], sizes = [8, 128], strides = [1, 1]} : vector<10x128xf32> to vector<8x128xf32>
    %50 = vector.broadcast %48 : f32 to vector<8x128xf32>
    %51 = arith.mulf %50, %49 : vector<8x128xf32>
    %52 = arith.addf %47, %51 : vector<8x128xf32>
    %c0_9 = arith.constant 0 : index
    %c1_10 = arith.constant 1 : index
    %c0_11 = arith.constant 0 : index
    %c0_12 = arith.constant 0 : index
    %53 = vector.load %arg3[%c0_9, %c1_10, %c0_11, %c0_12] : memref<1x16x8x128xf32, #tpu.memory_space<vmem>>, vector<1x1x8x128xf32>
    %54 = vector.shape_cast %53 : vector<1x1x8x128xf32> to vector<8x128xf32>
    %c0_13 = arith.constant 0 : index
    %c1_14 = arith.constant 1 : index
    %c0_15 = arith.constant 0 : index
    %c0_16 = arith.constant 0 : index
    %c0_17 = arith.constant 0 : index
    %55 = vector.load %arg4[%c0_13, %c1_14, %c0_15, %c0_16, %c0_17] : memref<1x16x1x2x128xf32, #tpu.memory_space<vmem>>, vector<1x1x1x2x128xf32>
    %56 = vector.shape_cast %55 : vector<1x1x1x2x128xf32> to vector<2x128xf32>
    %57 = tpu.concatenate %54, %56 in 0 : vector<8x128xf32>, vector<2x128xf32> -> vector<10x128xf32>
    %c9 = arith.constant 9 : index
    %58 = memref.load %arg2[%c9] : memref<144xf32, #tpu.memory_space<smem>>
    %59 = vector.extract_strided_slice %57 {offsets = [0, 0], sizes = [8, 128], strides = [1, 1]} : vector<10x128xf32> to vector<8x128xf32>
    %60 = vector.broadcast %58 : f32 to vector<8x128xf32>
    %61 = arith.mulf %60, %59 : vector<8x128xf32>
    %62 = arith.addf %52, %61 : vector<8x128xf32>
    %c12 = arith.constant 12 : index
    %63 = memref.load %arg2[%c12] : memref<144xf32, #tpu.memory_space<smem>>
    %64 = vector.extract_strided_slice %57 {offsets = [1, 0], sizes = [8, 128], strides = [1, 1]} : vector<10x128xf32> to vector<8x128xf32>
    %65 = vector.broadcast %63 : f32 to vector<8x128xf32>
    %66 = arith.mulf %65, %64 : vector<8x128xf32>
    %67 = arith.addf %62, %66 : vector<8x128xf32>
    %c15 = arith.constant 15 : index
    %68 = memref.load %arg2[%c15] : memref<144xf32, #tpu.memory_space<smem>>
    %69 = vector.extract_strided_slice %57 {offsets = [2, 0], sizes = [8, 128], strides = [1, 1]} : vector<10x128xf32> to vector<8x128xf32>
    %70 = vector.broadcast %68 : f32 to vector<8x128xf32>
    %71 = arith.mulf %70, %69 : vector<8x128xf32>
    %72 = arith.addf %67, %71 : vector<8x128xf32>
    %c127_i32_18 = arith.constant 127 : i32
    %73 = tpu.dynamic_rotate %57 by %c127_i32_18 dim 1 : vector<10x128xf32>, i32 -> vector<10x128xf32>
    %c10 = arith.constant 10 : index
    %74 = memref.load %arg2[%c10] : memref<144xf32, #tpu.memory_space<smem>>
    %75 = vector.extract_strided_slice %73 {offsets = [0, 0], sizes = [8, 128], strides = [1, 1]} : vector<10x128xf32> to vector<8x128xf32>
    %76 = vector.broadcast %74 : f32 to vector<8x128xf32>
    %77 = arith.mulf %76, %75 : vector<8x128xf32>
    %78 = arith.addf %72, %77 : vector<8x128xf32>
    %c13 = arith.constant 13 : index
    %79 = memref.load %arg2[%c13] : memref<144xf32, #tpu.memory_space<smem>>
    %80 = vector.extract_strided_slice %73 {offsets = [1, 0], sizes = [8, 128], strides = [1, 1]} : vector<10x128xf32> to vector<8x128xf32>
    %81 = vector.broadcast %79 : f32 to vector<8x128xf32>
    %82 = arith.mulf %81, %80 : vector<8x128xf32>
    %83 = arith.addf %78, %82 : vector<8x128xf32>
    %c16 = arith.constant 16 : index
    %84 = memref.load %arg2[%c16] : memref<144xf32, #tpu.memory_space<smem>>
    %85 = vector.extract_strided_slice %73 {offsets = [2, 0], sizes = [8, 128], strides = [1, 1]} : vector<10x128xf32> to vector<8x128xf32>
    %86 = vector.broadcast %84 : f32 to vector<8x128xf32>
    %87 = arith.mulf %86, %85 : vector<8x128xf32>
    %88 = arith.addf %83, %87 : vector<8x128xf32>
    %c126_i32_19 = arith.constant 126 : i32
    %89 = tpu.dynamic_rotate %57 by %c126_i32_19 dim 1 : vector<10x128xf32>, i32 -> vector<10x128xf32>
    %c11 = arith.constant 11 : index
    %90 = memref.load %arg2[%c11] : memref<144xf32, #tpu.memory_space<smem>>
    %91 = vector.extract_strided_slice %89 {offsets = [0, 0], sizes = [8, 128], strides = [1, 1]} : vector<10x128xf32> to vector<8x128xf32>
    %92 = vector.broadcast %90 : f32 to vector<8x128xf32>
    %93 = arith.mulf %92, %91 : vector<8x128xf32>
    %94 = arith.addf %88, %93 : vector<8x128xf32>
    %c14 = arith.constant 14 : index
    %95 = memref.load %arg2[%c14] : memref<144xf32, #tpu.memory_space<smem>>
    %96 = vector.extract_strided_slice %89 {offsets = [1, 0], sizes = [8, 128], strides = [1, 1]} : vector<10x128xf32> to vector<8x128xf32>
    %97 = vector.broadcast %95 : f32 to vector<8x128xf32>
    %98 = arith.mulf %97, %96 : vector<8x128xf32>
    %99 = arith.addf %94, %98 : vector<8x128xf32>
    %c17 = arith.constant 17 : index
    %100 = memref.load %arg2[%c17] : memref<144xf32, #tpu.memory_space<smem>>
    %101 = vector.extract_strided_slice %89 {offsets = [2, 0], sizes = [8, 128], strides = [1, 1]} : vector<10x128xf32> to vector<8x128xf32>
    %102 = vector.broadcast %100 : f32 to vector<8x128xf32>
    %103 = arith.mulf %102, %101 : vector<8x128xf32>
    %104 = arith.addf %99, %103 : vector<8x128xf32>
    %c0_20 = arith.constant 0 : index
    %c2_21 = arith.constant 2 : index
    %c0_22 = arith.constant 0 : index
    %c0_23 = arith.constant 0 : index
    %105 = vector.load %arg3[%c0_20, %c2_21, %c0_22, %c0_23] : memref<1x16x8x128xf32, #tpu.memory_space<vmem>>, vector<1x1x8x128xf32>
    %106 = vector.shape_cast %105 : vector<1x1x8x128xf32> to vector<8x128xf32>
    %c0_24 = arith.constant 0 : index
    %c2_25 = arith.constant 2 : index
    %c0_26 = arith.constant 0 : index
    %c0_27 = arith.constant 0 : index
    %c0_28 = arith.constant 0 : index
    %107 = vector.load %arg4[%c0_24, %c2_25, %c0_26, %c0_27, %c0_28] : memref<1x16x1x2x128xf32, #tpu.memory_space<vmem>>, vector<1x1x1x2x128xf32>
    %108 = vector.shape_cast %107 : vector<1x1x1x2x128xf32> to vector<2x128xf32>
    %109 = tpu.concatenate %106, %108 in 0 : vector<8x128xf32>, vector<2x128xf32> -> vector<10x128xf32>
    %c18 = arith.constant 18 : index
    %110 = memref.load %arg2[%c18] : memref<144xf32, #tpu.memory_space<smem>>
    %111 = vector.extract_strided_slice %109 {offsets = [0, 0], sizes = [8, 128], strides = [1, 1]} : vector<10x128xf32> to vector<8x128xf32>
    %112 = vector.broadcast %110 : f32 to vector<8x128xf32>
    %113 = arith.mulf %112, %111 : vector<8x128xf32>
    %114 = arith.addf %104, %113 : vector<8x128xf32>
    %c21 = arith.constant 21 : index
    %115 = memref.load %arg2[%c21] : memref<144xf32, #tpu.memory_space<smem>>
    %116 = vector.extract_strided_slice %109 {offsets = [1, 0], sizes = [8, 128], strides = [1, 1]} : vector<10x128xf32> to vector<8x128xf32>
    %117 = vector.broadcast %115 : f32 to vector<8x128xf32>
    %118 = arith.mulf %117, %116 : vector<8x128xf32>
    %119 = arith.addf %114, %118 : vector<8x128xf32>
    %c24 = arith.constant 24 : index
    %120 = memref.load %arg2[%c24] : memref<144xf32, #tpu.memory_space<smem>>
    %121 = vector.extract_strided_slice %109 {offsets = [2, 0], sizes = [8, 128], strides = [1, 1]} : vector<10x128xf32> to vector<8x128xf32>
    %122 = vector.broadcast %120 : f32 to vector<8x128xf32>
    %123 = arith.mulf %122, %121 : vector<8x128xf32>
    %124 = arith.addf %119, %123 : vector<8x128xf32>
    %c127_i32_29 = arith.constant 127 : i32
    %125 = tpu.dynamic_rotate %109 by %c127_i32_29 dim 1 : vector<10x128xf32>, i32 -> vector<10x128xf32>
    %c19 = arith.constant 19 : index
    %126 = memref.load %arg2[%c19] : memref<144xf32, #tpu.memory_space<smem>>
    %127 = vector.extract_strided_slice %125 {offsets = [0, 0], sizes = [8, 128], strides = [1, 1]} : vector<10x128xf32> to vector<8x128xf32>
    %128 = vector.broadcast %126 : f32 to vector<8x128xf32>
    %129 = arith.mulf %128, %127 : vector<8x128xf32>
    %130 = arith.addf %124, %129 : vector<8x128xf32>
    %c22 = arith.constant 22 : index
    %131 = memref.load %arg2[%c22] : memref<144xf32, #tpu.memory_space<smem>>
    %132 = vector.extract_strided_slice %125 {offsets = [1, 0], sizes = [8, 128], strides = [1, 1]} : vector<10x128xf32> to vector<8x128xf32>
    %133 = vector.broadcast %131 : f32 to vector<8x128xf32>
    %134 = arith.mulf %133, %132 : vector<8x128xf32>
    %135 = arith.addf %130, %134 : vector<8x128xf32>
    %c25 = arith.constant 25 : index
    %136 = memref.load %arg2[%c25] : memref<144xf32, #tpu.memory_space<smem>>
    %137 = vector.extract_strided_slice %125 {offsets = [2, 0], sizes = [8, 128], strides = [1, 1]} : vector<10x128xf32> to vector<8x128xf32>
    %138 = vector.broadcast %136 : f32 to vector<8x128xf32>
    %139 = arith.mulf %138, %137 : vector<8x128xf32>
    %140 = arith.addf %135, %139 : vector<8x128xf32>
    %c126_i32_30 = arith.constant 126 : i32
    %141 = tpu.dynamic_rotate %109 by %c126_i32_30 dim 1 : vector<10x128xf32>, i32 -> vector<10x128xf32>
    %c20 = arith.constant 20 : index
    %142 = memref.load %arg2[%c20] : memref<144xf32, #tpu.memory_space<smem>>
    %143 = vector.extract_strided_slice %141 {offsets = [0, 0], sizes = [8, 128], strides = [1, 1]} : vector<10x128xf32> to vector<8x128xf32>
    %144 = vector.broadcast %142 : f32 to vector<8x128xf32>
    %145 = arith.mulf %144, %143 : vector<8x128xf32>
    %146 = arith.addf %140, %145 : vector<8x128xf32>
    %c23 = arith.constant 23 : index
    %147 = memref.load %arg2[%c23] : memref<144xf32, #tpu.memory_space<smem>>
    %148 = vector.extract_strided_slice %141 {offsets = [1, 0], sizes = [8, 128], strides = [1, 1]} : vector<10x128xf32> to vector<8x128xf32>
    %149 = vector.broadcast %147 : f32 to vector<8x128xf32>
    %150 = arith.mulf %149, %148 : vector<8x128xf32>
    %151 = arith.addf %146, %150 : vector<8x128xf32>
    %c26 = arith.constant 26 : index
    %152 = memref.load %arg2[%c26] : memref<144xf32, #tpu.memory_space<smem>>
    %153 = vector.extract_strided_slice %141 {offsets = [2, 0], sizes = [8, 128], strides = [1, 1]} : vector<10x128xf32> to vector<8x128xf32>
    %154 = vector.broadcast %152 : f32 to vector<8x128xf32>
    %155 = arith.mulf %154, %153 : vector<8x128xf32>
    %156 = arith.addf %151, %155 : vector<8x128xf32>
    %c0_31 = arith.constant 0 : index
    %c3_32 = arith.constant 3 : index
    %c0_33 = arith.constant 0 : index
    %c0_34 = arith.constant 0 : index
    %157 = vector.load %arg3[%c0_31, %c3_32, %c0_33, %c0_34] : memref<1x16x8x128xf32, #tpu.memory_space<vmem>>, vector<1x1x8x128xf32>
    %158 = vector.shape_cast %157 : vector<1x1x8x128xf32> to vector<8x128xf32>
    %c0_35 = arith.constant 0 : index
    %c3_36 = arith.constant 3 : index
    %c0_37 = arith.constant 0 : index
    %c0_38 = arith.constant 0 : index
    %c0_39 = arith.constant 0 : index
    %159 = vector.load %arg4[%c0_35, %c3_36, %c0_37, %c0_38, %c0_39] : memref<1x16x1x2x128xf32, #tpu.memory_space<vmem>>, vector<1x1x1x2x128xf32>
    %160 = vector.shape_cast %159 : vector<1x1x1x2x128xf32> to vector<2x128xf32>
    %161 = tpu.concatenate %158, %160 in 0 : vector<8x128xf32>, vector<2x128xf32> -> vector<10x128xf32>
    %c27 = arith.constant 27 : index
    %162 = memref.load %arg2[%c27] : memref<144xf32, #tpu.memory_space<smem>>
    %163 = vector.extract_strided_slice %161 {offsets = [0, 0], sizes = [8, 128], strides = [1, 1]} : vector<10x128xf32> to vector<8x128xf32>
    %164 = vector.broadcast %162 : f32 to vector<8x128xf32>
    %165 = arith.mulf %164, %163 : vector<8x128xf32>
    %166 = arith.addf %156, %165 : vector<8x128xf32>
    %c30 = arith.constant 30 : index
    %167 = memref.load %arg2[%c30] : memref<144xf32, #tpu.memory_space<smem>>
    %168 = vector.extract_strided_slice %161 {offsets = [1, 0], sizes = [8, 128], strides = [1, 1]} : vector<10x128xf32> to vector<8x128xf32>
    %169 = vector.broadcast %167 : f32 to vector<8x128xf32>
    %170 = arith.mulf %169, %168 : vector<8x128xf32>
    %171 = arith.addf %166, %170 : vector<8x128xf32>
    %c33 = arith.constant 33 : index
    %172 = memref.load %arg2[%c33] : memref<144xf32, #tpu.memory_space<smem>>
    %173 = vector.extract_strided_slice %161 {offsets = [2, 0], sizes = [8, 128], strides = [1, 1]} : vector<10x128xf32> to vector<8x128xf32>
    %174 = vector.broadcast %172 : f32 to vector<8x128xf32>
    %175 = arith.mulf %174, %173 : vector<8x128xf32>
    %176 = arith.addf %171, %175 : vector<8x128xf32>
    %c127_i32_40 = arith.constant 127 : i32
    %177 = tpu.dynamic_rotate %161 by %c127_i32_40 dim 1 : vector<10x128xf32>, i32 -> vector<10x128xf32>
    %c28 = arith.constant 28 : index
    %178 = memref.load %arg2[%c28] : memref<144xf32, #tpu.memory_space<smem>>
    %179 = vector.extract_strided_slice %177 {offsets = [0, 0], sizes = [8, 128], strides = [1, 1]} : vector<10x128xf32> to vector<8x128xf32>
    %180 = vector.broadcast %178 : f32 to vector<8x128xf32>
    %181 = arith.mulf %180, %179 : vector<8x128xf32>
    %182 = arith.addf %176, %181 : vector<8x128xf32>
    %c31 = arith.constant 31 : index
    %183 = memref.load %arg2[%c31] : memref<144xf32, #tpu.memory_space<smem>>
    %184 = vector.extract_strided_slice %177 {offsets = [1, 0], sizes = [8, 128], strides = [1, 1]} : vector<10x128xf32> to vector<8x128xf32>
    %185 = vector.broadcast %183 : f32 to vector<8x128xf32>
    %186 = arith.mulf %185, %184 : vector<8x128xf32>
    %187 = arith.addf %182, %186 : vector<8x128xf32>
    %c34 = arith.constant 34 : index
    %188 = memref.load %arg2[%c34] : memref<144xf32, #tpu.memory_space<smem>>
    %189 = vector.extract_strided_slice %177 {offsets = [2, 0], sizes = [8, 128], strides = [1, 1]} : vector<10x128xf32> to vector<8x128xf32>
    %190 = vector.broadcast %188 : f32 to vector<8x128xf32>
    %191 = arith.mulf %190, %189 : vector<8x128xf32>
    %192 = arith.addf %187, %191 : vector<8x128xf32>
    %c126_i32_41 = arith.constant 126 : i32
    %193 = tpu.dynamic_rotate %161 by %c126_i32_41 dim 1 : vector<10x128xf32>, i32 -> vector<10x128xf32>
    %c29 = arith.constant 29 : index
    %194 = memref.load %arg2[%c29] : memref<144xf32, #tpu.memory_space<smem>>
    %195 = vector.extract_strided_slice %193 {offsets = [0, 0], sizes = [8, 128], strides = [1, 1]} : vector<10x128xf32> to vector<8x128xf32>
    %196 = vector.broadcast %194 : f32 to vector<8x128xf32>
    %197 = arith.mulf %196, %195 : vector<8x128xf32>
    %198 = arith.addf %192, %197 : vector<8x128xf32>
    %c32 = arith.constant 32 : index
    %199 = memref.load %arg2[%c32] : memref<144xf32, #tpu.memory_space<smem>>
    %200 = vector.extract_strided_slice %193 {offsets = [1, 0], sizes = [8, 128], strides = [1, 1]} : vector<10x128xf32> to vector<8x128xf32>
    %201 = vector.broadcast %199 : f32 to vector<8x128xf32>
    %202 = arith.mulf %201, %200 : vector<8x128xf32>
    %203 = arith.addf %198, %202 : vector<8x128xf32>
    %c35 = arith.constant 35 : index
    %204 = memref.load %arg2[%c35] : memref<144xf32, #tpu.memory_space<smem>>
    %205 = vector.extract_strided_slice %193 {offsets = [2, 0], sizes = [8, 128], strides = [1, 1]} : vector<10x128xf32> to vector<8x128xf32>
    %206 = vector.broadcast %204 : f32 to vector<8x128xf32>
    %207 = arith.mulf %206, %205 : vector<8x128xf32>
    %208 = arith.addf %203, %207 : vector<8x128xf32>
    %c0_42 = arith.constant 0 : index
    %c4_43 = arith.constant 4 : index
    %c0_44 = arith.constant 0 : index
    %c0_45 = arith.constant 0 : index
    %209 = vector.load %arg3[%c0_42, %c4_43, %c0_44, %c0_45] : memref<1x16x8x128xf32, #tpu.memory_space<vmem>>, vector<1x1x8x128xf32>
    %210 = vector.shape_cast %209 : vector<1x1x8x128xf32> to vector<8x128xf32>
    %c0_46 = arith.constant 0 : index
    %c4_47 = arith.constant 4 : index
    %c0_48 = arith.constant 0 : index
    %c0_49 = arith.constant 0 : index
    %c0_50 = arith.constant 0 : index
    %211 = vector.load %arg4[%c0_46, %c4_47, %c0_48, %c0_49, %c0_50] : memref<1x16x1x2x128xf32, #tpu.memory_space<vmem>>, vector<1x1x1x2x128xf32>
    %212 = vector.shape_cast %211 : vector<1x1x1x2x128xf32> to vector<2x128xf32>
    %213 = tpu.concatenate %210, %212 in 0 : vector<8x128xf32>, vector<2x128xf32> -> vector<10x128xf32>
    %c36 = arith.constant 36 : index
    %214 = memref.load %arg2[%c36] : memref<144xf32, #tpu.memory_space<smem>>
    %215 = vector.extract_strided_slice %213 {offsets = [0, 0], sizes = [8, 128], strides = [1, 1]} : vector<10x128xf32> to vector<8x128xf32>
    %216 = vector.broadcast %214 : f32 to vector<8x128xf32>
    %217 = arith.mulf %216, %215 : vector<8x128xf32>
    %218 = arith.addf %208, %217 : vector<8x128xf32>
    %c39 = arith.constant 39 : index
    %219 = memref.load %arg2[%c39] : memref<144xf32, #tpu.memory_space<smem>>
    %220 = vector.extract_strided_slice %213 {offsets = [1, 0], sizes = [8, 128], strides = [1, 1]} : vector<10x128xf32> to vector<8x128xf32>
    %221 = vector.broadcast %219 : f32 to vector<8x128xf32>
    %222 = arith.mulf %221, %220 : vector<8x128xf32>
    %223 = arith.addf %218, %222 : vector<8x128xf32>
    %c42 = arith.constant 42 : index
    %224 = memref.load %arg2[%c42] : memref<144xf32, #tpu.memory_space<smem>>
    %225 = vector.extract_strided_slice %213 {offsets = [2, 0], sizes = [8, 128], strides = [1, 1]} : vector<10x128xf32> to vector<8x128xf32>
    %226 = vector.broadcast %224 : f32 to vector<8x128xf32>
    %227 = arith.mulf %226, %225 : vector<8x128xf32>
    %228 = arith.addf %223, %227 : vector<8x128xf32>
    %c127_i32_51 = arith.constant 127 : i32
    %229 = tpu.dynamic_rotate %213 by %c127_i32_51 dim 1 : vector<10x128xf32>, i32 -> vector<10x128xf32>
    %c37 = arith.constant 37 : index
    %230 = memref.load %arg2[%c37] : memref<144xf32, #tpu.memory_space<smem>>
    %231 = vector.extract_strided_slice %229 {offsets = [0, 0], sizes = [8, 128], strides = [1, 1]} : vector<10x128xf32> to vector<8x128xf32>
    %232 = vector.broadcast %230 : f32 to vector<8x128xf32>
    %233 = arith.mulf %232, %231 : vector<8x128xf32>
    %234 = arith.addf %228, %233 : vector<8x128xf32>
    %c40 = arith.constant 40 : index
    %235 = memref.load %arg2[%c40] : memref<144xf32, #tpu.memory_space<smem>>
    %236 = vector.extract_strided_slice %229 {offsets = [1, 0], sizes = [8, 128], strides = [1, 1]} : vector<10x128xf32> to vector<8x128xf32>
    %237 = vector.broadcast %235 : f32 to vector<8x128xf32>
    %238 = arith.mulf %237, %236 : vector<8x128xf32>
    %239 = arith.addf %234, %238 : vector<8x128xf32>
    %c43 = arith.constant 43 : index
    %240 = memref.load %arg2[%c43] : memref<144xf32, #tpu.memory_space<smem>>
    %241 = vector.extract_strided_slice %229 {offsets = [2, 0], sizes = [8, 128], strides = [1, 1]} : vector<10x128xf32> to vector<8x128xf32>
    %242 = vector.broadcast %240 : f32 to vector<8x128xf32>
    %243 = arith.mulf %242, %241 : vector<8x128xf32>
    %244 = arith.addf %239, %243 : vector<8x128xf32>
    %c126_i32_52 = arith.constant 126 : i32
    %245 = tpu.dynamic_rotate %213 by %c126_i32_52 dim 1 : vector<10x128xf32>, i32 -> vector<10x128xf32>
    %c38 = arith.constant 38 : index
    %246 = memref.load %arg2[%c38] : memref<144xf32, #tpu.memory_space<smem>>
    %247 = vector.extract_strided_slice %245 {offsets = [0, 0], sizes = [8, 128], strides = [1, 1]} : vector<10x128xf32> to vector<8x128xf32>
    %248 = vector.broadcast %246 : f32 to vector<8x128xf32>
    %249 = arith.mulf %248, %247 : vector<8x128xf32>
    %250 = arith.addf %244, %249 : vector<8x128xf32>
    %c41 = arith.constant 41 : index
    %251 = memref.load %arg2[%c41] : memref<144xf32, #tpu.memory_space<smem>>
    %252 = vector.extract_strided_slice %245 {offsets = [1, 0], sizes = [8, 128], strides = [1, 1]} : vector<10x128xf32> to vector<8x128xf32>
    %253 = vector.broadcast %251 : f32 to vector<8x128xf32>
    %254 = arith.mulf %253, %252 : vector<8x128xf32>
    %255 = arith.addf %250, %254 : vector<8x128xf32>
    %c44 = arith.constant 44 : index
    %256 = memref.load %arg2[%c44] : memref<144xf32, #tpu.memory_space<smem>>
    %257 = vector.extract_strided_slice %245 {offsets = [2, 0], sizes = [8, 128], strides = [1, 1]} : vector<10x128xf32> to vector<8x128xf32>
    %258 = vector.broadcast %256 : f32 to vector<8x128xf32>
    %259 = arith.mulf %258, %257 : vector<8x128xf32>
    %260 = arith.addf %255, %259 : vector<8x128xf32>
    %c0_53 = arith.constant 0 : index
    %c5_54 = arith.constant 5 : index
    %c0_55 = arith.constant 0 : index
    %c0_56 = arith.constant 0 : index
    %261 = vector.load %arg3[%c0_53, %c5_54, %c0_55, %c0_56] : memref<1x16x8x128xf32, #tpu.memory_space<vmem>>, vector<1x1x8x128xf32>
    %262 = vector.shape_cast %261 : vector<1x1x8x128xf32> to vector<8x128xf32>
    %c0_57 = arith.constant 0 : index
    %c5_58 = arith.constant 5 : index
    %c0_59 = arith.constant 0 : index
    %c0_60 = arith.constant 0 : index
    %c0_61 = arith.constant 0 : index
    %263 = vector.load %arg4[%c0_57, %c5_58, %c0_59, %c0_60, %c0_61] : memref<1x16x1x2x128xf32, #tpu.memory_space<vmem>>, vector<1x1x1x2x128xf32>
    %264 = vector.shape_cast %263 : vector<1x1x1x2x128xf32> to vector<2x128xf32>
    %265 = tpu.concatenate %262, %264 in 0 : vector<8x128xf32>, vector<2x128xf32> -> vector<10x128xf32>
    %c45 = arith.constant 45 : index
    %266 = memref.load %arg2[%c45] : memref<144xf32, #tpu.memory_space<smem>>
    %267 = vector.extract_strided_slice %265 {offsets = [0, 0], sizes = [8, 128], strides = [1, 1]} : vector<10x128xf32> to vector<8x128xf32>
    %268 = vector.broadcast %266 : f32 to vector<8x128xf32>
    %269 = arith.mulf %268, %267 : vector<8x128xf32>
    %270 = arith.addf %260, %269 : vector<8x128xf32>
    %c48 = arith.constant 48 : index
    %271 = memref.load %arg2[%c48] : memref<144xf32, #tpu.memory_space<smem>>
    %272 = vector.extract_strided_slice %265 {offsets = [1, 0], sizes = [8, 128], strides = [1, 1]} : vector<10x128xf32> to vector<8x128xf32>
    %273 = vector.broadcast %271 : f32 to vector<8x128xf32>
    %274 = arith.mulf %273, %272 : vector<8x128xf32>
    %275 = arith.addf %270, %274 : vector<8x128xf32>
    %c51 = arith.constant 51 : index
    %276 = memref.load %arg2[%c51] : memref<144xf32, #tpu.memory_space<smem>>
    %277 = vector.extract_strided_slice %265 {offsets = [2, 0], sizes = [8, 128], strides = [1, 1]} : vector<10x128xf32> to vector<8x128xf32>
    %278 = vector.broadcast %276 : f32 to vector<8x128xf32>
    %279 = arith.mulf %278, %277 : vector<8x128xf32>
    %280 = arith.addf %275, %279 : vector<8x128xf32>
    %c127_i32_62 = arith.constant 127 : i32
    %281 = tpu.dynamic_rotate %265 by %c127_i32_62 dim 1 : vector<10x128xf32>, i32 -> vector<10x128xf32>
    %c46 = arith.constant 46 : index
    %282 = memref.load %arg2[%c46] : memref<144xf32, #tpu.memory_space<smem>>
    %283 = vector.extract_strided_slice %281 {offsets = [0, 0], sizes = [8, 128], strides = [1, 1]} : vector<10x128xf32> to vector<8x128xf32>
    %284 = vector.broadcast %282 : f32 to vector<8x128xf32>
    %285 = arith.mulf %284, %283 : vector<8x128xf32>
    %286 = arith.addf %280, %285 : vector<8x128xf32>
    %c49 = arith.constant 49 : index
    %287 = memref.load %arg2[%c49] : memref<144xf32, #tpu.memory_space<smem>>
    %288 = vector.extract_strided_slice %281 {offsets = [1, 0], sizes = [8, 128], strides = [1, 1]} : vector<10x128xf32> to vector<8x128xf32>
    %289 = vector.broadcast %287 : f32 to vector<8x128xf32>
    %290 = arith.mulf %289, %288 : vector<8x128xf32>
    %291 = arith.addf %286, %290 : vector<8x128xf32>
    %c52 = arith.constant 52 : index
    %292 = memref.load %arg2[%c52] : memref<144xf32, #tpu.memory_space<smem>>
    %293 = vector.extract_strided_slice %281 {offsets = [2, 0], sizes = [8, 128], strides = [1, 1]} : vector<10x128xf32> to vector<8x128xf32>
    %294 = vector.broadcast %292 : f32 to vector<8x128xf32>
    %295 = arith.mulf %294, %293 : vector<8x128xf32>
    %296 = arith.addf %291, %295 : vector<8x128xf32>
    %c126_i32_63 = arith.constant 126 : i32
    %297 = tpu.dynamic_rotate %265 by %c126_i32_63 dim 1 : vector<10x128xf32>, i32 -> vector<10x128xf32>
    %c47 = arith.constant 47 : index
    %298 = memref.load %arg2[%c47] : memref<144xf32, #tpu.memory_space<smem>>
    %299 = vector.extract_strided_slice %297 {offsets = [0, 0], sizes = [8, 128], strides = [1, 1]} : vector<10x128xf32> to vector<8x128xf32>
    %300 = vector.broadcast %298 : f32 to vector<8x128xf32>
    %301 = arith.mulf %300, %299 : vector<8x128xf32>
    %302 = arith.addf %296, %301 : vector<8x128xf32>
    %c50 = arith.constant 50 : index
    %303 = memref.load %arg2[%c50] : memref<144xf32, #tpu.memory_space<smem>>
    %304 = vector.extract_strided_slice %297 {offsets = [1, 0], sizes = [8, 128], strides = [1, 1]} : vector<10x128xf32> to vector<8x128xf32>
    %305 = vector.broadcast %303 : f32 to vector<8x128xf32>
    %306 = arith.mulf %305, %304 : vector<8x128xf32>
    %307 = arith.addf %302, %306 : vector<8x128xf32>
    %c53 = arith.constant 53 : index
    %308 = memref.load %arg2[%c53] : memref<144xf32, #tpu.memory_space<smem>>
    %309 = vector.extract_strided_slice %297 {offsets = [2, 0], sizes = [8, 128], strides = [1, 1]} : vector<10x128xf32> to vector<8x128xf32>
    %310 = vector.broadcast %308 : f32 to vector<8x128xf32>
    %311 = arith.mulf %310, %309 : vector<8x128xf32>
    %312 = arith.addf %307, %311 : vector<8x128xf32>
    %c0_64 = arith.constant 0 : index
    %c6_65 = arith.constant 6 : index
    %c0_66 = arith.constant 0 : index
    %c0_67 = arith.constant 0 : index
    %313 = vector.load %arg3[%c0_64, %c6_65, %c0_66, %c0_67] : memref<1x16x8x128xf32, #tpu.memory_space<vmem>>, vector<1x1x8x128xf32>
    %314 = vector.shape_cast %313 : vector<1x1x8x128xf32> to vector<8x128xf32>
    %c0_68 = arith.constant 0 : index
    %c6_69 = arith.constant 6 : index
    %c0_70 = arith.constant 0 : index
    %c0_71 = arith.constant 0 : index
    %c0_72 = arith.constant 0 : index
    %315 = vector.load %arg4[%c0_68, %c6_69, %c0_70, %c0_71, %c0_72] : memref<1x16x1x2x128xf32, #tpu.memory_space<vmem>>, vector<1x1x1x2x128xf32>
    %316 = vector.shape_cast %315 : vector<1x1x1x2x128xf32> to vector<2x128xf32>
    %317 = tpu.concatenate %314, %316 in 0 : vector<8x128xf32>, vector<2x128xf32> -> vector<10x128xf32>
    %c54 = arith.constant 54 : index
    %318 = memref.load %arg2[%c54] : memref<144xf32, #tpu.memory_space<smem>>
    %319 = vector.extract_strided_slice %317 {offsets = [0, 0], sizes = [8, 128], strides = [1, 1]} : vector<10x128xf32> to vector<8x128xf32>
    %320 = vector.broadcast %318 : f32 to vector<8x128xf32>
    %321 = arith.mulf %320, %319 : vector<8x128xf32>
    %322 = arith.addf %312, %321 : vector<8x128xf32>
    %c57 = arith.constant 57 : index
    %323 = memref.load %arg2[%c57] : memref<144xf32, #tpu.memory_space<smem>>
    %324 = vector.extract_strided_slice %317 {offsets = [1, 0], sizes = [8, 128], strides = [1, 1]} : vector<10x128xf32> to vector<8x128xf32>
    %325 = vector.broadcast %323 : f32 to vector<8x128xf32>
    %326 = arith.mulf %325, %324 : vector<8x128xf32>
    %327 = arith.addf %322, %326 : vector<8x128xf32>
    %c60 = arith.constant 60 : index
    %328 = memref.load %arg2[%c60] : memref<144xf32, #tpu.memory_space<smem>>
    %329 = vector.extract_strided_slice %317 {offsets = [2, 0], sizes = [8, 128], strides = [1, 1]} : vector<10x128xf32> to vector<8x128xf32>
    %330 = vector.broadcast %328 : f32 to vector<8x128xf32>
    %331 = arith.mulf %330, %329 : vector<8x128xf32>
    %332 = arith.addf %327, %331 : vector<8x128xf32>
    %c127_i32_73 = arith.constant 127 : i32
    %333 = tpu.dynamic_rotate %317 by %c127_i32_73 dim 1 : vector<10x128xf32>, i32 -> vector<10x128xf32>
    %c55 = arith.constant 55 : index
    %334 = memref.load %arg2[%c55] : memref<144xf32, #tpu.memory_space<smem>>
    %335 = vector.extract_strided_slice %333 {offsets = [0, 0], sizes = [8, 128], strides = [1, 1]} : vector<10x128xf32> to vector<8x128xf32>
    %336 = vector.broadcast %334 : f32 to vector<8x128xf32>
    %337 = arith.mulf %336, %335 : vector<8x128xf32>
    %338 = arith.addf %332, %337 : vector<8x128xf32>
    %c58 = arith.constant 58 : index
    %339 = memref.load %arg2[%c58] : memref<144xf32, #tpu.memory_space<smem>>
    %340 = vector.extract_strided_slice %333 {offsets = [1, 0], sizes = [8, 128], strides = [1, 1]} : vector<10x128xf32> to vector<8x128xf32>
    %341 = vector.broadcast %339 : f32 to vector<8x128xf32>
    %342 = arith.mulf %341, %340 : vector<8x128xf32>
    %343 = arith.addf %338, %342 : vector<8x128xf32>
    %c61 = arith.constant 61 : index
    %344 = memref.load %arg2[%c61] : memref<144xf32, #tpu.memory_space<smem>>
    %345 = vector.extract_strided_slice %333 {offsets = [2, 0], sizes = [8, 128], strides = [1, 1]} : vector<10x128xf32> to vector<8x128xf32>
    %346 = vector.broadcast %344 : f32 to vector<8x128xf32>
    %347 = arith.mulf %346, %345 : vector<8x128xf32>
    %348 = arith.addf %343, %347 : vector<8x128xf32>
    %c126_i32_74 = arith.constant 126 : i32
    %349 = tpu.dynamic_rotate %317 by %c126_i32_74 dim 1 : vector<10x128xf32>, i32 -> vector<10x128xf32>
    %c56 = arith.constant 56 : index
    %350 = memref.load %arg2[%c56] : memref<144xf32, #tpu.memory_space<smem>>
    %351 = vector.extract_strided_slice %349 {offsets = [0, 0], sizes = [8, 128], strides = [1, 1]} : vector<10x128xf32> to vector<8x128xf32>
    %352 = vector.broadcast %350 : f32 to vector<8x128xf32>
    %353 = arith.mulf %352, %351 : vector<8x128xf32>
    %354 = arith.addf %348, %353 : vector<8x128xf32>
    %c59 = arith.constant 59 : index
    %355 = memref.load %arg2[%c59] : memref<144xf32, #tpu.memory_space<smem>>
    %356 = vector.extract_strided_slice %349 {offsets = [1, 0], sizes = [8, 128], strides = [1, 1]} : vector<10x128xf32> to vector<8x128xf32>
    %357 = vector.broadcast %355 : f32 to vector<8x128xf32>
    %358 = arith.mulf %357, %356 : vector<8x128xf32>
    %359 = arith.addf %354, %358 : vector<8x128xf32>
    %c62 = arith.constant 62 : index
    %360 = memref.load %arg2[%c62] : memref<144xf32, #tpu.memory_space<smem>>
    %361 = vector.extract_strided_slice %349 {offsets = [2, 0], sizes = [8, 128], strides = [1, 1]} : vector<10x128xf32> to vector<8x128xf32>
    %362 = vector.broadcast %360 : f32 to vector<8x128xf32>
    %363 = arith.mulf %362, %361 : vector<8x128xf32>
    %364 = arith.addf %359, %363 : vector<8x128xf32>
    %c0_75 = arith.constant 0 : index
    %c7_76 = arith.constant 7 : index
    %c0_77 = arith.constant 0 : index
    %c0_78 = arith.constant 0 : index
    %365 = vector.load %arg3[%c0_75, %c7_76, %c0_77, %c0_78] : memref<1x16x8x128xf32, #tpu.memory_space<vmem>>, vector<1x1x8x128xf32>
    %366 = vector.shape_cast %365 : vector<1x1x8x128xf32> to vector<8x128xf32>
    %c0_79 = arith.constant 0 : index
    %c7_80 = arith.constant 7 : index
    %c0_81 = arith.constant 0 : index
    %c0_82 = arith.constant 0 : index
    %c0_83 = arith.constant 0 : index
    %367 = vector.load %arg4[%c0_79, %c7_80, %c0_81, %c0_82, %c0_83] : memref<1x16x1x2x128xf32, #tpu.memory_space<vmem>>, vector<1x1x1x2x128xf32>
    %368 = vector.shape_cast %367 : vector<1x1x1x2x128xf32> to vector<2x128xf32>
    %369 = tpu.concatenate %366, %368 in 0 : vector<8x128xf32>, vector<2x128xf32> -> vector<10x128xf32>
    %c63 = arith.constant 63 : index
    %370 = memref.load %arg2[%c63] : memref<144xf32, #tpu.memory_space<smem>>
    %371 = vector.extract_strided_slice %369 {offsets = [0, 0], sizes = [8, 128], strides = [1, 1]} : vector<10x128xf32> to vector<8x128xf32>
    %372 = vector.broadcast %370 : f32 to vector<8x128xf32>
    %373 = arith.mulf %372, %371 : vector<8x128xf32>
    %374 = arith.addf %364, %373 : vector<8x128xf32>
    %c66 = arith.constant 66 : index
    %375 = memref.load %arg2[%c66] : memref<144xf32, #tpu.memory_space<smem>>
    %376 = vector.extract_strided_slice %369 {offsets = [1, 0], sizes = [8, 128], strides = [1, 1]} : vector<10x128xf32> to vector<8x128xf32>
    %377 = vector.broadcast %375 : f32 to vector<8x128xf32>
    %378 = arith.mulf %377, %376 : vector<8x128xf32>
    %379 = arith.addf %374, %378 : vector<8x128xf32>
    %c69 = arith.constant 69 : index
    %380 = memref.load %arg2[%c69] : memref<144xf32, #tpu.memory_space<smem>>
    %381 = vector.extract_strided_slice %369 {offsets = [2, 0], sizes = [8, 128], strides = [1, 1]} : vector<10x128xf32> to vector<8x128xf32>
    %382 = vector.broadcast %380 : f32 to vector<8x128xf32>
    %383 = arith.mulf %382, %381 : vector<8x128xf32>
    %384 = arith.addf %379, %383 : vector<8x128xf32>
    %c127_i32_84 = arith.constant 127 : i32
    %385 = tpu.dynamic_rotate %369 by %c127_i32_84 dim 1 : vector<10x128xf32>, i32 -> vector<10x128xf32>
    %c64 = arith.constant 64 : index
    %386 = memref.load %arg2[%c64] : memref<144xf32, #tpu.memory_space<smem>>
    %387 = vector.extract_strided_slice %385 {offsets = [0, 0], sizes = [8, 128], strides = [1, 1]} : vector<10x128xf32> to vector<8x128xf32>
    %388 = vector.broadcast %386 : f32 to vector<8x128xf32>
    %389 = arith.mulf %388, %387 : vector<8x128xf32>
    %390 = arith.addf %384, %389 : vector<8x128xf32>
    %c67 = arith.constant 67 : index
    %391 = memref.load %arg2[%c67] : memref<144xf32, #tpu.memory_space<smem>>
    %392 = vector.extract_strided_slice %385 {offsets = [1, 0], sizes = [8, 128], strides = [1, 1]} : vector<10x128xf32> to vector<8x128xf32>
    %393 = vector.broadcast %391 : f32 to vector<8x128xf32>
    %394 = arith.mulf %393, %392 : vector<8x128xf32>
    %395 = arith.addf %390, %394 : vector<8x128xf32>
    %c70 = arith.constant 70 : index
    %396 = memref.load %arg2[%c70] : memref<144xf32, #tpu.memory_space<smem>>
    %397 = vector.extract_strided_slice %385 {offsets = [2, 0], sizes = [8, 128], strides = [1, 1]} : vector<10x128xf32> to vector<8x128xf32>
    %398 = vector.broadcast %396 : f32 to vector<8x128xf32>
    %399 = arith.mulf %398, %397 : vector<8x128xf32>
    %400 = arith.addf %395, %399 : vector<8x128xf32>
    %c126_i32_85 = arith.constant 126 : i32
    %401 = tpu.dynamic_rotate %369 by %c126_i32_85 dim 1 : vector<10x128xf32>, i32 -> vector<10x128xf32>
    %c65 = arith.constant 65 : index
    %402 = memref.load %arg2[%c65] : memref<144xf32, #tpu.memory_space<smem>>
    %403 = vector.extract_strided_slice %401 {offsets = [0, 0], sizes = [8, 128], strides = [1, 1]} : vector<10x128xf32> to vector<8x128xf32>
    %404 = vector.broadcast %402 : f32 to vector<8x128xf32>
    %405 = arith.mulf %404, %403 : vector<8x128xf32>
    %406 = arith.addf %400, %405 : vector<8x128xf32>
    %c68 = arith.constant 68 : index
    %407 = memref.load %arg2[%c68] : memref<144xf32, #tpu.memory_space<smem>>
    %408 = vector.extract_strided_slice %401 {offsets = [1, 0], sizes = [8, 128], strides = [1, 1]} : vector<10x128xf32> to vector<8x128xf32>
    %409 = vector.broadcast %407 : f32 to vector<8x128xf32>
    %410 = arith.mulf %409, %408 : vector<8x128xf32>
    %411 = arith.addf %406, %410 : vector<8x128xf32>
    %c71 = arith.constant 71 : index
    %412 = memref.load %arg2[%c71] : memref<144xf32, #tpu.memory_space<smem>>
    %413 = vector.extract_strided_slice %401 {offsets = [2, 0], sizes = [8, 128], strides = [1, 1]} : vector<10x128xf32> to vector<8x128xf32>
    %414 = vector.broadcast %412 : f32 to vector<8x128xf32>
    %415 = arith.mulf %414, %413 : vector<8x128xf32>
    %416 = arith.addf %411, %415 : vector<8x128xf32>
    %c0_86 = arith.constant 0 : index
    %c8_87 = arith.constant 8 : index
    %c0_88 = arith.constant 0 : index
    %c0_89 = arith.constant 0 : index
    %417 = vector.load %arg3[%c0_86, %c8_87, %c0_88, %c0_89] : memref<1x16x8x128xf32, #tpu.memory_space<vmem>>, vector<1x1x8x128xf32>
    %418 = vector.shape_cast %417 : vector<1x1x8x128xf32> to vector<8x128xf32>
    %c0_90 = arith.constant 0 : index
    %c8_91 = arith.constant 8 : index
    %c0_92 = arith.constant 0 : index
    %c0_93 = arith.constant 0 : index
    %c0_94 = arith.constant 0 : index
    %419 = vector.load %arg4[%c0_90, %c8_91, %c0_92, %c0_93, %c0_94] : memref<1x16x1x2x128xf32, #tpu.memory_space<vmem>>, vector<1x1x1x2x128xf32>
    %420 = vector.shape_cast %419 : vector<1x1x1x2x128xf32> to vector<2x128xf32>
    %421 = tpu.concatenate %418, %420 in 0 : vector<8x128xf32>, vector<2x128xf32> -> vector<10x128xf32>
    %c72 = arith.constant 72 : index
    %422 = memref.load %arg2[%c72] : memref<144xf32, #tpu.memory_space<smem>>
    %423 = vector.extract_strided_slice %421 {offsets = [0, 0], sizes = [8, 128], strides = [1, 1]} : vector<10x128xf32> to vector<8x128xf32>
    %424 = vector.broadcast %422 : f32 to vector<8x128xf32>
    %425 = arith.mulf %424, %423 : vector<8x128xf32>
    %426 = arith.addf %416, %425 : vector<8x128xf32>
    %c75 = arith.constant 75 : index
    %427 = memref.load %arg2[%c75] : memref<144xf32, #tpu.memory_space<smem>>
    %428 = vector.extract_strided_slice %421 {offsets = [1, 0], sizes = [8, 128], strides = [1, 1]} : vector<10x128xf32> to vector<8x128xf32>
    %429 = vector.broadcast %427 : f32 to vector<8x128xf32>
    %430 = arith.mulf %429, %428 : vector<8x128xf32>
    %431 = arith.addf %426, %430 : vector<8x128xf32>
    %c78 = arith.constant 78 : index
    %432 = memref.load %arg2[%c78] : memref<144xf32, #tpu.memory_space<smem>>
    %433 = vector.extract_strided_slice %421 {offsets = [2, 0], sizes = [8, 128], strides = [1, 1]} : vector<10x128xf32> to vector<8x128xf32>
    %434 = vector.broadcast %432 : f32 to vector<8x128xf32>
    %435 = arith.mulf %434, %433 : vector<8x128xf32>
    %436 = arith.addf %431, %435 : vector<8x128xf32>
    %c127_i32_95 = arith.constant 127 : i32
    %437 = tpu.dynamic_rotate %421 by %c127_i32_95 dim 1 : vector<10x128xf32>, i32 -> vector<10x128xf32>
    %c73 = arith.constant 73 : index
    %438 = memref.load %arg2[%c73] : memref<144xf32, #tpu.memory_space<smem>>
    %439 = vector.extract_strided_slice %437 {offsets = [0, 0], sizes = [8, 128], strides = [1, 1]} : vector<10x128xf32> to vector<8x128xf32>
    %440 = vector.broadcast %438 : f32 to vector<8x128xf32>
    %441 = arith.mulf %440, %439 : vector<8x128xf32>
    %442 = arith.addf %436, %441 : vector<8x128xf32>
    %c76 = arith.constant 76 : index
    %443 = memref.load %arg2[%c76] : memref<144xf32, #tpu.memory_space<smem>>
    %444 = vector.extract_strided_slice %437 {offsets = [1, 0], sizes = [8, 128], strides = [1, 1]} : vector<10x128xf32> to vector<8x128xf32>
    %445 = vector.broadcast %443 : f32 to vector<8x128xf32>
    %446 = arith.mulf %445, %444 : vector<8x128xf32>
    %447 = arith.addf %442, %446 : vector<8x128xf32>
    %c79 = arith.constant 79 : index
    %448 = memref.load %arg2[%c79] : memref<144xf32, #tpu.memory_space<smem>>
    %449 = vector.extract_strided_slice %437 {offsets = [2, 0], sizes = [8, 128], strides = [1, 1]} : vector<10x128xf32> to vector<8x128xf32>
    %450 = vector.broadcast %448 : f32 to vector<8x128xf32>
    %451 = arith.mulf %450, %449 : vector<8x128xf32>
    %452 = arith.addf %447, %451 : vector<8x128xf32>
    %c126_i32_96 = arith.constant 126 : i32
    %453 = tpu.dynamic_rotate %421 by %c126_i32_96 dim 1 : vector<10x128xf32>, i32 -> vector<10x128xf32>
    %c74 = arith.constant 74 : index
    %454 = memref.load %arg2[%c74] : memref<144xf32, #tpu.memory_space<smem>>
    %455 = vector.extract_strided_slice %453 {offsets = [0, 0], sizes = [8, 128], strides = [1, 1]} : vector<10x128xf32> to vector<8x128xf32>
    %456 = vector.broadcast %454 : f32 to vector<8x128xf32>
    %457 = arith.mulf %456, %455 : vector<8x128xf32>
    %458 = arith.addf %452, %457 : vector<8x128xf32>
    %c77 = arith.constant 77 : index
    %459 = memref.load %arg2[%c77] : memref<144xf32, #tpu.memory_space<smem>>
    %460 = vector.extract_strided_slice %453 {offsets = [1, 0], sizes = [8, 128], strides = [1, 1]} : vector<10x128xf32> to vector<8x128xf32>
    %461 = vector.broadcast %459 : f32 to vector<8x128xf32>
    %462 = arith.mulf %461, %460 : vector<8x128xf32>
    %463 = arith.addf %458, %462 : vector<8x128xf32>
    %c80 = arith.constant 80 : index
    %464 = memref.load %arg2[%c80] : memref<144xf32, #tpu.memory_space<smem>>
    %465 = vector.extract_strided_slice %453 {offsets = [2, 0], sizes = [8, 128], strides = [1, 1]} : vector<10x128xf32> to vector<8x128xf32>
    %466 = vector.broadcast %464 : f32 to vector<8x128xf32>
    %467 = arith.mulf %466, %465 : vector<8x128xf32>
    %468 = arith.addf %463, %467 : vector<8x128xf32>
    %c0_97 = arith.constant 0 : index
    %c9_98 = arith.constant 9 : index
    %c0_99 = arith.constant 0 : index
    %c0_100 = arith.constant 0 : index
    %469 = vector.load %arg3[%c0_97, %c9_98, %c0_99, %c0_100] : memref<1x16x8x128xf32, #tpu.memory_space<vmem>>, vector<1x1x8x128xf32>
    %470 = vector.shape_cast %469 : vector<1x1x8x128xf32> to vector<8x128xf32>
    %c0_101 = arith.constant 0 : index
    %c9_102 = arith.constant 9 : index
    %c0_103 = arith.constant 0 : index
    %c0_104 = arith.constant 0 : index
    %c0_105 = arith.constant 0 : index
    %471 = vector.load %arg4[%c0_101, %c9_102, %c0_103, %c0_104, %c0_105] : memref<1x16x1x2x128xf32, #tpu.memory_space<vmem>>, vector<1x1x1x2x128xf32>
    %472 = vector.shape_cast %471 : vector<1x1x1x2x128xf32> to vector<2x128xf32>
    %473 = tpu.concatenate %470, %472 in 0 : vector<8x128xf32>, vector<2x128xf32> -> vector<10x128xf32>
    %c81 = arith.constant 81 : index
    %474 = memref.load %arg2[%c81] : memref<144xf32, #tpu.memory_space<smem>>
    %475 = vector.extract_strided_slice %473 {offsets = [0, 0], sizes = [8, 128], strides = [1, 1]} : vector<10x128xf32> to vector<8x128xf32>
    %476 = vector.broadcast %474 : f32 to vector<8x128xf32>
    %477 = arith.mulf %476, %475 : vector<8x128xf32>
    %478 = arith.addf %468, %477 : vector<8x128xf32>
    %c84 = arith.constant 84 : index
    %479 = memref.load %arg2[%c84] : memref<144xf32, #tpu.memory_space<smem>>
    %480 = vector.extract_strided_slice %473 {offsets = [1, 0], sizes = [8, 128], strides = [1, 1]} : vector<10x128xf32> to vector<8x128xf32>
    %481 = vector.broadcast %479 : f32 to vector<8x128xf32>
    %482 = arith.mulf %481, %480 : vector<8x128xf32>
    %483 = arith.addf %478, %482 : vector<8x128xf32>
    %c87 = arith.constant 87 : index
    %484 = memref.load %arg2[%c87] : memref<144xf32, #tpu.memory_space<smem>>
    %485 = vector.extract_strided_slice %473 {offsets = [2, 0], sizes = [8, 128], strides = [1, 1]} : vector<10x128xf32> to vector<8x128xf32>
    %486 = vector.broadcast %484 : f32 to vector<8x128xf32>
    %487 = arith.mulf %486, %485 : vector<8x128xf32>
    %488 = arith.addf %483, %487 : vector<8x128xf32>
    %c127_i32_106 = arith.constant 127 : i32
    %489 = tpu.dynamic_rotate %473 by %c127_i32_106 dim 1 : vector<10x128xf32>, i32 -> vector<10x128xf32>
    %c82 = arith.constant 82 : index
    %490 = memref.load %arg2[%c82] : memref<144xf32, #tpu.memory_space<smem>>
    %491 = vector.extract_strided_slice %489 {offsets = [0, 0], sizes = [8, 128], strides = [1, 1]} : vector<10x128xf32> to vector<8x128xf32>
    %492 = vector.broadcast %490 : f32 to vector<8x128xf32>
    %493 = arith.mulf %492, %491 : vector<8x128xf32>
    %494 = arith.addf %488, %493 : vector<8x128xf32>
    %c85 = arith.constant 85 : index
    %495 = memref.load %arg2[%c85] : memref<144xf32, #tpu.memory_space<smem>>
    %496 = vector.extract_strided_slice %489 {offsets = [1, 0], sizes = [8, 128], strides = [1, 1]} : vector<10x128xf32> to vector<8x128xf32>
    %497 = vector.broadcast %495 : f32 to vector<8x128xf32>
    %498 = arith.mulf %497, %496 : vector<8x128xf32>
    %499 = arith.addf %494, %498 : vector<8x128xf32>
    %c88 = arith.constant 88 : index
    %500 = memref.load %arg2[%c88] : memref<144xf32, #tpu.memory_space<smem>>
    %501 = vector.extract_strided_slice %489 {offsets = [2, 0], sizes = [8, 128], strides = [1, 1]} : vector<10x128xf32> to vector<8x128xf32>
    %502 = vector.broadcast %500 : f32 to vector<8x128xf32>
    %503 = arith.mulf %502, %501 : vector<8x128xf32>
    %504 = arith.addf %499, %503 : vector<8x128xf32>
    %c126_i32_107 = arith.constant 126 : i32
    %505 = tpu.dynamic_rotate %473 by %c126_i32_107 dim 1 : vector<10x128xf32>, i32 -> vector<10x128xf32>
    %c83 = arith.constant 83 : index
    %506 = memref.load %arg2[%c83] : memref<144xf32, #tpu.memory_space<smem>>
    %507 = vector.extract_strided_slice %505 {offsets = [0, 0], sizes = [8, 128], strides = [1, 1]} : vector<10x128xf32> to vector<8x128xf32>
    %508 = vector.broadcast %506 : f32 to vector<8x128xf32>
    %509 = arith.mulf %508, %507 : vector<8x128xf32>
    %510 = arith.addf %504, %509 : vector<8x128xf32>
    %c86 = arith.constant 86 : index
    %511 = memref.load %arg2[%c86] : memref<144xf32, #tpu.memory_space<smem>>
    %512 = vector.extract_strided_slice %505 {offsets = [1, 0], sizes = [8, 128], strides = [1, 1]} : vector<10x128xf32> to vector<8x128xf32>
    %513 = vector.broadcast %511 : f32 to vector<8x128xf32>
    %514 = arith.mulf %513, %512 : vector<8x128xf32>
    %515 = arith.addf %510, %514 : vector<8x128xf32>
    %c89 = arith.constant 89 : index
    %516 = memref.load %arg2[%c89] : memref<144xf32, #tpu.memory_space<smem>>
    %517 = vector.extract_strided_slice %505 {offsets = [2, 0], sizes = [8, 128], strides = [1, 1]} : vector<10x128xf32> to vector<8x128xf32>
    %518 = vector.broadcast %516 : f32 to vector<8x128xf32>
    %519 = arith.mulf %518, %517 : vector<8x128xf32>
    %520 = arith.addf %515, %519 : vector<8x128xf32>
    %c0_108 = arith.constant 0 : index
    %c10_109 = arith.constant 10 : index
    %c0_110 = arith.constant 0 : index
    %c0_111 = arith.constant 0 : index
    %521 = vector.load %arg3[%c0_108, %c10_109, %c0_110, %c0_111] : memref<1x16x8x128xf32, #tpu.memory_space<vmem>>, vector<1x1x8x128xf32>
    %522 = vector.shape_cast %521 : vector<1x1x8x128xf32> to vector<8x128xf32>
    %c0_112 = arith.constant 0 : index
    %c10_113 = arith.constant 10 : index
    %c0_114 = arith.constant 0 : index
    %c0_115 = arith.constant 0 : index
    %c0_116 = arith.constant 0 : index
    %523 = vector.load %arg4[%c0_112, %c10_113, %c0_114, %c0_115, %c0_116] : memref<1x16x1x2x128xf32, #tpu.memory_space<vmem>>, vector<1x1x1x2x128xf32>
    %524 = vector.shape_cast %523 : vector<1x1x1x2x128xf32> to vector<2x128xf32>
    %525 = tpu.concatenate %522, %524 in 0 : vector<8x128xf32>, vector<2x128xf32> -> vector<10x128xf32>
    %c90 = arith.constant 90 : index
    %526 = memref.load %arg2[%c90] : memref<144xf32, #tpu.memory_space<smem>>
    %527 = vector.extract_strided_slice %525 {offsets = [0, 0], sizes = [8, 128], strides = [1, 1]} : vector<10x128xf32> to vector<8x128xf32>
    %528 = vector.broadcast %526 : f32 to vector<8x128xf32>
    %529 = arith.mulf %528, %527 : vector<8x128xf32>
    %530 = arith.addf %520, %529 : vector<8x128xf32>
    %c93 = arith.constant 93 : index
    %531 = memref.load %arg2[%c93] : memref<144xf32, #tpu.memory_space<smem>>
    %532 = vector.extract_strided_slice %525 {offsets = [1, 0], sizes = [8, 128], strides = [1, 1]} : vector<10x128xf32> to vector<8x128xf32>
    %533 = vector.broadcast %531 : f32 to vector<8x128xf32>
    %534 = arith.mulf %533, %532 : vector<8x128xf32>
    %535 = arith.addf %530, %534 : vector<8x128xf32>
    %c96 = arith.constant 96 : index
    %536 = memref.load %arg2[%c96] : memref<144xf32, #tpu.memory_space<smem>>
    %537 = vector.extract_strided_slice %525 {offsets = [2, 0], sizes = [8, 128], strides = [1, 1]} : vector<10x128xf32> to vector<8x128xf32>
    %538 = vector.broadcast %536 : f32 to vector<8x128xf32>
    %539 = arith.mulf %538, %537 : vector<8x128xf32>
    %540 = arith.addf %535, %539 : vector<8x128xf32>
    %c127_i32_117 = arith.constant 127 : i32
    %541 = tpu.dynamic_rotate %525 by %c127_i32_117 dim 1 : vector<10x128xf32>, i32 -> vector<10x128xf32>
    %c91 = arith.constant 91 : index
    %542 = memref.load %arg2[%c91] : memref<144xf32, #tpu.memory_space<smem>>
    %543 = vector.extract_strided_slice %541 {offsets = [0, 0], sizes = [8, 128], strides = [1, 1]} : vector<10x128xf32> to vector<8x128xf32>
    %544 = vector.broadcast %542 : f32 to vector<8x128xf32>
    %545 = arith.mulf %544, %543 : vector<8x128xf32>
    %546 = arith.addf %540, %545 : vector<8x128xf32>
    %c94 = arith.constant 94 : index
    %547 = memref.load %arg2[%c94] : memref<144xf32, #tpu.memory_space<smem>>
    %548 = vector.extract_strided_slice %541 {offsets = [1, 0], sizes = [8, 128], strides = [1, 1]} : vector<10x128xf32> to vector<8x128xf32>
    %549 = vector.broadcast %547 : f32 to vector<8x128xf32>
    %550 = arith.mulf %549, %548 : vector<8x128xf32>
    %551 = arith.addf %546, %550 : vector<8x128xf32>
    %c97 = arith.constant 97 : index
    %552 = memref.load %arg2[%c97] : memref<144xf32, #tpu.memory_space<smem>>
    %553 = vector.extract_strided_slice %541 {offsets = [2, 0], sizes = [8, 128], strides = [1, 1]} : vector<10x128xf32> to vector<8x128xf32>
    %554 = vector.broadcast %552 : f32 to vector<8x128xf32>
    %555 = arith.mulf %554, %553 : vector<8x128xf32>
    %556 = arith.addf %551, %555 : vector<8x128xf32>
    %c126_i32_118 = arith.constant 126 : i32
    %557 = tpu.dynamic_rotate %525 by %c126_i32_118 dim 1 : vector<10x128xf32>, i32 -> vector<10x128xf32>
    %c92 = arith.constant 92 : index
    %558 = memref.load %arg2[%c92] : memref<144xf32, #tpu.memory_space<smem>>
    %559 = vector.extract_strided_slice %557 {offsets = [0, 0], sizes = [8, 128], strides = [1, 1]} : vector<10x128xf32> to vector<8x128xf32>
    %560 = vector.broadcast %558 : f32 to vector<8x128xf32>
    %561 = arith.mulf %560, %559 : vector<8x128xf32>
    %562 = arith.addf %556, %561 : vector<8x128xf32>
    %c95 = arith.constant 95 : index
    %563 = memref.load %arg2[%c95] : memref<144xf32, #tpu.memory_space<smem>>
    %564 = vector.extract_strided_slice %557 {offsets = [1, 0], sizes = [8, 128], strides = [1, 1]} : vector<10x128xf32> to vector<8x128xf32>
    %565 = vector.broadcast %563 : f32 to vector<8x128xf32>
    %566 = arith.mulf %565, %564 : vector<8x128xf32>
    %567 = arith.addf %562, %566 : vector<8x128xf32>
    %c98 = arith.constant 98 : index
    %568 = memref.load %arg2[%c98] : memref<144xf32, #tpu.memory_space<smem>>
    %569 = vector.extract_strided_slice %557 {offsets = [2, 0], sizes = [8, 128], strides = [1, 1]} : vector<10x128xf32> to vector<8x128xf32>
    %570 = vector.broadcast %568 : f32 to vector<8x128xf32>
    %571 = arith.mulf %570, %569 : vector<8x128xf32>
    %572 = arith.addf %567, %571 : vector<8x128xf32>
    %c0_119 = arith.constant 0 : index
    %c11_120 = arith.constant 11 : index
    %c0_121 = arith.constant 0 : index
    %c0_122 = arith.constant 0 : index
    %573 = vector.load %arg3[%c0_119, %c11_120, %c0_121, %c0_122] : memref<1x16x8x128xf32, #tpu.memory_space<vmem>>, vector<1x1x8x128xf32>
    %574 = vector.shape_cast %573 : vector<1x1x8x128xf32> to vector<8x128xf32>
    %c0_123 = arith.constant 0 : index
    %c11_124 = arith.constant 11 : index
    %c0_125 = arith.constant 0 : index
    %c0_126 = arith.constant 0 : index
    %c0_127 = arith.constant 0 : index
    %575 = vector.load %arg4[%c0_123, %c11_124, %c0_125, %c0_126, %c0_127] : memref<1x16x1x2x128xf32, #tpu.memory_space<vmem>>, vector<1x1x1x2x128xf32>
    %576 = vector.shape_cast %575 : vector<1x1x1x2x128xf32> to vector<2x128xf32>
    %577 = tpu.concatenate %574, %576 in 0 : vector<8x128xf32>, vector<2x128xf32> -> vector<10x128xf32>
    %c99 = arith.constant 99 : index
    %578 = memref.load %arg2[%c99] : memref<144xf32, #tpu.memory_space<smem>>
    %579 = vector.extract_strided_slice %577 {offsets = [0, 0], sizes = [8, 128], strides = [1, 1]} : vector<10x128xf32> to vector<8x128xf32>
    %580 = vector.broadcast %578 : f32 to vector<8x128xf32>
    %581 = arith.mulf %580, %579 : vector<8x128xf32>
    %582 = arith.addf %572, %581 : vector<8x128xf32>
    %c102 = arith.constant 102 : index
    %583 = memref.load %arg2[%c102] : memref<144xf32, #tpu.memory_space<smem>>
    %584 = vector.extract_strided_slice %577 {offsets = [1, 0], sizes = [8, 128], strides = [1, 1]} : vector<10x128xf32> to vector<8x128xf32>
    %585 = vector.broadcast %583 : f32 to vector<8x128xf32>
    %586 = arith.mulf %585, %584 : vector<8x128xf32>
    %587 = arith.addf %582, %586 : vector<8x128xf32>
    %c105 = arith.constant 105 : index
    %588 = memref.load %arg2[%c105] : memref<144xf32, #tpu.memory_space<smem>>
    %589 = vector.extract_strided_slice %577 {offsets = [2, 0], sizes = [8, 128], strides = [1, 1]} : vector<10x128xf32> to vector<8x128xf32>
    %590 = vector.broadcast %588 : f32 to vector<8x128xf32>
    %591 = arith.mulf %590, %589 : vector<8x128xf32>
    %592 = arith.addf %587, %591 : vector<8x128xf32>
    %c127_i32_128 = arith.constant 127 : i32
    %593 = tpu.dynamic_rotate %577 by %c127_i32_128 dim 1 : vector<10x128xf32>, i32 -> vector<10x128xf32>
    %c100 = arith.constant 100 : index
    %594 = memref.load %arg2[%c100] : memref<144xf32, #tpu.memory_space<smem>>
    %595 = vector.extract_strided_slice %593 {offsets = [0, 0], sizes = [8, 128], strides = [1, 1]} : vector<10x128xf32> to vector<8x128xf32>
    %596 = vector.broadcast %594 : f32 to vector<8x128xf32>
    %597 = arith.mulf %596, %595 : vector<8x128xf32>
    %598 = arith.addf %592, %597 : vector<8x128xf32>
    %c103 = arith.constant 103 : index
    %599 = memref.load %arg2[%c103] : memref<144xf32, #tpu.memory_space<smem>>
    %600 = vector.extract_strided_slice %593 {offsets = [1, 0], sizes = [8, 128], strides = [1, 1]} : vector<10x128xf32> to vector<8x128xf32>
    %601 = vector.broadcast %599 : f32 to vector<8x128xf32>
    %602 = arith.mulf %601, %600 : vector<8x128xf32>
    %603 = arith.addf %598, %602 : vector<8x128xf32>
    %c106 = arith.constant 106 : index
    %604 = memref.load %arg2[%c106] : memref<144xf32, #tpu.memory_space<smem>>
    %605 = vector.extract_strided_slice %593 {offsets = [2, 0], sizes = [8, 128], strides = [1, 1]} : vector<10x128xf32> to vector<8x128xf32>
    %606 = vector.broadcast %604 : f32 to vector<8x128xf32>
    %607 = arith.mulf %606, %605 : vector<8x128xf32>
    %608 = arith.addf %603, %607 : vector<8x128xf32>
    %c126_i32_129 = arith.constant 126 : i32
    %609 = tpu.dynamic_rotate %577 by %c126_i32_129 dim 1 : vector<10x128xf32>, i32 -> vector<10x128xf32>
    %c101 = arith.constant 101 : index
    %610 = memref.load %arg2[%c101] : memref<144xf32, #tpu.memory_space<smem>>
    %611 = vector.extract_strided_slice %609 {offsets = [0, 0], sizes = [8, 128], strides = [1, 1]} : vector<10x128xf32> to vector<8x128xf32>
    %612 = vector.broadcast %610 : f32 to vector<8x128xf32>
    %613 = arith.mulf %612, %611 : vector<8x128xf32>
    %614 = arith.addf %608, %613 : vector<8x128xf32>
    %c104 = arith.constant 104 : index
    %615 = memref.load %arg2[%c104] : memref<144xf32, #tpu.memory_space<smem>>
    %616 = vector.extract_strided_slice %609 {offsets = [1, 0], sizes = [8, 128], strides = [1, 1]} : vector<10x128xf32> to vector<8x128xf32>
    %617 = vector.broadcast %615 : f32 to vector<8x128xf32>
    %618 = arith.mulf %617, %616 : vector<8x128xf32>
    %619 = arith.addf %614, %618 : vector<8x128xf32>
    %c107 = arith.constant 107 : index
    %620 = memref.load %arg2[%c107] : memref<144xf32, #tpu.memory_space<smem>>
    %621 = vector.extract_strided_slice %609 {offsets = [2, 0], sizes = [8, 128], strides = [1, 1]} : vector<10x128xf32> to vector<8x128xf32>
    %622 = vector.broadcast %620 : f32 to vector<8x128xf32>
    %623 = arith.mulf %622, %621 : vector<8x128xf32>
    %624 = arith.addf %619, %623 : vector<8x128xf32>
    %c0_130 = arith.constant 0 : index
    %c12_131 = arith.constant 12 : index
    %c0_132 = arith.constant 0 : index
    %c0_133 = arith.constant 0 : index
    %625 = vector.load %arg3[%c0_130, %c12_131, %c0_132, %c0_133] : memref<1x16x8x128xf32, #tpu.memory_space<vmem>>, vector<1x1x8x128xf32>
    %626 = vector.shape_cast %625 : vector<1x1x8x128xf32> to vector<8x128xf32>
    %c0_134 = arith.constant 0 : index
    %c12_135 = arith.constant 12 : index
    %c0_136 = arith.constant 0 : index
    %c0_137 = arith.constant 0 : index
    %c0_138 = arith.constant 0 : index
    %627 = vector.load %arg4[%c0_134, %c12_135, %c0_136, %c0_137, %c0_138] : memref<1x16x1x2x128xf32, #tpu.memory_space<vmem>>, vector<1x1x1x2x128xf32>
    %628 = vector.shape_cast %627 : vector<1x1x1x2x128xf32> to vector<2x128xf32>
    %629 = tpu.concatenate %626, %628 in 0 : vector<8x128xf32>, vector<2x128xf32> -> vector<10x128xf32>
    %c108 = arith.constant 108 : index
    %630 = memref.load %arg2[%c108] : memref<144xf32, #tpu.memory_space<smem>>
    %631 = vector.extract_strided_slice %629 {offsets = [0, 0], sizes = [8, 128], strides = [1, 1]} : vector<10x128xf32> to vector<8x128xf32>
    %632 = vector.broadcast %630 : f32 to vector<8x128xf32>
    %633 = arith.mulf %632, %631 : vector<8x128xf32>
    %634 = arith.addf %624, %633 : vector<8x128xf32>
    %c111 = arith.constant 111 : index
    %635 = memref.load %arg2[%c111] : memref<144xf32, #tpu.memory_space<smem>>
    %636 = vector.extract_strided_slice %629 {offsets = [1, 0], sizes = [8, 128], strides = [1, 1]} : vector<10x128xf32> to vector<8x128xf32>
    %637 = vector.broadcast %635 : f32 to vector<8x128xf32>
    %638 = arith.mulf %637, %636 : vector<8x128xf32>
    %639 = arith.addf %634, %638 : vector<8x128xf32>
    %c114 = arith.constant 114 : index
    %640 = memref.load %arg2[%c114] : memref<144xf32, #tpu.memory_space<smem>>
    %641 = vector.extract_strided_slice %629 {offsets = [2, 0], sizes = [8, 128], strides = [1, 1]} : vector<10x128xf32> to vector<8x128xf32>
    %642 = vector.broadcast %640 : f32 to vector<8x128xf32>
    %643 = arith.mulf %642, %641 : vector<8x128xf32>
    %644 = arith.addf %639, %643 : vector<8x128xf32>
    %c127_i32_139 = arith.constant 127 : i32
    %645 = tpu.dynamic_rotate %629 by %c127_i32_139 dim 1 : vector<10x128xf32>, i32 -> vector<10x128xf32>
    %c109 = arith.constant 109 : index
    %646 = memref.load %arg2[%c109] : memref<144xf32, #tpu.memory_space<smem>>
    %647 = vector.extract_strided_slice %645 {offsets = [0, 0], sizes = [8, 128], strides = [1, 1]} : vector<10x128xf32> to vector<8x128xf32>
    %648 = vector.broadcast %646 : f32 to vector<8x128xf32>
    %649 = arith.mulf %648, %647 : vector<8x128xf32>
    %650 = arith.addf %644, %649 : vector<8x128xf32>
    %c112 = arith.constant 112 : index
    %651 = memref.load %arg2[%c112] : memref<144xf32, #tpu.memory_space<smem>>
    %652 = vector.extract_strided_slice %645 {offsets = [1, 0], sizes = [8, 128], strides = [1, 1]} : vector<10x128xf32> to vector<8x128xf32>
    %653 = vector.broadcast %651 : f32 to vector<8x128xf32>
    %654 = arith.mulf %653, %652 : vector<8x128xf32>
    %655 = arith.addf %650, %654 : vector<8x128xf32>
    %c115 = arith.constant 115 : index
    %656 = memref.load %arg2[%c115] : memref<144xf32, #tpu.memory_space<smem>>
    %657 = vector.extract_strided_slice %645 {offsets = [2, 0], sizes = [8, 128], strides = [1, 1]} : vector<10x128xf32> to vector<8x128xf32>
    %658 = vector.broadcast %656 : f32 to vector<8x128xf32>
    %659 = arith.mulf %658, %657 : vector<8x128xf32>
    %660 = arith.addf %655, %659 : vector<8x128xf32>
    %c126_i32_140 = arith.constant 126 : i32
    %661 = tpu.dynamic_rotate %629 by %c126_i32_140 dim 1 : vector<10x128xf32>, i32 -> vector<10x128xf32>
    %c110 = arith.constant 110 : index
    %662 = memref.load %arg2[%c110] : memref<144xf32, #tpu.memory_space<smem>>
    %663 = vector.extract_strided_slice %661 {offsets = [0, 0], sizes = [8, 128], strides = [1, 1]} : vector<10x128xf32> to vector<8x128xf32>
    %664 = vector.broadcast %662 : f32 to vector<8x128xf32>
    %665 = arith.mulf %664, %663 : vector<8x128xf32>
    %666 = arith.addf %660, %665 : vector<8x128xf32>
    %c113 = arith.constant 113 : index
    %667 = memref.load %arg2[%c113] : memref<144xf32, #tpu.memory_space<smem>>
    %668 = vector.extract_strided_slice %661 {offsets = [1, 0], sizes = [8, 128], strides = [1, 1]} : vector<10x128xf32> to vector<8x128xf32>
    %669 = vector.broadcast %667 : f32 to vector<8x128xf32>
    %670 = arith.mulf %669, %668 : vector<8x128xf32>
    %671 = arith.addf %666, %670 : vector<8x128xf32>
    %c116 = arith.constant 116 : index
    %672 = memref.load %arg2[%c116] : memref<144xf32, #tpu.memory_space<smem>>
    %673 = vector.extract_strided_slice %661 {offsets = [2, 0], sizes = [8, 128], strides = [1, 1]} : vector<10x128xf32> to vector<8x128xf32>
    %674 = vector.broadcast %672 : f32 to vector<8x128xf32>
    %675 = arith.mulf %674, %673 : vector<8x128xf32>
    %676 = arith.addf %671, %675 : vector<8x128xf32>
    %c0_141 = arith.constant 0 : index
    %c13_142 = arith.constant 13 : index
    %c0_143 = arith.constant 0 : index
    %c0_144 = arith.constant 0 : index
    %677 = vector.load %arg3[%c0_141, %c13_142, %c0_143, %c0_144] : memref<1x16x8x128xf32, #tpu.memory_space<vmem>>, vector<1x1x8x128xf32>
    %678 = vector.shape_cast %677 : vector<1x1x8x128xf32> to vector<8x128xf32>
    %c0_145 = arith.constant 0 : index
    %c13_146 = arith.constant 13 : index
    %c0_147 = arith.constant 0 : index
    %c0_148 = arith.constant 0 : index
    %c0_149 = arith.constant 0 : index
    %679 = vector.load %arg4[%c0_145, %c13_146, %c0_147, %c0_148, %c0_149] : memref<1x16x1x2x128xf32, #tpu.memory_space<vmem>>, vector<1x1x1x2x128xf32>
    %680 = vector.shape_cast %679 : vector<1x1x1x2x128xf32> to vector<2x128xf32>
    %681 = tpu.concatenate %678, %680 in 0 : vector<8x128xf32>, vector<2x128xf32> -> vector<10x128xf32>
    %c117 = arith.constant 117 : index
    %682 = memref.load %arg2[%c117] : memref<144xf32, #tpu.memory_space<smem>>
    %683 = vector.extract_strided_slice %681 {offsets = [0, 0], sizes = [8, 128], strides = [1, 1]} : vector<10x128xf32> to vector<8x128xf32>
    %684 = vector.broadcast %682 : f32 to vector<8x128xf32>
    %685 = arith.mulf %684, %683 : vector<8x128xf32>
    %686 = arith.addf %676, %685 : vector<8x128xf32>
    %c120 = arith.constant 120 : index
    %687 = memref.load %arg2[%c120] : memref<144xf32, #tpu.memory_space<smem>>
    %688 = vector.extract_strided_slice %681 {offsets = [1, 0], sizes = [8, 128], strides = [1, 1]} : vector<10x128xf32> to vector<8x128xf32>
    %689 = vector.broadcast %687 : f32 to vector<8x128xf32>
    %690 = arith.mulf %689, %688 : vector<8x128xf32>
    %691 = arith.addf %686, %690 : vector<8x128xf32>
    %c123 = arith.constant 123 : index
    %692 = memref.load %arg2[%c123] : memref<144xf32, #tpu.memory_space<smem>>
    %693 = vector.extract_strided_slice %681 {offsets = [2, 0], sizes = [8, 128], strides = [1, 1]} : vector<10x128xf32> to vector<8x128xf32>
    %694 = vector.broadcast %692 : f32 to vector<8x128xf32>
    %695 = arith.mulf %694, %693 : vector<8x128xf32>
    %696 = arith.addf %691, %695 : vector<8x128xf32>
    %c127_i32_150 = arith.constant 127 : i32
    %697 = tpu.dynamic_rotate %681 by %c127_i32_150 dim 1 : vector<10x128xf32>, i32 -> vector<10x128xf32>
    %c118 = arith.constant 118 : index
    %698 = memref.load %arg2[%c118] : memref<144xf32, #tpu.memory_space<smem>>
    %699 = vector.extract_strided_slice %697 {offsets = [0, 0], sizes = [8, 128], strides = [1, 1]} : vector<10x128xf32> to vector<8x128xf32>
    %700 = vector.broadcast %698 : f32 to vector<8x128xf32>
    %701 = arith.mulf %700, %699 : vector<8x128xf32>
    %702 = arith.addf %696, %701 : vector<8x128xf32>
    %c121 = arith.constant 121 : index
    %703 = memref.load %arg2[%c121] : memref<144xf32, #tpu.memory_space<smem>>
    %704 = vector.extract_strided_slice %697 {offsets = [1, 0], sizes = [8, 128], strides = [1, 1]} : vector<10x128xf32> to vector<8x128xf32>
    %705 = vector.broadcast %703 : f32 to vector<8x128xf32>
    %706 = arith.mulf %705, %704 : vector<8x128xf32>
    %707 = arith.addf %702, %706 : vector<8x128xf32>
    %c124 = arith.constant 124 : index
    %708 = memref.load %arg2[%c124] : memref<144xf32, #tpu.memory_space<smem>>
    %709 = vector.extract_strided_slice %697 {offsets = [2, 0], sizes = [8, 128], strides = [1, 1]} : vector<10x128xf32> to vector<8x128xf32>
    %710 = vector.broadcast %708 : f32 to vector<8x128xf32>
    %711 = arith.mulf %710, %709 : vector<8x128xf32>
    %712 = arith.addf %707, %711 : vector<8x128xf32>
    %c126_i32_151 = arith.constant 126 : i32
    %713 = tpu.dynamic_rotate %681 by %c126_i32_151 dim 1 : vector<10x128xf32>, i32 -> vector<10x128xf32>
    %c119 = arith.constant 119 : index
    %714 = memref.load %arg2[%c119] : memref<144xf32, #tpu.memory_space<smem>>
    %715 = vector.extract_strided_slice %713 {offsets = [0, 0], sizes = [8, 128], strides = [1, 1]} : vector<10x128xf32> to vector<8x128xf32>
    %716 = vector.broadcast %714 : f32 to vector<8x128xf32>
    %717 = arith.mulf %716, %715 : vector<8x128xf32>
    %718 = arith.addf %712, %717 : vector<8x128xf32>
    %c122 = arith.constant 122 : index
    %719 = memref.load %arg2[%c122] : memref<144xf32, #tpu.memory_space<smem>>
    %720 = vector.extract_strided_slice %713 {offsets = [1, 0], sizes = [8, 128], strides = [1, 1]} : vector<10x128xf32> to vector<8x128xf32>
    %721 = vector.broadcast %719 : f32 to vector<8x128xf32>
    %722 = arith.mulf %721, %720 : vector<8x128xf32>
    %723 = arith.addf %718, %722 : vector<8x128xf32>
    %c125 = arith.constant 125 : index
    %724 = memref.load %arg2[%c125] : memref<144xf32, #tpu.memory_space<smem>>
    %725 = vector.extract_strided_slice %713 {offsets = [2, 0], sizes = [8, 128], strides = [1, 1]} : vector<10x128xf32> to vector<8x128xf32>
    %726 = vector.broadcast %724 : f32 to vector<8x128xf32>
    %727 = arith.mulf %726, %725 : vector<8x128xf32>
    %728 = arith.addf %723, %727 : vector<8x128xf32>
    %c0_152 = arith.constant 0 : index
    %c14_153 = arith.constant 14 : index
    %c0_154 = arith.constant 0 : index
    %c0_155 = arith.constant 0 : index
    %729 = vector.load %arg3[%c0_152, %c14_153, %c0_154, %c0_155] : memref<1x16x8x128xf32, #tpu.memory_space<vmem>>, vector<1x1x8x128xf32>
    %730 = vector.shape_cast %729 : vector<1x1x8x128xf32> to vector<8x128xf32>
    %c0_156 = arith.constant 0 : index
    %c14_157 = arith.constant 14 : index
    %c0_158 = arith.constant 0 : index
    %c0_159 = arith.constant 0 : index
    %c0_160 = arith.constant 0 : index
    %731 = vector.load %arg4[%c0_156, %c14_157, %c0_158, %c0_159, %c0_160] : memref<1x16x1x2x128xf32, #tpu.memory_space<vmem>>, vector<1x1x1x2x128xf32>
    %732 = vector.shape_cast %731 : vector<1x1x1x2x128xf32> to vector<2x128xf32>
    %733 = tpu.concatenate %730, %732 in 0 : vector<8x128xf32>, vector<2x128xf32> -> vector<10x128xf32>
    %c126 = arith.constant 126 : index
    %734 = memref.load %arg2[%c126] : memref<144xf32, #tpu.memory_space<smem>>
    %735 = vector.extract_strided_slice %733 {offsets = [0, 0], sizes = [8, 128], strides = [1, 1]} : vector<10x128xf32> to vector<8x128xf32>
    %736 = vector.broadcast %734 : f32 to vector<8x128xf32>
    %737 = arith.mulf %736, %735 : vector<8x128xf32>
    %738 = arith.addf %728, %737 : vector<8x128xf32>
    %c129 = arith.constant 129 : index
    %739 = memref.load %arg2[%c129] : memref<144xf32, #tpu.memory_space<smem>>
    %740 = vector.extract_strided_slice %733 {offsets = [1, 0], sizes = [8, 128], strides = [1, 1]} : vector<10x128xf32> to vector<8x128xf32>
    %741 = vector.broadcast %739 : f32 to vector<8x128xf32>
    %742 = arith.mulf %741, %740 : vector<8x128xf32>
    %743 = arith.addf %738, %742 : vector<8x128xf32>
    %c132 = arith.constant 132 : index
    %744 = memref.load %arg2[%c132] : memref<144xf32, #tpu.memory_space<smem>>
    %745 = vector.extract_strided_slice %733 {offsets = [2, 0], sizes = [8, 128], strides = [1, 1]} : vector<10x128xf32> to vector<8x128xf32>
    %746 = vector.broadcast %744 : f32 to vector<8x128xf32>
    %747 = arith.mulf %746, %745 : vector<8x128xf32>
    %748 = arith.addf %743, %747 : vector<8x128xf32>
    %c127_i32_161 = arith.constant 127 : i32
    %749 = tpu.dynamic_rotate %733 by %c127_i32_161 dim 1 : vector<10x128xf32>, i32 -> vector<10x128xf32>
    %c127 = arith.constant 127 : index
    %750 = memref.load %arg2[%c127] : memref<144xf32, #tpu.memory_space<smem>>
    %751 = vector.extract_strided_slice %749 {offsets = [0, 0], sizes = [8, 128], strides = [1, 1]} : vector<10x128xf32> to vector<8x128xf32>
    %752 = vector.broadcast %750 : f32 to vector<8x128xf32>
    %753 = arith.mulf %752, %751 : vector<8x128xf32>
    %754 = arith.addf %748, %753 : vector<8x128xf32>
    %c130 = arith.constant 130 : index
    %755 = memref.load %arg2[%c130] : memref<144xf32, #tpu.memory_space<smem>>
    %756 = vector.extract_strided_slice %749 {offsets = [1, 0], sizes = [8, 128], strides = [1, 1]} : vector<10x128xf32> to vector<8x128xf32>
    %757 = vector.broadcast %755 : f32 to vector<8x128xf32>
    %758 = arith.mulf %757, %756 : vector<8x128xf32>
    %759 = arith.addf %754, %758 : vector<8x128xf32>
    %c133 = arith.constant 133 : index
    %760 = memref.load %arg2[%c133] : memref<144xf32, #tpu.memory_space<smem>>
    %761 = vector.extract_strided_slice %749 {offsets = [2, 0], sizes = [8, 128], strides = [1, 1]} : vector<10x128xf32> to vector<8x128xf32>
    %762 = vector.broadcast %760 : f32 to vector<8x128xf32>
    %763 = arith.mulf %762, %761 : vector<8x128xf32>
    %764 = arith.addf %759, %763 : vector<8x128xf32>
    %c126_i32_162 = arith.constant 126 : i32
    %765 = tpu.dynamic_rotate %733 by %c126_i32_162 dim 1 : vector<10x128xf32>, i32 -> vector<10x128xf32>
    %c128 = arith.constant 128 : index
    %766 = memref.load %arg2[%c128] : memref<144xf32, #tpu.memory_space<smem>>
    %767 = vector.extract_strided_slice %765 {offsets = [0, 0], sizes = [8, 128], strides = [1, 1]} : vector<10x128xf32> to vector<8x128xf32>
    %768 = vector.broadcast %766 : f32 to vector<8x128xf32>
    %769 = arith.mulf %768, %767 : vector<8x128xf32>
    %770 = arith.addf %764, %769 : vector<8x128xf32>
    %c131 = arith.constant 131 : index
    %771 = memref.load %arg2[%c131] : memref<144xf32, #tpu.memory_space<smem>>
    %772 = vector.extract_strided_slice %765 {offsets = [1, 0], sizes = [8, 128], strides = [1, 1]} : vector<10x128xf32> to vector<8x128xf32>
    %773 = vector.broadcast %771 : f32 to vector<8x128xf32>
    %774 = arith.mulf %773, %772 : vector<8x128xf32>
    %775 = arith.addf %770, %774 : vector<8x128xf32>
    %c134 = arith.constant 134 : index
    %776 = memref.load %arg2[%c134] : memref<144xf32, #tpu.memory_space<smem>>
    %777 = vector.extract_strided_slice %765 {offsets = [2, 0], sizes = [8, 128], strides = [1, 1]} : vector<10x128xf32> to vector<8x128xf32>
    %778 = vector.broadcast %776 : f32 to vector<8x128xf32>
    %779 = arith.mulf %778, %777 : vector<8x128xf32>
    %780 = arith.addf %775, %779 : vector<8x128xf32>
    %c0_163 = arith.constant 0 : index
    %c15_164 = arith.constant 15 : index
    %c0_165 = arith.constant 0 : index
    %c0_166 = arith.constant 0 : index
    %781 = vector.load %arg3[%c0_163, %c15_164, %c0_165, %c0_166] : memref<1x16x8x128xf32, #tpu.memory_space<vmem>>, vector<1x1x8x128xf32>
    %782 = vector.shape_cast %781 : vector<1x1x8x128xf32> to vector<8x128xf32>
    %c0_167 = arith.constant 0 : index
    %c15_168 = arith.constant 15 : index
    %c0_169 = arith.constant 0 : index
    %c0_170 = arith.constant 0 : index
    %c0_171 = arith.constant 0 : index
    %783 = vector.load %arg4[%c0_167, %c15_168, %c0_169, %c0_170, %c0_171] : memref<1x16x1x2x128xf32, #tpu.memory_space<vmem>>, vector<1x1x1x2x128xf32>
    %784 = vector.shape_cast %783 : vector<1x1x1x2x128xf32> to vector<2x128xf32>
    %785 = tpu.concatenate %782, %784 in 0 : vector<8x128xf32>, vector<2x128xf32> -> vector<10x128xf32>
    %c135 = arith.constant 135 : index
    %786 = memref.load %arg2[%c135] : memref<144xf32, #tpu.memory_space<smem>>
    %787 = vector.extract_strided_slice %785 {offsets = [0, 0], sizes = [8, 128], strides = [1, 1]} : vector<10x128xf32> to vector<8x128xf32>
    %788 = vector.broadcast %786 : f32 to vector<8x128xf32>
    %789 = arith.mulf %788, %787 : vector<8x128xf32>
    %790 = arith.addf %780, %789 : vector<8x128xf32>
    %c138 = arith.constant 138 : index
    %791 = memref.load %arg2[%c138] : memref<144xf32, #tpu.memory_space<smem>>
    %792 = vector.extract_strided_slice %785 {offsets = [1, 0], sizes = [8, 128], strides = [1, 1]} : vector<10x128xf32> to vector<8x128xf32>
    %793 = vector.broadcast %791 : f32 to vector<8x128xf32>
    %794 = arith.mulf %793, %792 : vector<8x128xf32>
    %795 = arith.addf %790, %794 : vector<8x128xf32>
    %c141 = arith.constant 141 : index
    %796 = memref.load %arg2[%c141] : memref<144xf32, #tpu.memory_space<smem>>
    %797 = vector.extract_strided_slice %785 {offsets = [2, 0], sizes = [8, 128], strides = [1, 1]} : vector<10x128xf32> to vector<8x128xf32>
    %798 = vector.broadcast %796 : f32 to vector<8x128xf32>
    %799 = arith.mulf %798, %797 : vector<8x128xf32>
    %800 = arith.addf %795, %799 : vector<8x128xf32>
    %c127_i32_172 = arith.constant 127 : i32
    %801 = tpu.dynamic_rotate %785 by %c127_i32_172 dim 1 : vector<10x128xf32>, i32 -> vector<10x128xf32>
    %c136 = arith.constant 136 : index
    %802 = memref.load %arg2[%c136] : memref<144xf32, #tpu.memory_space<smem>>
    %803 = vector.extract_strided_slice %801 {offsets = [0, 0], sizes = [8, 128], strides = [1, 1]} : vector<10x128xf32> to vector<8x128xf32>
    %804 = vector.broadcast %802 : f32 to vector<8x128xf32>
    %805 = arith.mulf %804, %803 : vector<8x128xf32>
    %806 = arith.addf %800, %805 : vector<8x128xf32>
    %c139 = arith.constant 139 : index
    %807 = memref.load %arg2[%c139] : memref<144xf32, #tpu.memory_space<smem>>
    %808 = vector.extract_strided_slice %801 {offsets = [1, 0], sizes = [8, 128], strides = [1, 1]} : vector<10x128xf32> to vector<8x128xf32>
    %809 = vector.broadcast %807 : f32 to vector<8x128xf32>
    %810 = arith.mulf %809, %808 : vector<8x128xf32>
    %811 = arith.addf %806, %810 : vector<8x128xf32>
    %c142 = arith.constant 142 : index
    %812 = memref.load %arg2[%c142] : memref<144xf32, #tpu.memory_space<smem>>
    %813 = vector.extract_strided_slice %801 {offsets = [2, 0], sizes = [8, 128], strides = [1, 1]} : vector<10x128xf32> to vector<8x128xf32>
    %814 = vector.broadcast %812 : f32 to vector<8x128xf32>
    %815 = arith.mulf %814, %813 : vector<8x128xf32>
    %816 = arith.addf %811, %815 : vector<8x128xf32>
    %c126_i32_173 = arith.constant 126 : i32
    %817 = tpu.dynamic_rotate %785 by %c126_i32_173 dim 1 : vector<10x128xf32>, i32 -> vector<10x128xf32>
    %c137 = arith.constant 137 : index
    %818 = memref.load %arg2[%c137] : memref<144xf32, #tpu.memory_space<smem>>
    %819 = vector.extract_strided_slice %817 {offsets = [0, 0], sizes = [8, 128], strides = [1, 1]} : vector<10x128xf32> to vector<8x128xf32>
    %820 = vector.broadcast %818 : f32 to vector<8x128xf32>
    %821 = arith.mulf %820, %819 : vector<8x128xf32>
    %822 = arith.addf %816, %821 : vector<8x128xf32>
    %c140 = arith.constant 140 : index
    %823 = memref.load %arg2[%c140] : memref<144xf32, #tpu.memory_space<smem>>
    %824 = vector.extract_strided_slice %817 {offsets = [1, 0], sizes = [8, 128], strides = [1, 1]} : vector<10x128xf32> to vector<8x128xf32>
    %825 = vector.broadcast %823 : f32 to vector<8x128xf32>
    %826 = arith.mulf %825, %824 : vector<8x128xf32>
    %827 = arith.addf %822, %826 : vector<8x128xf32>
    %c143 = arith.constant 143 : index
    %828 = memref.load %arg2[%c143] : memref<144xf32, #tpu.memory_space<smem>>
    %829 = vector.extract_strided_slice %817 {offsets = [2, 0], sizes = [8, 128], strides = [1, 1]} : vector<10x128xf32> to vector<8x128xf32>
    %830 = vector.broadcast %828 : f32 to vector<8x128xf32>
    %831 = arith.mulf %830, %829 : vector<8x128xf32>
    %832 = arith.addf %827, %831 : vector<8x128xf32>
    %c0_174 = arith.constant 0 : index
    %c0_175 = arith.constant 0 : index
    %c0_176 = arith.constant 0 : index
    %c0_177 = arith.constant 0 : index
    %833 = vector.load %arg5[%c0_174, %c0_175, %c0_176, %c0_177] : memref<1x1x8x128xf32, #tpu.memory_space<vmem>>, vector<1x1x8x128xf32>
    %834 = vector.shape_cast %833 : vector<1x1x8x128xf32> to vector<8x128xf32>
    %835 = vector.shape_cast %832 : vector<8x128xf32> to vector<1x1x8x128xf32>
    tpu.vector_store %arg5[%c0_174, %c0_175, %c0_176, %c0_177], %835 {strides = array<i32>} : memref<1x1x8x128xf32, #tpu.memory_space<vmem>>, vector<1x1x8x128xf32>,
    return
  }
  func.func @transform_0(%arg0: i32, %arg1: i32) -> i32 {
    %c0_i32 = arith.constant 0 : i32
    %c0_i32_0 = arith.constant 0 : i32
    return %c0_i32 : i32
  }
  func.func @transform_1(%arg0: i32, %arg1: i32) -> (i32, i32, i32, i32) {
    %c0_i32 = arith.constant 0 : i32
    %c0_i32_0 = arith.constant 0 : i32
    %c0_i32_1 = arith.constant 0 : i32
    return %arg0, %c0_i32, %arg1, %c0_i32_0 : i32, i32, i32, i32
  }
  func.func @transform_2(%arg0: i32, %arg1: i32) -> (i32, i32, i32, i32, i32) {
    %c0_i32 = arith.constant 0 : i32
    %c0_i32_0 = arith.constant 0 : i32
    %c0_i32_1 = arith.constant 0 : i32
    %c0_i32_2 = arith.constant 0 : i32
    return %arg0, %c0_i32, %arg1, %c0_i32_0, %c0_i32_1 : i32, i32, i32, i32, i32
  }
  func.func @transform_3(%arg0: i32, %arg1: i32) -> (i32, i32, i32, i32) {
    %c0_i32 = arith.constant 0 : i32
    %c0_i32_0 = arith.constant 0 : i32
    %c0_i32_1 = arith.constant 0 : i32
    return %arg0, %c0_i32, %arg1, %c0_i32_0 : i32, i32, i32, i32
  }
}

</mosaic_0001>

<bundles_post_ra>
// kernel: tpu_custom_call.1
= control target key start
LH: loop header
LB: loop body
LE: loop exit
PB: predicated region body
PF: predicated region fallthrough
CT: control target
= control target key end

     0   :  { %8 = vsyncpa [#allocation4], 0  ;;  %s3178_s0 = inlined_call_operand.vmem [shape: f32[144], index: 0, kind: input, shape index: {}]   ;;  %s3179_s1 = inlined_call_operand.vmem [shape: f32[2,16,10,128], index: 1, kind: input, shape index: {}]   ;;  %s3180_s2 = inlined_call_operand.vmem [shape: f32[2,16,1,2,128], index: 2, kind: input, shape index: {}]   ;;  %s3181_s3 = inlined_call_operand.hbm [shape: f32[2,1,8,128], index: 3, kind: output, shape index: {}]  }
   0x1   :  { %9 = vsyncpa [#allocation3], 0 }
   0x2   :  { %11 = vsyncpa [#allocation3 + $0x1], 0  ;;  %s2283_s12 = smov 0   ;;  %s2285_s13 = smov 0  }
   0x3   :  { %s2287_s14 = smov 0   ;;  %s2289_s15 = smov 0  }
   0x4   :  { %s2291_s16 = smov 0   ;;  %s2293_s17 = smov 0  }
   0x5 LB: > { %s1889_s18 = sadd.s32 4294967295, %s2257_s17   ;;  %s1890_s19 = sadd.s32 4294967294, %s2257_s17   ;;  %s2257_s17 = sphi %s2293_s17, %s17_s17   ;;  %s2253_s16 = sphi %s2291_s16, %s3194_s16   ;;  %s2249_s15 = sphi %s2289_s15, %s3193_s15   ;;  %s2245_s14 = sphi %s2287_s14, %s3192_s14   ;;  %s2241_s13 = sphi %s2285_s13, %s3191_s13   ;;  %s2237_s12 = sphi %s2283_s12, %s3190_s12  }
   0x6   : > { %s29_s20 = sadd.s32 1, %s2253_s16  ;;  %s59_s21 = sadd.s32 1, %s2245_s14 }
   0x7   : > { %p31_p0 = scmp.ge.s32.totalorder %s29_s20, 2  ;;  %p66_p1 = scmp.ne.s32.totalorder %s2245_s14, %s2241_s13 }
   0x8   : > { %p67_p2 = scmp.eq.s32.totalorder %s2257_s17, 0  ;;  %p126_p3 = scmp.eq.s32.totalorder %s1889_s18, 1 }
   0x9   : > { %s3196_s20 = smov (%p31_p0, %s29_s20), 0  ;;  %p131_p6 = scmp.ne.s32.totalorder %s2241_s13, %s2237_s12 }
   0xa   : > { %p2322_p4 = por %p67_p2, %p66_p1  ;;  %p2326_p5 = por %p126_p3, %p66_p1 }
   0xb   : > { %s54_s24 = ssub.s32 %s2253_s16, %s3196_s20  ;;  %p132_p8 = scmp.eq.s32.totalorder %s1890_s19, 1 }
   0xc   : > { %s3184_s23 = scalar_select %p2326_p5, 1, 0 }
   0xd   : > { %p57_p7 = scmp.eq.s32.totalorder %s54_s24, 0  ;;  %p1891_p9 = scmp.ge.s32.totalorder %s2257_s17, 1 }
   0xe   : > { %p139_p10 = scmp.lt.s32.totalorder %s2257_s17, 3  ;;  %p2339_p11 = por %p132_p8, %p131_p6 }
   0xf   : > { %s2337_s25 = scalar_select %p57_p7, %s2245_s14, %s59_s21  }
  0x10   : > { %s3185_s26 = scalar_select %p2339_p11, 1, 0 }
  0x11   : > { %p2343_p12 = pnand %p1891_p9, %p139_p10  ;;  %p2347_p13 = scmp.eq.s32.totalorder %s1889_s18, 0 }
  0x12   : > { %s152_s4 = sshll.u32 %s3178_s0, 4  ;;  %s153_s4 = int_to_ptr.vmem [resolvable:$true] %s152_s4 }
  0x13   : > { %p2088_p0 = pneg %p2343_p12  ;;  %s2162_s5 = scalar_lea.vmem %s153_s4, 32 }
  0x14   : > { %p2163_p2 = scmp.ne.s32.totalorder %s153_s4, %s2162_s5  ;;  %p2170_p8 = scmp.lt.s32.totalorder %s153_s4, %s153_s4 }
  0x15   : > { %p2089_p1 = pnand %p2347_p13, %p2088_p0  ;;  %p2171_p9 = scmp.lt.s32.totalorder %s2162_s5, %s2162_s5 }
  0x17   : > { %p2164_p3 = pneg %p2089_p1  ;;  %p2172_p10 = por %p2171_p9, %p2170_p8 }
  0x19   : > { %p2165_p6 = pnand %p2164_p3, %p2163_p2 }
  0x1b   : > { %p2166_p7 = pneg %p2165_p6 }
  0x1d   : > { %p2173_p11 = pnand %p2172_p10, %p2166_p7 }
  0x1f   : > { %2176 = shalt.err (!%p2173_p11)
}
  0x20   : > { %s2259_s6 = smov [#allocation2]   ;;  %p1893_p5 = scmp.ge.s32.totalorder %s2257_s17, 2 }
  0x21   : > { %2091 = dma.vmem_to_smem (!%p2089_p1), %s153_s4, 32, %s2259_s6, [#allocation4]  }
  0x22   : > { %159 = sbr.rel (%p1893_p5) target bundleno = 51 (0x33), region = 20 }
  0x27   : > { %162 = sbr.rel (!%p2322_p4) target bundleno = 51 (0x33), region = 24  ;;  %s164_s7 = sand.u32 (%p2322_p4), 1, %s2245_s14  }
  0x28   : > { %s2080_s8 = sshll.u32 (%p2322_p4), %s2253_s16, 8  ;;  %s1894_s9 = sshll.u32 (%p2322_p4), %s164_s7, 7 }
  0x29   : > { %s2368_s18 = scalar_lea.vmem (%p2322_p4), %s3179_s1, %s2080_s8  ;;  %s166_s19 = scalar_lea.vmem (%p2322_p4), [#allocation5], %s1894_s9 }
  0x2a   : > { %v229_v0 = vld [vmem:[%s2368_s18] sm:$0xff] (%p2322_p4)  ;;  %v231_v1 = vld [vmem:[%s2368_s18 + $0x10] sm:$0xff] (%p2322_p4) }
  0x2b   : > { %v233_v2 = vld [vmem:[%s2368_s18 + $0x20] sm:$0xff] (%p2322_p4)  ;;  %230 = vst [vmem:[%s166_s19] sm:$0xff] (%p2322_p4), %v229_v0  ;;  %232 = vst [vmem:[%s166_s19 + $0x8] sm:$0xff] (%p2322_p4), %v231_v1  ;;  %v235_v3 = vld [vmem:[%s2368_s18 + $0x30] sm:$0xff] (%p2322_p4) }
  0x2c   : > { %234 = vst [vmem:[%s166_s19 + $0x10] sm:$0xff] %v233_v2  ;;  %v237_v4 = vld [vmem:[%s2368_s18 + $0x40] sm:$0xff]  ;;  %v239_v5 = vld [vmem:[%s2368_s18 + $0x50] sm:$0xff]  ;;  %236 = vst [vmem:[%s166_s19 + $0x18] sm:$0xff] %v235_v3 }
  0x2d   : > { %238 = vst [vmem:[%s166_s19 + $0x20] sm:$0xff] %v237_v4  ;;  %240 = vst [vmem:[%s166_s19 + $0x28] sm:$0xff] %v239_v5  ;;  %v241_v6 = vld [vmem:[%s2368_s18 + $0x60] sm:$0xff]  ;;  %v243_v7 = vld [vmem:[%s2368_s18 + $0x70] sm:$0xff] }
  0x2e   : > { %v245_v8 = vld [vmem:[%s2368_s18 + $0x80] sm:$0xff]  ;;  %242 = vst [vmem:[%s166_s19 + $0x30] sm:$0xff] %v241_v6  ;;  %244 = vst [vmem:[%s166_s19 + $0x38] sm:$0xff] %v243_v7  ;;  %v247_v9 = vld [vmem:[%s2368_s18 + $0x90] sm:$0xff] }
  0x2f   : > { %246 = vst [vmem:[%s166_s19 + $0x40] sm:$0xff] %v245_v8  ;;  %v249_v10 = vld [vmem:[%s2368_s18 + $0xa0] sm:$0xff]  ;;  %v251_v11 = vld [vmem:[%s2368_s18 + $0xb0] sm:$0xff]  ;;  %248 = vst [vmem:[%s166_s19 + $0x48] sm:$0xff] %v247_v9 }
  0x30   : > { %250 = vst [vmem:[%s166_s19 + $0x50] sm:$0xff] %v249_v10  ;;  %252 = vst [vmem:[%s166_s19 + $0x58] sm:$0xff] %v251_v11  ;;  %v253_v12 = vld [vmem:[%s2368_s18 + $0xc0] sm:$0xff]  ;;  %v255_v13 = vld [vmem:[%s2368_s18 + $0xd0] sm:$0xff] }
  0x31   : > { %v257_v14 = vld [vmem:[%s2368_s18 + $0xe0] sm:$0xff]  ;;  %254 = vst [vmem:[%s166_s19 + $0x60] sm:$0xff] %v253_v12  ;;  %256 = vst [vmem:[%s166_s19 + $0x68] sm:$0xff] %v255_v13  ;;  %v259_v15 = vld [vmem:[%s2368_s18 + $0xf0] sm:$0xff] }
  0x32   : > { %258 = vst [vmem:[%s166_s19 + $0x70] sm:$0xff] %v257_v14  ;;  %260 = vst [vmem:[%s166_s19 + $0x78] sm:$0xff] %v259_v15 }
  0x33 PF: > { %280 = sbr.rel (%p2343_p12) target bundleno = 482 (0x1e2), region = 66 }
  0x38   : > { %2228 = dma.done.wait (%p2347_p13), [#allocation4], 32  }
  0x39   : > { %2230 = vsyncadd (%p2347_p13), [#allocation4], 4294967264  ;;  %s2393_s21 = sand.u32 1, %s2241_s13  }
  0x3a   : > { %s1899_s22 = sshll.u32 %s2393_s21, 7 }
  0x3b   : > { %s2396_s24 = scalar_lea.vmem [#allocation5], %s1899_s22 }
  0x3c   : > { %293 = sfence }
  0x3d   : > { %v327_v16 = vld [vmem:[%s2396_s24] sm:$0xff]  ;;  %s2260_s27 = smov 127   ;;  %s2261_s29 = smov 126   ;;  %v2416_v22 = vld [vmem:[%s2396_s24 + $0x8] sm:$0xff]  ;;  %vm339_vm0 = vcmask 1046528   ;;  %vm351_vm1 = vcmask 1045504  }
  0x3e   : > { %357 = vrot.lane.b32.xlu0 %v327_v16, %s2260_s27  ;;  %387 = vrot.lane.b32.xlu1 %v327_v16, %s2261_s29  ;;  %p319_p4 = scmp.lt.s32.totalorder %s2249_s15, 1  ;;  %s329_s28 = sld [smem:[#allocation2]]  ;;  %v2439_v47 = vld [vmem:[%s2396_s24 + $0x10] sm:$0xff]  ;;  %v2457_v56 = vld [vmem:[%s2396_s24 + $0x18] sm:$0xff] }
  0x3f   : > { %s1903_s30 = sld [smem:[#allocation2 + $0x3]]  ;;  %v2475_v1 = vld [vmem:[%s2396_s24 + $0x20] sm:$0xff]  ;;  %v2485_v7 = vld [vmem:[%s2396_s24 + $0x28] sm:$0xff]  ;;  %p3188_p12 = scmp.ne.s32.totalorder %s3184_s23, 0 }
  0x40   : > { %s320_s4 = scalar_select %p319_p4, %s2249_s15, 1 }
  0x41   : > { %s1904_s5 = sld [smem:[#allocation2 + $0x6]] }
  0x42   : > { %s2081_s6 = sshll.u32 %s320_s4, 5  ;;  %s2403_s7 = sld [smem:[#allocation2 + $0xc]] }
  0x43   : > { %s2408_s10 = scalar_lea.vmem %s3180_s2, %s2081_s6  ;;  %s2410_s11 = sld [smem:[#allocation2 + $0xf]] }
  0x44   : > { %v328_v17 = vld [vmem:[%s2408_s10] sm:$0x3]  ;;  %v330_v18 = vstv %s329_s28  ;;  %v1912_v23 = vld [vmem:[%s2408_s10 + $0x2] sm:$0x3]  ;;  %s2419_s18 = sld [smem:[#allocation2 + $0x15]] }
  0x45   : > { %v334_v19 = vstv %s1903_s30  ;;  %359 = vrot.lane.b32.xlu0 %v328_v17, %s2260_s27  ;;  %389 = vrot.lane.b32.xlu1 %v328_v17, %s2261_s29  ;;  %v331_v24 = vmul.f32 %v330_v18, %v327_v16  ;;  %s2421_s19 = sld [smem:[#allocation2 + $0x18]]  ;;  %v1923_v46 = vld [vmem:[%s2408_s10 + $0x4] sm:$0x3] }
  0x46   : > { %v335_v20 = vmul.f32 %v334_v19, %v327_v16  ;;  %v336_v21 = vmul.f32 %v334_v19, %v328_v17  ;;  %v1934_v55 = vld [vmem:[%s2408_s10 + $0x6] sm:$0x3]  ;;  %s1936_s22 = sld [smem:[#allocation2 + $0x1e]]  ;;  %v1945_v0 = vld [vmem:[%s2408_s10 + $0x8] sm:$0x3] }
  0x47   : > { %v346_v25 = vstv %s1904_s5  ;;  %s1937_s28 = sld [smem:[#allocation2 + $0x21]]  ;;  %v1956_v6 = vld [vmem:[%s2408_s10 + $0xa] sm:$0x3] }
  0x48   : > { %v340_v26 = vrot.slane %v335_v20, 1  ;;  %v347_v27 = vmul.f32 %v346_v25, %v327_v16  ;;  %v341_v28 = vrot.slane %v336_v21, 1  ;;  %v348_v29 = vmul.f32 %v346_v25, %v328_v17  ;;  %s1947_s30 = sld [smem:[#allocation2 + $0x27]]  ;;  %v2502_v16 = vld [vmem:[%s2408_s10 + $0xc] sm:$0x3]  ;;  %v2505_v17 = vld [vmem:[%s2396_s24 + $0x30] sm:$0xff] }
  0x49   : > { %v426_v30 = vstv %s2403_s7  ;;  %v437_v31 = vstv %s2410_s11  ;;  %449 = vrot.lane.b32.xlu1 %v1912_v23, %s2260_s27  ;;  %447 = vrot.lane.b32.xlu0 %v2416_v22, %s2260_s27  ;;  %s1948_s4 = sld [smem:[#allocation2 + $0x2a]] }
  0x4a   : > { %v352_v32 = vrot.slane %v347_v27, 2  ;;  %v342_v33 = vsel %vm339_vm0, %v340_v26, %v341_v28  ;;  %v353_v34 = vrot.slane %v348_v29, 2  ;;  %v427_v35 = vmul.f32 %v2416_v22, %v426_v30  ;;  %v2516_v21 = vld [vmem:[%s2408_s10 + $0xe] sm:$0x3]  ;;  %s1958_s5 = sld [smem:[#allocation2 + $0x30]] }
  0x4b   : > { %v344_v36 = vadd.f32 %v342_v33, %v331_v24  ;;  %v428_v37 = vmul.f32 %v1912_v23, %v426_v30  ;;  %v438_v38 = vmul.f32 %v2416_v22, %v437_v31  ;;  %v439_v39 = vmul.f32 %v1912_v23, %v437_v31  ;;  %s1959_s6 = sld [smem:[#allocation2 + $0x33]]  ;;  %v2532_v31 = vld [vmem:[%s2408_s10 + $0x10] sm:$0x3] }
  0x4c   : > { %v354_v40 = vsel %vm351_vm1, %v352_v32, %v353_v34  ;;  %v431_v41 = vrot.slane %v427_v35, 1  ;;  %v516_v50 = vstv %s2419_s18  ;;  %v527_v51 = vstv %s2421_s19  ;;  %v1988_v32 = vld [vmem:[%s2396_s24 + $0x40] sm:$0xff]  ;;  %s1969_s7 = sld [smem:[#allocation2 + $0x39]] }
  0x4d   : > { %v2432_v42 = vadd.f32 %v354_v40, %v344_v36  ;;  %v432_v43 = vrot.slane %v428_v37, 1  ;;  %v442_v44 = vrot.slane %v438_v38, 2  ;;  %v443_v45 = vrot.slane %v439_v39, 2  ;;  %479 = vrot.lane.b32.xlu1 %v1912_v23, %s2261_s29  ;;  %477 = vrot.lane.b32.xlu0 %v2416_v22, %s2261_s29  ;;  %v2519_v23 = vld [vmem:[%s2396_s24 + $0x38] sm:$0xff]  ;;  %v2000_v37 = vld [vmem:[%s2408_s10 + $0x12] sm:$0x3] }
  0x4e   : > { %v518_v52 = vmul.f32 %v1923_v46, %v516_v50  ;;  %v529_v53 = vmul.f32 %v1923_v46, %v527_v51  ;;  %v517_v57 = vmul.f32 %v2439_v47, %v516_v50  ;;  %v528_v59 = vmul.f32 %v2439_v47, %v527_v51  ;;  %v1999_v38 = vld [vmem:[%s2396_s24 + $0x48] sm:$0xff]  ;;  %v2011_v50 = vld [vmem:[%s2408_s10 + $0x14] sm:$0x3]  ;;  %s1970_s8 = sld [smem:[#allocation2 + $0x3c]] }
  0x4f   : > { %v2442_v48 = vsel %vm339_vm0, %v431_v41, %v432_v43  ;;  %v2445_v49 = vsel %vm351_vm1, %v442_v44, %v443_v45  ;;  %v606_v2 = vstv %s1936_s22  ;;  %v617_v3 = vstv %s1937_s28  ;;  %s1980_s9 = sld [smem:[#allocation2 + $0x42]] }
  0x50   : > { %v522_v54 = vrot.slane %v518_v52, 1  ;;  %v533_v58 = vrot.slane %v529_v53, 2  ;;  %v521_v60 = vrot.slane %v517_v57, 1  ;;  %v532_v61 = vrot.slane %v528_v59, 2  ;;  %v2022_v57 = vld [vmem:[%s2408_s10 + $0x16] sm:$0x3] }
  0x51   : > { %539 = vrot.lane.b32.xlu1 %v1923_v46, %s2260_s27  ;;  %537 = vrot.lane.b32.xlu0 %v2439_v47, %s2260_s27  ;;  %v608_v4 = vmul.f32 %v1934_v55, %v606_v2  ;;  %v619_v5 = vmul.f32 %v1934_v55, %v617_v3  ;;  %v607_v9 = vmul.f32 %v2457_v56, %v606_v2  ;;  %v696_v18 = vstv %s1947_s30  ;;  %v2576_v2 = vld [vmem:[%s2408_s10 + $0x18] sm:$0x3]  ;;  %s1981_s11 = sld [smem:[#allocation2 + $0x45]] }
  0x52   : > { %v2465_v62 = vsel %vm339_vm0, %v521_v60, %v522_v54  ;;  %v2468_v63 = vsel %vm351_vm1, %v532_v61, %v533_v58  ;;  %v618_v11 = vmul.f32 %v2457_v56, %v617_v3  ;;  %v707_v19 = vstv %s1948_s4  ;;  %v2579_v3 = vld [vmem:[%s2396_s24 + $0x60] sm:$0xff]  ;;  %s2597_s18 = sld [smem:[#allocation2 + $0x4]] }
  0x53   : > { %v612_v8 = vrot.slane %v608_v4, 1  ;;  %v623_v10 = vrot.slane %v619_v5, 2  ;;  %v611_v12 = vrot.slane %v607_v9, 1  ;;  %v698_v20 = vmul.f32 %v1945_v0, %v696_v18  ;;  %s1905_s19 = sld [smem:[#allocation2 + $0x1]] }
  0x54   : > { %v622_v13 = vrot.slane %v618_v11, 2  ;;  %v709_v24 = vmul.f32 %v1945_v0, %v707_v19  ;;  %v697_v26 = vmul.f32 %v2475_v1, %v696_v18  ;;  %v708_v28 = vmul.f32 %v2475_v1, %v707_v19  ;;  %s2600_s22 = sld [smem:[#allocation2 + $0x7]]  ;;  %v2605_v18 = vld [vmem:[%s2408_s10 + $0x1a] sm:$0x3]  ;;  %v2608_v19 = vld [vmem:[%s2396_s24 + $0x68] sm:$0xff] }
  0x55   : > { %569 = vrot.lane.b32.xlu1 %v1923_v46, %s2261_s29  ;;  %567 = vrot.lane.b32.xlu0 %v2439_v47, %s2261_s29  ;;  %v2493_v14 = vsel %vm339_vm0, %v611_v12, %v612_v8  ;;  %v702_v25 = vrot.slane %v698_v20, 1  ;;  %v786_v35 = vstv %s1958_s5  ;;  %v797_v36 = vstv %s1959_s6  ;;  %s2602_s28 = sld [smem:[#allocation2 + $0x5]] }
  0x56   : > { %v2499_v15 = vsel %vm351_vm1, %v622_v13, %v623_v10  ;;  %v713_v27 = vrot.slane %v709_v24, 2  ;;  %v701_v29 = vrot.slane %v697_v26, 1  ;;  %v712_v30 = vrot.slane %v708_v28, 2  ;;  %v2010_v46 = vld [vmem:[%s2396_s24 + $0x50] sm:$0xff]  ;;  %s2616_s30 = sld [smem:[#allocation2 + $0x8]] }
  0x57   : > { %v788_v39 = vmul.f32 %v1956_v6, %v786_v35  ;;  %v799_v40 = vmul.f32 %v1956_v6, %v797_v36  ;;  %v787_v43 = vmul.f32 %v2485_v7, %v786_v35  ;;  %v798_v45 = vmul.f32 %v2485_v7, %v797_v36  ;;  %s2618_s4 = sld [smem:[#allocation2 + $0x2]] }
  0x58   : > { %v2536_v33 = vsel %vm339_vm0, %v701_v29, %v702_v25  ;;  %v2539_v34 = vsel %vm351_vm1, %v712_v30, %v713_v27  ;;  %v876_v58 = vstv %s1969_s7  ;;  %v887_v59 = vstv %s1970_s8  ;;  %s2634_s5 = sld [smem:[#allocation2 + $0x9]] }
  0x59   : > { %629 = vrot.lane.b32.xlu1 %v1934_v55, %s2260_s27  ;;  %627 = vrot.lane.b32.xlu0 %v2457_v56, %s2260_s27  ;;  %v792_v41 = vrot.slane %v788_v39, 1  ;;  %v803_v44 = vrot.slane %v799_v40, 2  ;;  %v791_v51 = vrot.slane %v787_v43, 1  ;;  %v802_v52 = vrot.slane %v798_v45, 2  ;;  %s2637_s6 = sld [smem:[#allocation2 + $0xd]] }
  0x5a   : > { %v878_v60 = vmul.f32 %v2502_v16, %v876_v58  ;;  %v889_v61 = vmul.f32 %v2502_v16, %v887_v59  ;;  %v877_v4 = vmul.f32 %v2505_v17, %v876_v58  ;;  %v966_v12 = vstv %s1980_s9  ;;  %s2642_s7 = sld [smem:[#allocation2 + $0x10]] }
  0x5b   : > { %v2558_v53 = vsel %vm339_vm0, %v791_v51, %v792_v41  ;;  %v2563_v54 = vsel %vm351_vm1, %v802_v52, %v803_v44  ;;  %v968_v13 = vmul.f32 %v2516_v21, %v966_v12  ;;  %v967_v25 = vmul.f32 %v2519_v23, %v966_v12  ;;  %s2645_s8 = sld [smem:[#allocation2 + $0xa]] }
  0x5c   : > { %v893_v5 = vrot.slane %v889_v61, 2  ;;  %v881_v8 = vrot.slane %v877_v4, 1  ;;  %v366_v29 = vstv %s2597_s18  ;;  %v377_v36 = vstv %s2600_s22  ;;  %s2647_s9 = sld [smem:[#allocation2 + $0xe]] }
  0x5d   : > { %659 = vrot.lane.b32.xlu1 %v1934_v55, %s2261_s29  ;;  %657 = vrot.lane.b32.xlu0 %v2457_v56, %s2261_s29  ;;  %v2021_v55 = vld [vmem:[%s2396_s24 + $0x58] sm:$0xff]  ;;  %v972_v24 = vrot.slane %v968_v13, 1  ;;  %v971_v28 = vrot.slane %v967_v25, 1  ;;  %v396_v39 = vstv %s2602_s28  ;;  %s2666_s18 = sld [smem:[#allocation2 + $0xb]] }
  0x5e   : > { %v407_v52 = vstv %s2616_s30  ;;  %v392_v61 = vstv %s2618_s4  ;;  %s2680_s22 = sld [smem:[#allocation2 + $0x16]] }
  0x5f   : > { %v2627_v35 = vsel %vm339_vm0, %v971_v28, %v972_v24  ;;  %v422_v24 = vstv %s2634_s5  ;;  %v2654_v28 = vld [vmem:[%s2396_s24 + $0x70] sm:$0xff]  ;;  %s2684_s28 = sld [smem:[#allocation2 + $0x19]] }
  0x60   : > { %s2687_s30 = sld [smem:[#allocation2 + $0x13]] }
  0x61   : > { %719 = vrot.lane.b32.xlu1 %v1945_v0, %s2260_s27  ;;  %717 = vrot.lane.b32.xlu0 %v2475_v1, %s2260_s27  ;;  %s2689_s4 = sld [smem:[#allocation2 + $0x17]] }
  0x62   : > { %s2705_s5 = sld [smem:[#allocation2 + $0x1a]] }
  0x65   : > { %749 = vrot.lane.b32.xlu1 %v1945_v0, %s2261_s29  ;;  %747 = vrot.lane.b32.xlu0 %v2475_v1, %s2261_s29  ;;  %v882_v0 = vrot.slane %v878_v60, 1 }
  0x67   : > { %v2588_v10 = vsel %vm339_vm0, %v881_v8, %v882_v0 }
  0x69   : > { %809 = vrot.lane.b32.xlu1 %v1956_v6, %s2260_s27  ;;  %807 = vrot.lane.b32.xlu0 %v2485_v7, %s2260_s27 }
  0x6d   : > { %839 = vrot.lane.b32.xlu1 %v1956_v6, %s2261_s29  ;;  %837 = vrot.lane.b32.xlu0 %v2485_v7, %s2261_s29  ;;  %v888_v6 = vmul.f32 %v2505_v17, %v887_v59 }
  0x6f   : > { %v892_v9 = vrot.slane %v888_v6, 2 }
  0x71   : > { %899 = vrot.lane.b32.xlu1 %v2502_v16, %s2260_s27  ;;  %897 = vrot.lane.b32.xlu0 %v2505_v17, %s2260_s27  ;;  %v2591_v11 = vsel %vm351_vm1, %v892_v9, %v893_v5 }
  0x75   : > { %929 = vrot.lane.b32.xlu1 %v2502_v16, %s2261_s29  ;;  %927 = vrot.lane.b32.xlu0 %v2505_v17, %s2261_s29  ;;  %v977_v16 = vstv %s1981_s11  ;;  %s2663_s11 = sld [smem:[#allocation2 + $0x11]] }
  0x76   : > { %v979_v20 = vmul.f32 %v2516_v21, %v977_v16  ;;  %v978_v30 = vmul.f32 %v2519_v23, %v977_v16 }
  0x79   : > { %989 = vrot.lane.b32.xlu1 %v2516_v21, %s2260_s27  ;;  %987 = vrot.lane.b32.xlu0 %v2519_v23, %s2260_s27 }
  0x7d   : > { %1019 = vrot.lane.b32.xlu1 %v2516_v21, %s2261_s29  ;;  %1017 = vrot.lane.b32.xlu0 %v2519_v23, %s2261_s29  ;;  %v983_v21 = vrot.slane %v979_v20, 2 }
  0x81   : > { %1079 = vrot.lane.b32.xlu1 %v2532_v31, %s2260_s27  ;;  %1077 = vrot.lane.b32.xlu0 %v1988_v32, %s2260_s27 }
  0x85   : > { %1109 = vrot.lane.b32.xlu1 %v2532_v31, %s2261_s29  ;;  %1107 = vrot.lane.b32.xlu0 %v1988_v32, %s2261_s29  ;;  %v362_v32 = vstv %s1905_s19  ;;  %s2676_s19 = sld [smem:[#allocation2 + $0x12]] }
  0x89   : > { %1169 = vrot.lane.b32.xlu1 %v2000_v37, %s2260_s27  ;;  %1167 = vrot.lane.b32.xlu0 %v1999_v38, %s2260_s27 }
  0x8d   : > { %1199 = vrot.lane.b32.xlu1 %v2000_v37, %s2261_s29  ;;  %1197 = vrot.lane.b32.xlu0 %v1999_v38, %s2261_s29  ;;  %v982_v37 = vrot.slane %v978_v30, 2 }
  0x8f   : > { %v2632_v44 = vsel %vm351_vm1, %v982_v37, %v983_v21  ;;  %v456_v21 = vstv %s2637_s6  ;;  %s2708_s6 = sld [smem:[#allocation2 + $0x14]] }
  0x91   : > { %1259 = vrot.lane.b32.xlu1 %v2011_v50, %s2260_s27  ;;  %1257 = vrot.lane.b32.xlu0 %v2010_v46, %s2260_s27 }
  0x95   : > { %1289 = vrot.lane.b32.xlu1 %v2011_v50, %s2261_s29  ;;  %1287 = vrot.lane.b32.xlu0 %v2010_v46, %s2261_s29 }
  0x99   : > { %1349 = vrot.lane.b32.xlu1 %v2022_v57, %s2260_s27  ;;  %1347 = vrot.lane.b32.xlu0 %v2021_v55, %s2260_s27 }
  0x9d   : > { %1379 = vrot.lane.b32.xlu1 %v2022_v57, %s2261_s29  ;;  %1377 = vrot.lane.b32.xlu0 %v2021_v55, %s2261_s29 }
  0xa1   : > { %1439 = vrot.lane.b32.xlu1 %v2576_v2, %s2260_s27  ;;  %1437 = vrot.lane.b32.xlu0 %v2579_v3, %s2260_s27 }
  0xa5   : > { %1469 = vrot.lane.b32.xlu1 %v2576_v2, %s2261_s29  ;;  %1467 = vrot.lane.b32.xlu0 %v2579_v3, %s2261_s29 }
  0xa9   : > { %1529 = vrot.lane.b32.xlu1 %v2605_v18, %s2260_s27  ;;  %1527 = vrot.lane.b32.xlu0 %v2608_v19, %s2260_s27 }
  0xad   : > { %1559 = vrot.lane.b32.xlu1 %v2605_v18, %s2261_s29  ;;  %1557 = vrot.lane.b32.xlu0 %v2608_v19, %s2261_s29 }
  0xb0   : > { %v358_v26 = vpop.permute.xlu0 %357  ;;  %v388_v27 = vpop.permute.xlu1 %387 }
  0xb1   : > { %v367_v38 = vmul.f32 %v366_v29, %v358_v26  ;;  %v363_v40 = vmul.f32 %v362_v32, %v358_v26  ;;  %v378_v45 = vmul.f32 %v377_v36, %v358_v26  ;;  %v397_v51 = vmul.f32 %v396_v39, %v388_v27  ;;  %v2651_v26 = vld [vmem:[%s2408_s10 + $0x1c] sm:$0x3]  ;;  %1617 = vrot.lane.b32.xlu0 %v2654_v28, %s2260_s27 }
  0xb2   : > { %v408_v5 = vmul.f32 %v407_v52, %v388_v27  ;;  %1619 = vrot.lane.b32.xlu1 %v2651_v26, %s2260_s27 }
  0xb3   : > { %v371_v55 = vrot.slane %v367_v38, 1  ;;  %v364_v60 = vadd.f32 %v363_v40, %v2432_v42  ;;  %v382_v0 = vrot.slane %v378_v45, 2  ;;  %v401_v12 = vrot.slane %v397_v51, 1 }
  0xb4   : > { %v393_v42 = vmul.f32 %v392_v61, %v388_v27  ;;  %v412_v20 = vrot.slane %v408_v5, 2  ;;  %v452_v45 = vstv %s2645_s8  ;;  %v497_v5 = vstv %s2663_s11  ;;  %s1938_s8 = sld [smem:[#allocation2 + $0x1c]] }
  0xb5   : > { %1647 = vrot.lane.b32.xlu0 %v2654_v28, %s2261_s29  ;;  %s2725_s11 = sld [smem:[#allocation2 + $0x23]] }
  0xb6   : > { %1649 = vrot.lane.b32.xlu1 %v2651_v26, %s2261_s29 }
  0xb7   : > { %v360_v41 = vpop.permute.xlu0 %359  ;;  %v390_v43 = vpop.permute.xlu1 %389 }
  0xb8   : > { %v368_v46 = vmul.f32 %v366_v29, %v360_v41  ;;  %v379_v50 = vmul.f32 %v377_v36, %v360_v41  ;;  %v398_v59 = vmul.f32 %v396_v39, %v390_v43  ;;  %v409_v6 = vmul.f32 %v407_v52, %v390_v43 }
  0xb9   : > { %v423_v36 = vmul.f32 %v2416_v22, %v422_v24  ;;  %v467_v43 = vstv %s2642_s7  ;;  %s1940_s7 = sld [smem:[#allocation2 + $0x22]] }
  0xba   : > { %v372_v57 = vrot.slane %v368_v46, 1  ;;  %v383_v58 = vrot.slane %v379_v50, 2  ;;  %v402_v13 = vrot.slane %v398_v59, 1  ;;  %v413_v25 = vrot.slane %v409_v6, 2 }
  0xbb   : > { %v450_v30 = vpop.permute.xlu1 %449  ;;  %v448_v32 = vpop.permute.xlu0 %447  ;;  %v486_v46 = vstv %s2647_s9  ;;  %s1942_s9 = sld [smem:[#allocation2 + $0x20]] }
  0xbc   : > { %v373_v4 = vsel %vm339_vm0, %v371_v55, %v372_v57  ;;  %v384_v9 = vsel %vm351_vm1, %v382_v0, %v383_v58  ;;  %v403_v27 = vsel %vm339_vm0, %v401_v12, %v402_v13  ;;  %v414_v38 = vsel %vm351_vm1, %v412_v20, %v413_v25 }
  0xbd   : > { %v375_v8 = vadd.f32 %v373_v4, %v364_v60  ;;  %v458_v39 = vmul.f32 %v456_v21, %v450_v30  ;;  %v457_v40 = vmul.f32 %v456_v21, %v448_v32  ;;  %v469_v55 = vmul.f32 %v467_v43, %v450_v30 }
  0xbe   : > { %v468_v58 = vmul.f32 %v467_v43, %v448_v32  ;;  %v453_v60 = vmul.f32 %v452_v45, %v448_v32  ;;  %v482_v12 = vstv %s2666_s18  ;;  %s1941_s18 = sld [smem:[#allocation2 + $0x1d]] }
  0xbf   : > { %v386_v16 = vadd.f32 %v384_v9, %v375_v8  ;;  %v480_v50 = vpop.permute.xlu1 %479  ;;  %v478_v51 = vpop.permute.xlu0 %477  ;;  %v462_v52 = vrot.slane %v458_v39, 1  ;;  %v461_v57 = vrot.slane %v457_v40, 1  ;;  %v473_v6 = vrot.slane %v469_v55, 2 }
  0xc0   : > { %v488_v61 = vmul.f32 %v486_v46, %v480_v50  ;;  %v487_v0 = vmul.f32 %v486_v46, %v478_v51  ;;  %v472_v9 = vrot.slane %v468_v58, 2  ;;  %v498_v20 = vmul.f32 %v497_v5, %v478_v51 }
  0xc1   : > { %v394_v29 = vadd.f32 %v393_v42, %v386_v16  ;;  %v463_v8 = vsel %vm339_vm0, %v461_v57, %v462_v52  ;;  %v483_v25 = vmul.f32 %v482_v12, %v478_v51  ;;  %v546_v39 = vstv %s2680_s22  ;;  %s1950_s22 = sld [smem:[#allocation2 + $0x28]] }
  0xc2   : > { %v492_v42 = vrot.slane %v488_v61, 1  ;;  %v491_v16 = vrot.slane %v487_v0, 1  ;;  %v502_v32 = vrot.slane %v498_v20, 2  ;;  %v557_v52 = vstv %s2684_s28  ;;  %s1951_s28 = sld [smem:[#allocation2 + $0x2b]] }
  0xc3   : > { %v405_v37 = vadd.f32 %v403_v27, %v394_v29  ;;  %v512_v27 = vstv %s2676_s19  ;;  %v540_v40 = vpop.permute.xlu1 %539  ;;  %v542_v55 = vstv %s2687_s30  ;;  %v572_v20 = vstv %s2708_s6  ;;  %s1946_s19 = sld [smem:[#allocation2 + $0x24]] }
  0xc4   : > { %v493_v30 = vsel %vm339_vm0, %v491_v16, %v492_v42  ;;  %v513_v45 = vmul.f32 %v2439_v47, %v512_v27  ;;  %v548_v46 = vmul.f32 %v546_v39, %v540_v40  ;;  %v576_v47 = vstv %s2689_s4  ;;  %s1949_s30 = sld [smem:[#allocation2 + $0x25]] }
  0xc5   : > { %v416_v41 = vadd.f32 %v414_v38, %v405_v37  ;;  %v2697_v37 = vld [vmem:[%s2396_s24 + $0x78] sm:$0xff]  ;;  %v559_v61 = vmul.f32 %v557_v52, %v540_v40  ;;  %s1953_s4 = sld [smem:[#allocation2 + $0x29]] }
  0xc6   : > { %1707 = vrot.lane.b32.xlu0 %v2697_v37, %s2260_s27  ;;  %s2738_s6 = sld [smem:[#allocation2 + $0x26]] }
  0xc7   : > { %v424_v22 = vadd.f32 %v423_v36, %v416_v41  ;;  %v2694_v36 = vld [vmem:[%s2408_s10 + $0x1e] sm:$0x3]  ;;  %v538_v41 = vpop.permute.xlu0 %537  ;;  %v570_v58 = vpop.permute.xlu1 %569  ;;  %v563_v42 = vrot.slane %v559_v61, 2 }
  0xc8   : > { %1709 = vrot.lane.b32.xlu1 %v2694_v36, %s2260_s27  ;;  %s1935_s27 = sld [smem:[#allocation2 + $0x1b]] }
  0xc9   : > { %v435_v59 = vadd.f32 %v2442_v48, %v424_v22  ;;  %v499_v48 = vmul.f32 %v497_v5, %v480_v50  ;;  %v547_v50 = vmul.f32 %v546_v39, %v538_v41 }
  0xca   : > { %1737 = vrot.lane.b32.xlu0 %v2697_v37, %s2261_s29 }
  0xcb   : > { %v446_v4 = vadd.f32 %v2445_v49, %v435_v59  ;;  %v474_v49 = vsel %vm351_vm1, %v472_v9, %v473_v6  ;;  %v503_v21 = vrot.slane %v499_v48, 2  ;;  %v568_v59 = vpop.permute.xlu0 %567  ;;  %v551_v0 = vrot.slane %v547_v50, 1 }
  0xcc   : > { %1739 = vrot.lane.b32.xlu1 %v2694_v36, %s2261_s29  ;;  %v543_v6 = vmul.f32 %v542_v55, %v538_v41  ;;  %v577_v9 = vmul.f32 %v576_v47, %v568_v59  ;;  %s1939_s29 = sld [smem:[#allocation2 + $0x1f]] }
  0xcd   : > { %v454_v13 = vadd.f32 %v453_v60, %v446_v4  ;;  %v504_v22 = vsel %vm351_vm1, %v502_v32, %v503_v21  ;;  %v552_v60 = vrot.slane %v548_v46, 1  ;;  %v558_v4 = vmul.f32 %v557_v52, %v538_v41 }
  0xce   : > { %v602_v40 = vstv %s1935_s27  ;;  %s2741_s27 = sld [smem:[#allocation2 + $0x2d]] }
  0xcf   : > { %v465_v24 = vadd.f32 %v463_v8, %v454_v13  ;;  %v578_v8 = vmul.f32 %v576_v47, %v570_v58  ;;  %v587_v13 = vstv %s2705_s5  ;;  %v553_v48 = vsel %vm339_vm0, %v551_v0, %v552_v60  ;;  %s2735_s5 = sld [smem:[#allocation2 + $0x2c]] }
  0xd0   : > { %v562_v16 = vrot.slane %v558_v4, 2  ;;  %v588_v21 = vmul.f32 %v587_v13, %v568_v59  ;;  %v603_v50 = vmul.f32 %v2457_v56, %v602_v40  ;;  %v647_v47 = vstv %s1940_s7  ;;  %s2749_s7 = sld [smem:[#allocation2 + $0x34]] }
  0xd1   : > { %v476_v29 = vadd.f32 %v474_v49, %v465_v24  ;;  %v589_v49 = vmul.f32 %v587_v13, %v570_v58  ;;  %v632_v58 = vstv %s1938_s8  ;;  %v666_v60 = vstv %s1942_s9  ;;  %s2751_s8 = sld [smem:[#allocation2 + $0x6f]] }
  0xd2   : > { %v564_v32 = vsel %vm351_vm1, %v562_v16, %v563_v42  ;;  %v592_v39 = vrot.slane %v588_v21, 2  ;;  %v692_v40 = vstv %s1946_s19  ;;  %s2753_s9 = sld [smem:[#allocation2 + $0x72]] }
  0xd3   : > { %v484_v38 = vadd.f32 %v483_v25, %v476_v29  ;;  %v582_v25 = vrot.slane %v578_v8, 1  ;;  %v581_v29 = vrot.slane %v577_v9, 1  ;;  %s2763_s19 = sld [smem:[#allocation2 + $0x35]] }
  0xd5   : > { %v495_v43 = vadd.f32 %v493_v30, %v484_v38  ;;  %v583_v38 = vsel %vm339_vm0, %v581_v29, %v582_v25  ;;  %v662_v25 = vstv %s1941_s18  ;;  %s2758_s18 = sld [smem:[#allocation2 + $0x32]] }
  0xd7   : > { %v506_v51 = vadd.f32 %v504_v22, %v495_v43  ;;  %v636_v43 = vstv %s1939_s29  ;;  %v628_v22 = vpop.permute.xlu0 %627  ;;  %s2745_s29 = sld [smem:[#allocation2 + $0x31]] }
  0xd8   : > { %v637_v55 = vmul.f32 %v636_v43, %v628_v22  ;;  %v648_v8 = vmul.f32 %v647_v47, %v628_v22  ;;  %v633_v9 = vmul.f32 %v632_v58, %v628_v22  ;;  %v722_v58 = vstv %s1949_s30  ;;  %s2774_s30 = sld [smem:[#allocation2 + $0x7b]] }
  0xd9   : > { %v514_v57 = vadd.f32 %v513_v45, %v506_v51  ;;  %v630_v45 = vpop.permute.xlu1 %629 }
  0xda   : > { %v638_v52 = vmul.f32 %v636_v43, %v630_v45  ;;  %v726_v43 = vstv %s1950_s22  ;;  %s2766_s22 = sld [smem:[#allocation2 + $0x2f]] }
  0xdb   : > { %v525_v5 = vadd.f32 %v2465_v62, %v514_v57  ;;  %v573_v62 = vmul.f32 %v572_v20, %v568_v59  ;;  %v658_v0 = vpop.permute.xlu0 %657 }
  0xdc   : > { %v642_v4 = vrot.slane %v638_v52, 1  ;;  %v667_v13 = vmul.f32 %v666_v60, %v658_v0 }
  0xdd   : > { %v536_v12 = vadd.f32 %v2468_v63, %v525_v5  ;;  %v593_v63 = vrot.slane %v589_v49, 2  ;;  %v660_v61 = vpop.permute.xlu1 %659  ;;  %v649_v5 = vmul.f32 %v647_v47, %v630_v45  ;;  %v737_v47 = vstv %s1951_s28  ;;  %s2771_s28 = sld [smem:[#allocation2 + $0x78]] }
  0xdf   : > { %v544_v24 = vadd.f32 %v543_v6, %v536_v12  ;;  %v594_v51 = vsel %vm351_vm1, %v592_v39, %v593_v63  ;;  %v641_v6 = vrot.slane %v637_v55, 1  ;;  %v668_v12 = vmul.f32 %v666_v60, %v660_v61  ;;  %v718_v22 = vpop.permute.xlu0 %717 }
  0xe0   : > { %v653_v16 = vrot.slane %v649_v5, 2  ;;  %v727_v55 = vmul.f32 %v726_v43, %v718_v22  ;;  %v756_v60 = vstv %s1953_s4  ;;  %s2784_s4 = sld [smem:[#allocation2 + $0x36]] }
  0xe1   : > { %v555_v30 = vadd.f32 %v553_v48, %v544_v24  ;;  %v677_v48 = vstv %s2725_s11  ;;  %v643_v20 = vsel %vm339_vm0, %v641_v6, %v642_v4  ;;  %v652_v24 = vrot.slane %v648_v8, 2  ;;  %v720_v45 = vpop.permute.xlu1 %719  ;;  %s2755_s11 = sld [smem:[#allocation2 + $0x2e]] }
  0xe2   : > { %v672_v29 = vrot.slane %v668_v12, 1  ;;  %v679_v21 = vmul.f32 %v677_v48, %v660_v61  ;;  %v728_v52 = vmul.f32 %v726_v43, %v720_v45  ;;  %v739_v5 = vmul.f32 %v737_v47, %v720_v45 }
  0xe3   : > { %v566_v27 = vadd.f32 %v564_v32, %v555_v30  ;;  %v671_v30 = vrot.slane %v667_v13, 1  ;;  %v738_v6 = vmul.f32 %v737_v47, %v718_v22 }
  0xe4   : > { %v732_v4 = vrot.slane %v728_v52, 1  ;;  %v1427_v52 = vstv %s2753_s9  ;;  %s2817_s9 = sld [smem:[#allocation2 + $0x84]] }
  0xe5   : > { %v574_v41 = vadd.f32 %v573_v62, %v566_v27  ;;  %v678_v62 = vmul.f32 %v677_v48, %v658_v0  ;;  %v654_v27 = vsel %vm351_vm1, %v652_v24, %v653_v16  ;;  %v750_v61 = vpop.permute.xlu1 %749  ;;  %v743_v48 = vrot.slane %v739_v5, 2 }
  0xe6   : > { %v752_v24 = vstv %s2738_s6  ;;  %s2793_s6 = sld [smem:[#allocation2 + $0x3d]] }
  0xe7   : > { %v585_v46 = vadd.f32 %v583_v38, %v574_v41  ;;  %v673_v38 = vsel %vm339_vm0, %v671_v30, %v672_v29  ;;  %v682_v39 = vrot.slane %v678_v62, 2  ;;  %v812_v47 = vstv %s2755_s11  ;;  %s2820_s11 = sld [smem:[#allocation2 + $0x38]] }
  0xe9   : > { %v596_v57 = vadd.f32 %v594_v51, %v585_v46 }
  0xeb   : > { %v604_v59 = vadd.f32 %v603_v50, %v596_v57  ;;  %v693_v50 = vmul.f32 %v2475_v1, %v692_v40  ;;  %v731_v1 = vrot.slane %v727_v55, 1  ;;  %v810_v40 = vpop.permute.xlu1 %809 }
  0xed   : > { %v615_v56 = vadd.f32 %v2493_v14, %v604_v59  ;;  %v663_v14 = vmul.f32 %v662_v25, %v658_v0  ;;  %v748_v0 = vpop.permute.xlu0 %747  ;;  %v733_v16 = vsel %vm339_vm0, %v731_v1, %v732_v4 }
  0xee   : > { %v757_v12 = vmul.f32 %v756_v60, %v748_v0  ;;  %v753_v30 = vmul.f32 %v752_v24, %v748_v0 }
  0xef   : > { %v626_v42 = vadd.f32 %v2499_v15, %v615_v56  ;;  %v683_v15 = vrot.slane %v679_v21, 2  ;;  %v723_v56 = vmul.f32 %v722_v58, %v718_v22  ;;  %v1416_v22 = vstv %s2751_s8  ;;  %s2815_s8 = sld [smem:[#allocation2 + $0x81]] }
  0xf0   : > { %v761_v29 = vrot.slane %v757_v12, 1  ;;  %v846_v58 = vstv %s2758_s18  ;;  %v1417_v4 = vmul.f32 %v2579_v3, %v1416_v22  ;;  %v1428_v12 = vmul.f32 %v2579_v3, %v1427_v52  ;;  %s2834_s18 = sld [smem:[#allocation2 + $0x3f]] }
  0xf1   : > { %v634_v49 = vadd.f32 %v633_v9, %v626_v42  ;;  %v684_v51 = vsel %vm351_vm1, %v682_v39, %v683_v15  ;;  %v758_v9 = vmul.f32 %v756_v60, %v750_v61  ;;  %v767_v42 = vstv %s2735_s5  ;;  %v840_v60 = vpop.permute.xlu1 %839  ;;  %s2788_s5 = sld [smem:[#allocation2 + $0x3a]] }
  0xf2   : > { %v768_v21 = vmul.f32 %v767_v42, %v748_v0  ;;  %v782_v15 = vstv %s2741_s27  ;;  %v816_v39 = vstv %s2745_s29  ;;  %v1429_v0 = vmul.f32 %v2576_v2, %v1427_v52  ;;  %s2796_s27 = sld [smem:[#allocation2 + $0x37]] }
  0xf3   : > { %v645_v32 = vadd.f32 %v643_v20, %v634_v49  ;;  %v742_v20 = vrot.slane %v738_v6, 2  ;;  %v769_v49 = vmul.f32 %v767_v42, %v750_v61  ;;  %v783_v45 = vmul.f32 %v2485_v7, %v782_v15  ;;  %s2801_s29 = sld [smem:[#allocation2 + $0x3b]] }
  0xf4   : > { %v1418_v61 = vmul.f32 %v2576_v2, %v1416_v22  ;;  %v848_v42 = vmul.f32 %v846_v58, %v840_v60  ;;  %v1421_v24 = vrot.slane %v1417_v4, 1 }
  0xf5   : > { %v656_v63 = vadd.f32 %v654_v27, %v645_v32  ;;  %v744_v62 = vsel %vm351_vm1, %v742_v20, %v743_v48 }
  0xf6   : > { %v1422_v20 = vrot.slane %v1418_v61, 1 }
  0xf7   : > { %v664_v41 = vadd.f32 %v663_v14, %v656_v63  ;;  %v773_v14 = vrot.slane %v769_v49, 2  ;;  %v772_v63 = vrot.slane %v768_v21, 2  ;;  %v1433_v49 = vrot.slane %v1429_v0, 2 }
  0xf8   : > { %v1506_v21 = vstv %s2771_s28  ;;  %v906_v52 = vstv %s2788_s5  ;;  %s2849_s28 = sld [smem:[#allocation2 + $0x4e]] }
  0xf9   : > { %v675_v46 = vadd.f32 %v673_v38, %v664_v41  ;;  %v808_v41 = vpop.permute.xlu0 %807  ;;  %v1508_v15 = vmul.f32 %v2605_v18, %v1506_v21  ;;  %s2856_s5 = sld [smem:[#allocation2 + $0x44]] }
  0xfb   : > { %v686_v57 = vadd.f32 %v684_v51, %v675_v46  ;;  %v774_v46 = vsel %vm351_vm1, %v772_v63, %v773_v14  ;;  %v817_v51 = vmul.f32 %v816_v39, %v808_v41 }
  0xfd   : > { %v694_v59 = vadd.f32 %v693_v50, %v686_v57  ;;  %v818_v50 = vmul.f32 %v816_v39, %v810_v40  ;;  %v827_v57 = vstv %s2749_s7  ;;  %v838_v7 = vpop.permute.xlu0 %837  ;;  %v821_v6 = vrot.slane %v817_v51, 1  ;;  %s2812_s7 = sld [smem:[#allocation2 + $0x3e]] }
  0xfe   : > { %v829_v1 = vmul.f32 %v827_v57, %v810_v40  ;;  %v847_v48 = vmul.f32 %v846_v58, %v838_v7  ;;  %v1507_v39 = vmul.f32 %v2608_v19, %v1506_v21  ;;  %v872_v51 = vstv %s2784_s4  ;;  %s2854_s4 = sld [smem:[#allocation2 + $0x40]] }
  0xff   : > { %v705_v8 = vadd.f32 %v2536_v33, %v694_v59  ;;  %v762_v33 = vrot.slane %v758_v9, 1  ;;  %v822_v5 = vrot.slane %v818_v50, 1  ;;  %v813_v9 = vmul.f32 %v812_v47, %v808_v41 }
 0x100   : > { %v1511_v47 = vrot.slane %v1507_v39, 1  ;;  %v932_v21 = vstv %s2820_s11  ;;  %s2901_s11 = sld [smem:[#allocation2 + $0x4f]] }
 0x101   : > { %v716_v13 = vadd.f32 %v2539_v34, %v705_v8  ;;  %v763_v27 = vsel %vm339_vm0, %v761_v29, %v762_v33  ;;  %v828_v8 = vmul.f32 %v827_v57, %v808_v41  ;;  %v1432_v29 = vrot.slane %v1428_v12, 2  ;;  %v898_v57 = vpop.permute.xlu0 %897 }
 0x102   : > { %v907_v4 = vmul.f32 %v906_v52, %v898_v57 }
 0x103   : > { %v724_v25 = vadd.f32 %v723_v56, %v716_v13  ;;  %v857_v13 = vstv %s2763_s19  ;;  %v832_v33 = vrot.slane %v828_v8, 2  ;;  %s2840_s19 = sld [smem:[#allocation2 + $0x43]] }
 0x104   : > { %v858_v14 = vmul.f32 %v857_v13, %v838_v7 }
 0x105   : > { %v735_v34 = vadd.f32 %v733_v16, %v724_v25  ;;  %v842_v16 = vstv %s2766_s22  ;;  %v833_v25 = vrot.slane %v829_v1, 2  ;;  %v917_v1 = vstv %s2793_s6  ;;  %v928_v12 = vpop.permute.xlu0 %927  ;;  %s2844_s22 = sld [smem:[#allocation2 + $0x4b]] }
 0x106   : > { %v862_v50 = vrot.slane %v858_v14, 2  ;;  %s2860_s6 = sld [smem:[#allocation2 + $0x47]] }
 0x107   : > { %v746_v32 = vadd.f32 %v744_v62, %v735_v34  ;;  %v1517_v34 = vstv %s2774_s30  ;;  %v859_v62 = vmul.f32 %v857_v13, %v840_v60  ;;  %v834_v63 = vsel %vm351_vm1, %v832_v33, %v833_v25  ;;  %s2851_s30 = sld [smem:[#allocation2 + $0x46]] }
 0x108   : > { %v1518_v41 = vmul.f32 %v2608_v19, %v1517_v34  ;;  %v1512_v19 = vrot.slane %v1508_v15, 1  ;;  %v1596_v25 = vstv %s2815_s8  ;;  %s2881_s8 = sld [smem:[#allocation2 + $0x48]] }
 0x109   : > { %v754_v38 = vadd.f32 %v753_v30, %v746_v32  ;;  %v852_v30 = vrot.slane %v848_v42, 1  ;;  %v851_v32 = vrot.slane %v847_v48, 1  ;;  %v863_v22 = vrot.slane %v859_v62, 2 }
 0x10a   : > { %v2826_v8 = vsel %vm339_vm0, %v1511_v47, %v1512_v19  ;;  %v996_v19 = vstv %s2840_s19  ;;  %s2908_s19 = sld [smem:[#allocation2 + $0x4d]] }
 0x10b   : > { %v765_v43 = vadd.f32 %v763_v27, %v754_v38  ;;  %v1519_v38 = vmul.f32 %v2605_v18, %v1517_v34  ;;  %v864_v61 = vsel %vm351_vm1, %v862_v50, %v863_v22 }
 0x10d   : > { %v776_v55 = vadd.f32 %v774_v46, %v765_v43  ;;  %v2805_v43 = vsel %vm339_vm0, %v1421_v24, %v1422_v20  ;;  %v853_v46 = vsel %vm339_vm0, %v851_v32, %v852_v30  ;;  %v1523_v60 = vrot.slane %v1519_v38, 2 }
 0x10e   : > { %v1598_v32 = vmul.f32 %v2651_v26, %v1596_v25 }
 0x10f   : > { %v784_v59 = vadd.f32 %v783_v45, %v776_v55  ;;  %v2808_v45 = vsel %vm351_vm1, %v1432_v29, %v1433_v49  ;;  %v900_v55 = vpop.permute.xlu1 %899  ;;  %v1607_v49 = vstv %s2817_s9  ;;  %v947_v29 = vstv %s2812_s7  ;;  %s2868_s7 = sld [smem:[#allocation2 + $0x41]] }
 0x110   : > { %v908_v0 = vmul.f32 %v906_v52, %v900_v55  ;;  %v919_v48 = vmul.f32 %v917_v1, %v900_v55  ;;  %v1609_v14 = vmul.f32 %v2651_v26, %v1607_v49  ;;  %v948_v38 = vmul.f32 %v947_v29, %v928_v12  ;;  %s2893_s9 = sld [smem:[#allocation2 + $0x4c]] }
 0x111   : > { %v795_v56 = vadd.f32 %v2558_v53, %v784_v59  ;;  %v823_v53 = vsel %vm339_vm0, %v821_v6, %v822_v5  ;;  %v873_v59 = vmul.f32 %v2505_v17, %v872_v51  ;;  %v902_v6 = vstv %s2796_s27  ;;  %s2863_s27 = sld [smem:[#allocation2 + $0x8a]] }
 0x112   : > { %v912_v42 = vrot.slane %v908_v0, 1  ;;  %v903_v24 = vmul.f32 %v902_v6, %v898_v57  ;;  %v923_v34 = vrot.slane %v919_v48, 2  ;;  %v1602_v26 = vrot.slane %v1598_v32, 1 }
 0x113   : > { %v806_v2 = vadd.f32 %v2563_v54, %v795_v56  ;;  %v843_v54 = vmul.f32 %v842_v16, %v838_v7  ;;  %v1522_v7 = vrot.slane %v1518_v41, 2  ;;  %v930_v17 = vpop.permute.xlu1 %929  ;;  %v918_v16 = vmul.f32 %v917_v1, %v898_v57 }
 0x114   : > { %v952_v52 = vrot.slane %v948_v38, 2  ;;  %v962_v55 = vstv %s2834_s18  ;;  %v1007_v6 = vstv %s2851_s30  ;;  %s2906_s18 = sld [smem:[#allocation2 + $0x49]] }
 0x115   : > { %v814_v3 = vadd.f32 %v813_v9, %v806_v2  ;;  %v936_v9 = vstv %s2801_s29  ;;  %v2830_v13 = vsel %vm351_vm1, %v1522_v7, %v1523_v60  ;;  %v911_v2 = vrot.slane %v907_v4, 1  ;;  %s2865_s29 = sld [smem:[#allocation2 + $0x8d]] }
 0x116   : > { %v937_v33 = vmul.f32 %v936_v9, %v928_v12  ;;  %v922_v62 = vrot.slane %v918_v16, 2  ;;  %v963_v60 = vmul.f32 %v2519_v23, %v962_v55  ;;  %v1026_v23 = vstv %s2856_s5  ;;  %s2924_s30 = sld [smem:[#allocation2 + $0x54]] }
 0x117   : > { %v825_v27 = vadd.f32 %v823_v53, %v814_v3  ;;  %v938_v53 = vmul.f32 %v936_v9, %v930_v17  ;;  %v913_v30 = vsel %vm339_vm0, %v911_v2, %v912_v42  ;;  %v990_v47 = vpop.permute.xlu1 %989  ;;  %v1056_v9 = vstv %s2844_s22  ;;  %s2913_s22 = sld [smem:[#allocation2 + $0x50]] }
 0x118   : > { %v941_v15 = vrot.slane %v937_v33, 1  ;;  %v924_v41 = vsel %vm351_vm1, %v922_v62, %v923_v34  ;;  %v998_v4 = vmul.f32 %v996_v19, %v990_v47  ;;  %v1009_v2 = vmul.f32 %v1007_v6, %v990_v47  ;;  %s2934_s5 = sld [smem:[#allocation2 + $0x51]] }
 0x119   : > { %v836_v40 = vadd.f32 %v834_v63, %v825_v27  ;;  %v1597_v27 = vmul.f32 %v2654_v28, %v1596_v25  ;;  %v949_v63 = vmul.f32 %v947_v29, %v930_v17  ;;  %v2886_v33 = vmul.f32 %v2532_v31, %v1056_v9 }
 0x11a   : > { %v1002_v48 = vrot.slane %v998_v4, 1  ;;  %v1022_v62 = vstv %s2868_s7  ;;  %v1013_v32 = vrot.slane %v1009_v2, 2  ;;  %s2949_s7 = sld [smem:[#allocation2 + $0x56]] }
 0x11b   : > { %v844_v18 = vadd.f32 %v843_v54, %v836_v40  ;;  %v1608_v54 = vmul.f32 %v2654_v28, %v1607_v49  ;;  %v933_v40 = vmul.f32 %v932_v21, %v928_v12  ;;  %v1613_v28 = vrot.slane %v1609_v14, 2  ;;  %v1020_v12 = vpop.permute.xlu1 %1019 }
 0x11c   : > { %v953_v51 = vrot.slane %v949_v63, 2  ;;  %v1028_v49 = vmul.f32 %v1026_v23, %v1020_v12  ;;  %v1697_v29 = vstv %s2865_s29  ;;  %v1067_v21 = vstv %s2849_s28  ;;  %s2922_s28 = sld [smem:[#allocation2 + $0x4a]] }
 0x11d   : > { %v855_v58 = vadd.f32 %v853_v46, %v844_v18  ;;  %v1601_v46 = vrot.slane %v1597_v27, 1  ;;  %v1612_v50 = vrot.slane %v1608_v54, 2  ;;  %v1699_v27 = vmul.f32 %v2694_v36, %v1697_v29  ;;  %s2947_s29 = sld [smem:[#allocation2 + $0x52]] }
 0x11e   : > { %v954_v0 = vsel %vm351_vm1, %v952_v52, %v953_v51  ;;  %v1062_v4 = vrot.slane %v2886_v33, 1  ;;  %v1116_v33 = vstv %s2908_s19  ;;  %s2968_s19 = sld [smem:[#allocation2 + $0x5a]] }
 0x11f   : > { %v866_v5 = vadd.f32 %v864_v61, %v855_v58  ;;  %v988_v58 = vpop.permute.xlu0 %987  ;;  %v2871_v7 = vsel %vm339_vm0, %v1601_v46, %v1602_v26  ;;  %v2874_v61 = vsel %vm351_vm1, %v1612_v50, %v1613_v28  ;;  %v2151_v46 = vld [vmem:[%s2396_s24 + $0x40] sm:$0xff] }
 0x120   : > { %v1068_v50 = vmul.f32 %v2151_v46, %v1067_v21 }
 0x121   : > { %v874_v56 = vadd.f32 %v873_v59, %v866_v5  ;;  %v997_v5 = vmul.f32 %v996_v19, %v988_v58 }
 0x123   : > { %v885_v20 = vadd.f32 %v2588_v10, %v874_v56  ;;  %v992_v56 = vstv %s2854_s4  ;;  %v1018_v42 = vpop.permute.xlu0 %1017  ;;  %v1001_v16 = vrot.slane %v997_v5, 1  ;;  %s2927_s4 = sld [smem:[#allocation2 + $0x57]] }
 0x124   : > { %v993_v25 = vmul.f32 %v992_v56, %v988_v58  ;;  %v1023_v26 = vmul.f32 %v1022_v62, %v1018_v42 }
 0x125   : > { %v896_v3 = vadd.f32 %v2591_v11, %v885_v20  ;;  %v942_v11 = vrot.slane %v938_v53, 1  ;;  %v1008_v20 = vmul.f32 %v1007_v6, %v988_v58  ;;  %v1686_v53 = vstv %s2863_s27  ;;  %s2941_s27 = sld [smem:[#allocation2 + $0x58]] }
 0x126   : > { %v1688_v14 = vmul.f32 %v2694_v36, %v1686_v53  ;;  %v1687_v54 = vmul.f32 %v2697_v37, %v1686_v53  ;;  %v1057_v36 = vmul.f32 %v2151_v46, %v1056_v9  ;;  %v1072_v9 = vrot.slane %v1068_v50, 2 }
 0x127   : > { %v904_v10 = vadd.f32 %v903_v24, %v896_v3  ;;  %v943_v18 = vsel %vm339_vm0, %v941_v15, %v942_v11  ;;  %v1027_v3 = vmul.f32 %v1026_v23, %v1018_v42  ;;  %v1032_v11 = vrot.slane %v1028_v49, 1 }
 0x128   : > { %v1691_v52 = vrot.slane %v1687_v54, 1  ;;  %v1061_v6 = vrot.slane %v1057_v36, 1 }
 0x129   : > { %v915_v39 = vadd.f32 %v913_v30, %v904_v10  ;;  %v1037_v30 = vstv %s2860_s6  ;;  %v1003_v10 = vsel %vm339_vm0, %v1001_v16, %v1002_v48  ;;  %v1031_v15 = vrot.slane %v1027_v3, 1  ;;  %s2936_s6 = sld [smem:[#allocation2 + $0x55]] }
 0x12a   : > { %v1039_v63 = vmul.f32 %v1037_v30, %v1020_v12  ;;  %v1038_v38 = vmul.f32 %v1037_v30, %v1018_v42  ;;  %v1097_v16 = vstv %s2901_s11  ;;  %s2960_s11 = sld [smem:[#allocation2 + $0x53]] }
 0x12b   : > { %v926_v22 = vadd.f32 %v924_v41, %v915_v39  ;;  %v2150_v39 = vld [vmem:[%s2408_s10 + $0x10] sm:$0x3]  ;;  %v1033_v19 = vsel %vm339_vm0, %v1031_v15, %v1032_v11  ;;  %v1112_v11 = vstv %s2922_s28  ;;  %s2977_s28 = sld [smem:[#allocation2 + $0x61]] }
 0x12c   : > { %v1042_v47 = vrot.slane %v1038_v38, 2 }
 0x12d   : > { %v934_v57 = vadd.f32 %v933_v40, %v926_v22  ;;  %v1069_v40 = vmul.f32 %v2150_v39, %v1067_v21  ;;  %v1052_v22 = vstv %s2881_s8  ;;  %v1157_v39 = vstv %s2927_s4  ;;  %s2954_s8 = sld [smem:[#allocation2 + $0x5d]] }
 0x12e   : > { %s2984_s4 = sld [smem:[#allocation2 + $0x5f]] }
 0x12f   : > { %v945_v59 = vadd.f32 %v943_v18, %v934_v57  ;;  %v1703_v18 = vrot.slane %v1699_v27, 2  ;;  %v1043_v57 = vrot.slane %v1039_v63, 2  ;;  %v1073_v5 = vrot.slane %v1069_v40, 2 }
 0x130   : > { %v1146_v63 = vstv %s2924_s30  ;;  %s2982_s30 = sld [smem:[#allocation2 + $0x5b]] }
 0x131   : > { %v956_v1 = vadd.f32 %v954_v0, %v945_v59  ;;  %v1086_v59 = vstv %s2893_s9  ;;  %v1078_v0 = vpop.permute.xlu0 %1077  ;;  %v1044_v12 = vsel %vm351_vm1, %v1042_v47, %v1043_v57  ;;  %v1142_v47 = vstv %s2934_s5  ;;  %s2957_s9 = sld [smem:[#allocation2 + $0x59]] }
 0x132   : > { %v1087_v48 = vmul.f32 %v1086_v59, %v1078_v0  ;;  %v1098_v30 = vmul.f32 %v1097_v16, %v1078_v0  ;;  %s2989_s5 = sld [smem:[#allocation2 + $0x66]] }
 0x133   : > { %v964_v17 = vadd.f32 %v963_v60, %v956_v1  ;;  %v1080_v60 = vpop.permute.xlu1 %1079  ;;  %v1053_v1 = vmul.f32 %v2151_v46, %v1052_v22  ;;  %v2152_v46 = vld [vmem:[%s2408_s10 + $0x12] sm:$0x3] }
 0x134   : > { %v1088_v42 = vmul.f32 %v1086_v59, %v1080_v60  ;;  %v1099_v21 = vmul.f32 %v1097_v16, %v1080_v60  ;;  %v1148_v36 = vmul.f32 %v2152_v46, %v1146_v63  ;;  %v1176_v60 = vstv %s2936_s6  ;;  %s2991_s6 = sld [smem:[#allocation2 + $0x62]] }
 0x135   : > { %v975_v24 = vadd.f32 %v2627_v35, %v964_v17  ;;  %v1012_v35 = vrot.slane %v1008_v20, 2  ;;  %v1063_v20 = vsel %vm339_vm0, %v1061_v6, %v1062_v4  ;;  %v1108_v3 = vpop.permute.xlu0 %1107 }
 0x136   : > { %v1103_v27 = vrot.slane %v1099_v21, 2 }
 0x137   : > { %v986_v34 = vadd.f32 %v2632_v44, %v975_v24  ;;  %v1698_v44 = vmul.f32 %v2697_v37, %v1697_v29  ;;  %v1014_v28 = vsel %vm351_vm1, %v1012_v35, %v1013_v32  ;;  %v1692_v37 = vrot.slane %v1688_v14, 1  ;;  %v1110_v49 = vpop.permute.xlu1 %1109 }
 0x138   : > { %v1082_v24 = vstv %s2906_s18  ;;  %v1092_v29 = vrot.slane %v1088_v42, 1  ;;  %v1118_v35 = vmul.f32 %v1116_v33, %v1110_v49  ;;  %v1117_v14 = vmul.f32 %v1116_v33, %v1108_v3  ;;  %s2962_s18 = sld [smem:[#allocation2 + $0x60]] }
 0x139   : > { %v994_v31 = vadd.f32 %v993_v25, %v986_v34  ;;  %v1702_v55 = vrot.slane %v1698_v44, 2  ;;  %v2916_v17 = vsel %vm339_vm0, %v1691_v52, %v1692_v37  ;;  %v1074_v25 = vsel %vm351_vm1, %v1072_v9, %v1073_v5  ;;  %v2153_v37 = vld [vmem:[%s2396_s24 + $0x48] sm:$0xff]  ;;  %v1168_v4 = vpop.permute.xlu0 %1167 }
 0x13a   : > { %v1091_v34 = vrot.slane %v1087_v48, 1  ;;  %v1083_v32 = vmul.f32 %v1082_v24, %v1078_v0  ;;  %v1102_v44 = vrot.slane %v1098_v30, 2  ;;  %v1122_v40 = vrot.slane %v1118_v35, 1 }
 0x13b   : > { %v1005_v41 = vadd.f32 %v1003_v10, %v994_v31  ;;  %v2919_v23 = vsel %vm351_vm1, %v1702_v55, %v1703_v18  ;;  %v1127_v10 = vstv %s2913_s22  ;;  %v1159_v18 = vmul.f32 %v2152_v46, %v1157_v39  ;;  %v1170_v0 = vpop.permute.xlu1 %1169  ;;  %s2971_s22 = sld [smem:[#allocation2 + $0x5e]] }
 0x13c   : > { %v1093_v54 = vsel %vm339_vm0, %v1091_v34, %v1092_v29  ;;  %v1129_v38 = vmul.f32 %v1127_v10, %v1110_v49  ;;  %v1104_v50 = vsel %vm351_vm1, %v1102_v44, %v1103_v27  ;;  %v1152_v5 = vrot.slane %v1148_v36, 1  ;;  %v2154_v36 = vld [vmem:[%s2396_s24 + $0x50] sm:$0xff] }
 0x13d   : > { %v1016_v51 = vadd.f32 %v1014_v28, %v1005_v41  ;;  %v1121_v41 = vrot.slane %v1117_v14, 1  ;;  %v1113_v28 = vmul.f32 %v1112_v11, %v1108_v3  ;;  %v1163_v6 = vrot.slane %v1159_v18, 2  ;;  %v1198_v29 = vpop.permute.xlu0 %1197 }
 0x13e   : > { %v1133_v52 = vrot.slane %v1129_v38, 2  ;;  %v1187_v9 = vstv %s2941_s27  ;;  %v1178_v48 = vmul.f32 %v1176_v60, %v1170_v0  ;;  %v1177_v16 = vmul.f32 %v1176_v60, %v1168_v4  ;;  %s2995_s27 = sld [smem:[#allocation2 + $0x5c]] }
 0x13f   : > { %v1024_v58 = vadd.f32 %v1023_v26, %v1016_v51  ;;  %v1128_v26 = vmul.f32 %v1127_v10, %v1108_v3  ;;  %v1147_v51 = vmul.f32 %v2153_v37, %v1146_v63  ;;  %v1123_v57 = vsel %vm339_vm0, %v1121_v41, %v1122_v40  ;;  %v1200_v3 = vpop.permute.xlu1 %1199 }
 0x140   : > { %v1206_v49 = vstv %s2949_s7  ;;  %v1182_v21 = vrot.slane %v1178_v48, 1  ;;  %v1181_v30 = vrot.slane %v1177_v16, 1  ;;  %v1217_v27 = vstv %s2957_s9  ;;  %s3003_s7 = sld [smem:[#allocation2 + $0x63]] }
 0x141   : > { %v1035_v56 = vadd.f32 %v1033_v19, %v1024_v58  ;;  %v1132_v19 = vrot.slane %v1128_v26, 2  ;;  %v1158_v58 = vmul.f32 %v2153_v37, %v1157_v39  ;;  %v1208_v35 = vmul.f32 %v1206_v49, %v1200_v3  ;;  %s3012_s9 = sld [smem:[#allocation2 + $0x6a]] }
 0x142   : > { %v1207_v14 = vmul.f32 %v1206_v49, %v1198_v29  ;;  %v1183_v44 = vsel %vm339_vm0, %v1181_v30, %v1182_v21  ;;  %v1202_v63 = vstv %s2960_s11  ;;  %v1247_v38 = vstv %s2962_s18  ;;  %s3017_s11 = sld [smem:[#allocation2 + $0x64]] }
 0x143   : > { %v1046_v2 = vadd.f32 %v1044_v12, %v1035_v56  ;;  %v1143_v12 = vmul.f32 %v2153_v37, %v1142_v47  ;;  %v1134_v42 = vsel %vm351_vm1, %v1132_v19, %v1133_v52  ;;  %v1212_v40 = vrot.slane %v1208_v35, 1  ;;  %v2155_v37 = vld [vmem:[%s2408_s10 + $0x14] sm:$0x3]  ;;  %s3019_s18 = sld [smem:[#allocation2 + $0x68]] }
 0x144   : > { %v1219_v41 = vmul.f32 %v1217_v27, %v1200_v3  ;;  %v1211_v26 = vrot.slane %v1207_v14, 1  ;;  %v1203_v46 = vmul.f32 %v1202_v63, %v1198_v29  ;;  %v1248_v52 = vmul.f32 %v2154_v36, %v1247_v38 }
 0x145   : > { %v1054_v53 = vadd.f32 %v1053_v1, %v1046_v2  ;;  %v1151_v1 = vrot.slane %v1147_v51, 1  ;;  %v1162_v2 = vrot.slane %v1158_v58, 2  ;;  %v1296_v3 = vstv %s2984_s4  ;;  %s3044_s4 = sld [smem:[#allocation2 + $0x6d]] }
 0x146   : > { %v1223_v19 = vrot.slane %v1219_v41, 2  ;;  %v1213_v47 = vsel %vm339_vm0, %v1211_v26, %v1212_v40 }
 0x147   : > { %v1065_v62 = vadd.f32 %v1063_v20, %v1054_v53  ;;  %v1153_v24 = vsel %vm339_vm0, %v1151_v1, %v1152_v5  ;;  %v1189_v53 = vmul.f32 %v1187_v9, %v1170_v0  ;;  %v1164_v34 = vsel %vm351_vm1, %v1162_v2, %v1163_v6  ;;  %v1258_v5 = vpop.permute.xlu0 %1257 }
 0x148   : > { %v1266_v0 = vstv %s2971_s22  ;;  %v1277_v2 = vstv %s2977_s28  ;;  %s3034_s22 = sld [smem:[#allocation2 + $0x6c]] }
 0x149   : > { %v1076_v31 = vadd.f32 %v1074_v25, %v1065_v62  ;;  %v1172_v25 = vstv %s2947_s29  ;;  %v1188_v62 = vmul.f32 %v1187_v9, %v1168_v4  ;;  %s2997_s29 = sld [smem:[#allocation2 + $0x69]] }
 0x14a   : > { %v1173_v10 = vmul.f32 %v1172_v25, %v1168_v4  ;;  %v1260_v4 = vpop.permute.xlu1 %1259  ;;  %s3037_s28 = sld [smem:[#allocation2 + $0x70]] }
 0x14b   : > { %v1084_v15 = vadd.f32 %v1083_v32, %v1076_v31  ;;  %v1192_v11 = vrot.slane %v1188_v62, 2  ;;  %v1268_v16 = vmul.f32 %v1266_v0, %v1260_v4  ;;  %v1288_v21 = vpop.permute.xlu0 %1287 }
 0x14d   : > { %v1095_v22 = vadd.f32 %v1093_v54, %v1084_v15  ;;  %v1193_v54 = vrot.slane %v1189_v53, 2  ;;  %v1236_v15 = vstv %s2954_s8  ;;  %v1262_v53 = vstv %s2982_s30  ;;  %s3006_s8 = sld [smem:[#allocation2 + $0x67]] }
 0x14e   : > { %v1238_v51 = vmul.f32 %v2155_v37, %v1236_v15  ;;  %v1263_v35 = vmul.f32 %v1262_v53, %v1258_v5  ;;  %s3041_s30 = sld [smem:[#allocation2 + $0x73]] }
 0x14f   : > { %v1106_v55 = vadd.f32 %v1104_v50, %v1095_v22  ;;  %v1218_v22 = vmul.f32 %v1217_v27, %v1198_v29  ;;  %v1237_v50 = vmul.f32 %v2154_v36, %v1236_v15  ;;  %v1194_v18 = vsel %vm351_vm1, %v1192_v11, %v1193_v54  ;;  %v1290_v29 = vpop.permute.xlu1 %1289 }
 0x150   : > { %v1242_v6 = vrot.slane %v1238_v51, 1  ;;  %v1298_v14 = vmul.f32 %v1296_v3, %v1290_v29  ;;  %v1307_v54 = vstv %s2991_s6  ;;  %v1292_v15 = vstv %s2995_s27  ;;  %v2157_v51 = vld [vmem:[%s2408_s10 + $0x16] sm:$0x3]  ;;  %s3024_s10 = sld [smem:[#allocation2 + $0x6b]] }
 0x151   : > { %v1114_v59 = vadd.f32 %v1113_v28, %v1106_v55  ;;  %v1249_v55 = vmul.f32 %v2155_v37, %v1247_v38  ;;  %v1222_v58 = vrot.slane %v1218_v22, 2  ;;  %v1241_v1 = vrot.slane %v1237_v50, 1  ;;  %v2156_v50 = vld [vmem:[%s2396_s24 + $0x58] sm:$0xff]  ;;  %s3052_s6 = sld [smem:[#allocation2 + $0x74]] }
 0x152   : > { %v1326_v38 = vstv %s2989_s5  ;;  %v1302_v41 = vrot.slane %v1298_v14, 1  ;;  %v1309_v26 = vmul.f32 %v1307_v54, %v1290_v29  ;;  %v1386_v29 = vstv %s3019_s18  ;;  %s3046_s5 = sld [smem:[#allocation2 + $0x71]] }
 0x153   : > { %v1125_v56 = vadd.f32 %v1123_v57, %v1114_v59  ;;  %v1232_v59 = vstv %s2968_s19  ;;  %v1253_v9 = vrot.slane %v1249_v55, 2  ;;  %v1224_v48 = vsel %vm351_vm1, %v1222_v58, %v1223_v19  ;;  %s3028_s19 = sld [smem:[#allocation2 + $0x65]] }
 0x154   : > { %v1243_v25 = vsel %vm339_vm0, %v1241_v1, %v1242_v6  ;;  %v1327_v37 = vmul.f32 %v2156_v50, %v1326_v38  ;;  %v1348_v1 = vpop.permute.xlu0 %1347  ;;  %s2040_s27 = sld [smem:[#allocation2 + $0x6e]] }
 0x155   : > { %v1136_v20 = vadd.f32 %v1134_v42, %v1125_v56  ;;  %v1252_v56 = vrot.slane %v1248_v52, 2  ;;  %v1233_v42 = vmul.f32 %v2154_v36, %v1232_v59  ;;  %v1293_v36 = vmul.f32 %v1292_v15, %v1288_v21  ;;  %s3077_s18 = sld [smem:[#allocation2 + $0x7d]] }
 0x156   : > { %v1331_v6 = vrot.slane %v1327_v37, 1  ;;  %v1412_v37 = vstv %s3034_s22  ;;  %s3088_s22 = sld [smem:[#allocation2 + $0x82]] }
 0x157   : > { %v1144_v33 = vadd.f32 %v1143_v12, %v1136_v20  ;;  %v1267_v20 = vmul.f32 %v1266_v0, %v1258_v5  ;;  %v1254_v30 = vsel %vm351_vm1, %v1252_v56, %v1253_v9 }
 0x159   : > { %v1155_v32 = vadd.f32 %v1153_v24, %v1144_v33  ;;  %v1279_v33 = vmul.f32 %v1277_v2, %v1260_v4  ;;  %v1271_v62 = vrot.slane %v1267_v20, 1  ;;  %v1356_v4 = vstv %s3006_s8  ;;  %s3066_s8 = sld [smem:[#allocation2 + $0x7c]] }
 0x15b   : > { %v1166_v31 = vadd.f32 %v1164_v34, %v1155_v32  ;;  %v1272_v34 = vrot.slane %v1268_v16, 1  ;;  %v1278_v32 = vmul.f32 %v1277_v2, %v1258_v5  ;;  %v1350_v5 = vpop.permute.xlu1 %1349  ;;  %v1367_v16 = vstv %s3012_s9  ;;  %s3069_s9 = sld [smem:[#allocation2 + $0x76]] }
 0x15c   : > { %v1358_v20 = vmul.f32 %v1356_v4, %v1350_v5 }
 0x15d   : > { %v1174_v39 = vadd.f32 %v1173_v10, %v1166_v31  ;;  %v1297_v31 = vmul.f32 %v1296_v3, %v1288_v21  ;;  %v1273_v11 = vsel %vm339_vm0, %v1271_v62, %v1272_v34  ;;  %v1282_v63 = vrot.slane %v1278_v32, 2  ;;  %v1378_v34 = vpop.permute.xlu0 %1377 }
 0x15f   : > { %v1185_v28 = vadd.f32 %v1183_v44, %v1174_v39  ;;  %v1283_v44 = vrot.slane %v1279_v33, 2  ;;  %v1337_v39 = vstv %s2997_s29  ;;  %v1301_v22 = vrot.slane %v1297_v31, 1  ;;  %s3059_s29 = sld [smem:[#allocation2 + $0x75]] }
 0x160   : > { %v1338_v55 = vmul.f32 %v2156_v50, %v1337_v39  ;;  %v1352_v33 = vstv %s3017_s11  ;;  %s3071_s11 = sld [smem:[#allocation2 + $0x7a]] }
 0x161   : > { %v1196_v57 = vadd.f32 %v1194_v18, %v1185_v28  ;;  %v1308_v28 = vmul.f32 %v1307_v54, %v1288_v21  ;;  %v1328_v18 = vmul.f32 %v2157_v51, %v1326_v38  ;;  %v1284_v52 = vsel %vm351_vm1, %v1282_v63, %v1283_v44  ;;  %v1380_v21 = vpop.permute.xlu1 %1379 }
 0x162   : > { %v1303_v58 = vsel %vm339_vm0, %v1301_v22, %v1302_v41  ;;  %v1342_v9 = vrot.slane %v1338_v55, 2  ;;  %v1353_v14 = vmul.f32 %v1352_v33, %v1348_v1  ;;  %v1388_v31 = vmul.f32 %v1386_v29, %v1380_v21 }
 0x163   : > { %v1204_v60 = vadd.f32 %v1203_v46, %v1196_v57  ;;  %v1339_v57 = vmul.f32 %v2157_v51, %v1337_v39  ;;  %v1312_v59 = vrot.slane %v1308_v28, 2  ;;  %v1332_v56 = vrot.slane %v1328_v18, 1 }
 0x164   : > { %v1397_v44 = vstv %s3024_s10  ;;  %v1382_v38 = vstv %s3028_s19  ;;  %s2051_s10 = sld [smem:[#allocation2 + $0x77]] }
 0x165   : > { %v1215_v12 = vadd.f32 %v1213_v47, %v1204_v60  ;;  %v1313_v47 = vrot.slane %v1309_v26, 2  ;;  %v1322_v60 = vstv %s3003_s7  ;;  %v1333_v53 = vsel %vm339_vm0, %v1331_v6, %v1332_v56  ;;  %s3063_s7 = sld [smem:[#allocation2 + $0x79]] }
 0x166   : > { %v1399_v41 = vmul.f32 %v1397_v44, %v1380_v21  ;;  %v1398_v22 = vmul.f32 %v1397_v44, %v1378_v34  ;;  %v1457_v6 = vstv %s3041_s30  ;;  %v1442_v56 = vstv %s3044_s4  ;;  %s3084_s19 = sld [smem:[#allocation2 + $0x7e]] }
 0x167   : > { %v1226_v24 = vadd.f32 %v1224_v48, %v1215_v12  ;;  %v1343_v12 = vrot.slane %v1339_v57, 2  ;;  %v1323_v48 = vmul.f32 %v2156_v50, %v1322_v60  ;;  %v1314_v2 = vsel %vm351_vm1, %v1312_v59, %v1313_v47  ;;  %v1438_v47 = vpop.permute.xlu0 %1437  ;;  %s3094_s30 = sld [smem:[#allocation2 + $0x7f]] }
 0x168   : > { %v1403_v51 = vrot.slane %v1399_v41, 2  ;;  %v1446_v57 = vstv %s3037_s28  ;;  %v1502_v44 = vstv %s3059_s29  ;;  %s3091_s28 = sld [smem:[#allocation2 + $0x85]] }
 0x169   : > { %v1234_v49 = vadd.f32 %v1233_v42, %v1226_v24  ;;  %v1357_v24 = vmul.f32 %v1356_v4, %v1348_v1  ;;  %v1344_v62 = vsel %vm351_vm1, %v1342_v9, %v1343_v12  ;;  %v1476_v12 = vstv %s3046_s5  ;;  %s3096_s4 = sld [smem:[#allocation2 + $0x83]] }
 0x16a   : > { %s3102_s5 = sld [smem:[#allocation2 + $0x86]] }
 0x16b   : > { %v1245_v10 = vadd.f32 %v1243_v25, %v1234_v49  ;;  %v1369_v49 = vmul.f32 %v1367_v16, %v1350_v5  ;;  %v1361_v32 = vrot.slane %v1357_v24, 1  ;;  %v1447_v5 = vmul.f32 %v1446_v57, %v1438_v47  ;;  %s3113_s29 = sld [smem:[#allocation2 + $0x8b]] }
 0x16c   : > { %v1458_v24 = vmul.f32 %v1457_v6, %v1438_v47 }
 0x16d   : > { %v1256_v27 = vadd.f32 %v1254_v30, %v1245_v10  ;;  %v1362_v30 = vrot.slane %v1358_v20, 1  ;;  %v1368_v10 = vmul.f32 %v1367_v16, %v1348_v1  ;;  %v1451_v20 = vrot.slane %v1447_v5, 1 }
 0x16f   : > { %v1264_v40 = vadd.f32 %v1263_v35, %v1256_v27  ;;  %v1387_v27 = vmul.f32 %v1386_v29, %v1378_v34  ;;  %v1363_v63 = vsel %vm339_vm0, %v1361_v32, %v1362_v30  ;;  %v1372_v15 = vrot.slane %v1368_v10, 2 }
 0x170   : > { %v1487_v29 = vstv %s3052_s6  ;;  %v1462_v30 = vrot.slane %v1458_v24, 2  ;;  %s2062_s6 = sld [smem:[#allocation2 + $0x80]] }
 0x171   : > { %v1275_v46 = vadd.f32 %v1273_v11, %v1264_v40  ;;  %v1373_v11 = vrot.slane %v1369_v49, 2  ;;  %v1392_v40 = vrot.slane %v1388_v31, 1  ;;  %v1391_v26 = vrot.slane %v1387_v27, 1 }
 0x173   : > { %v1286_v19 = vadd.f32 %v1284_v52, %v1275_v46  ;;  %v1383_v46 = vmul.f32 %v1382_v38, %v1378_v34  ;;  %v1393_v18 = vsel %vm339_vm0, %v1391_v26, %v1392_v40  ;;  %v1402_v52 = vrot.slane %v1398_v22, 2  ;;  %v2159_v26 = vld [vmem:[%s2396_s24 + $0x68] sm:$0xff] }
 0x174   : > { %v1503_v22 = vmul.f32 %v2159_v26, %v1502_v44  ;;  %v1622_v44 = vstv %s3094_s30 }
 0x175   : > { %v1294_v0 = vadd.f32 %v1293_v36, %v1286_v19  ;;  %v1374_v36 = vsel %vm351_vm1, %v1372_v15, %v1373_v11  ;;  %v1440_v19 = vpop.permute.xlu1 %1439 }
 0x176   : > { %v1448_v4 = vmul.f32 %v1446_v57, %v1440_v19  ;;  %v1459_v16 = vmul.f32 %v1457_v6, %v1440_v19 }
 0x177   : > { %v1305_v42 = vadd.f32 %v1303_v58, %v1294_v0  ;;  %v2158_v58 = vld [vmem:[%s2396_s24 + $0x60] sm:$0xff]  ;;  %v1404_v0 = vsel %vm351_vm1, %v1402_v52, %v1403_v51  ;;  %v1547_v51 = vstv %s3066_s8  ;;  %s3119_s8 = sld [smem:[#allocation2 + $0x88]] }
 0x178   : > { %v1413_v59 = vmul.f32 %v2158_v58, %v1412_v37  ;;  %v1463_v21 = vrot.slane %v1459_v16, 2 }
 0x179   : > { %v1316_v25 = vadd.f32 %v1314_v2, %v1305_v42  ;;  %v1470_v42 = vpop.permute.xlu1 %1469  ;;  %v1452_v2 = vrot.slane %v1448_v4, 1 }
 0x17a   : > { %v1478_v33 = vmul.f32 %v1476_v12, %v1470_v42 }
 0x17b   : > { %v1324_v3 = vadd.f32 %v1323_v48, %v1316_v25  ;;  %v1468_v48 = vpop.permute.xlu0 %1467  ;;  %v1453_v34 = vsel %vm339_vm0, %v1451_v20, %v1452_v2 }
 0x17c   : > { %v1477_v49 = vmul.f32 %v1476_v12, %v1468_v48  ;;  %v1482_v10 = vrot.slane %v1478_v33, 1 }
 0x17d   : > { %v1335_v35 = vadd.f32 %v1333_v53, %v1324_v3  ;;  %v1443_v53 = vmul.f32 %v1442_v56, %v1438_v47  ;;  %v1530_v40 = vpop.permute.xlu1 %1529  ;;  %v1577_v56 = vstv %s3077_s18  ;;  %s2073_s18 = sld [smem:[#allocation2 + $0x89]] }
 0x17e   : > { %v1549_v58 = vmul.f32 %v1547_v51, %v1530_v40 }
 0x17f   : > { %v1346_v54 = vadd.f32 %v1344_v62, %v1335_v35  ;;  %v1472_v62 = vstv %s2040_s27  ;;  %v1481_v35 = vrot.slane %v1477_v49, 1  ;;  %v1528_v41 = vpop.permute.xlu0 %1527  ;;  %v1592_v49 = vstv %s3084_s19  ;;  %s3109_s27 = sld [smem:[#allocation2 + $0x87]] }
 0x180   : > { %v1473_v27 = vmul.f32 %v1472_v62, %v1468_v48 }
 0x181   : > { %v1354_v39 = vadd.f32 %v1353_v14, %v1346_v54  ;;  %v1488_v14 = vmul.f32 %v1487_v29, %v1468_v48  ;;  %v1560_v57 = vpop.permute.xlu1 %1559  ;;  %v1562_v48 = vstv %s2051_s10  ;;  %s2077_s10 = sshll.u32 %s2249_s15, 7 }
 0x183   : > { %v1365_v28 = vadd.f32 %v1363_v63, %v1354_v39  ;;  %v1483_v63 = vsel %vm339_vm0, %v1481_v35, %v1482_v10  ;;  %v1492_v15 = vrot.slane %v1488_v14, 2  ;;  %v1536_v39 = vstv %s3063_s7  ;;  %v1558_v19 = vpop.permute.xlu0 %1557  ;;  %v2160_v10 = vld [vmem:[%s2396_s24 + $0x70] sm:$0xff]  ;;  %s3116_s7 = sld [smem:[#allocation2 + $0x8e]] }
 0x184   : > { %v1578_v24 = vmul.f32 %v1577_v56, %v1558_v19 }
 0x185   : > { %v1376_v50 = vadd.f32 %v1374_v36, %v1365_v28  ;;  %v1538_v36 = vmul.f32 %v1536_v39, %v1530_v40  ;;  %v1620_v62 = vpop.permute.xlu1 %1619 }
 0x187   : > { %v1384_v55 = vadd.f32 %v1383_v46, %v1376_v50  ;;  %v1537_v50 = vmul.f32 %v1536_v39, %v1528_v41  ;;  %v1542_v47 = vrot.slane %v1538_v36, 1 }
 0x189   : > { %v1395_v60 = vadd.f32 %v1393_v18, %v1384_v55  ;;  %v1532_v18 = vstv %s3069_s9  ;;  %v1566_v55 = vstv %s3071_s11  ;;  %s3121_s9 = sld [smem:[#allocation2 + $0x8c]] }
 0x18a   : > { %v1533_v4 = vmul.f32 %v1532_v18, %v1528_v41  ;;  %v1568_v5 = vmul.f32 %v1566_v55, %v1560_v57  ;;  %s2075_s11 = sld [smem:[#allocation2 + $0x8f]] }
 0x18b   : > { %v1406_v1 = vadd.f32 %v1404_v0, %v1395_v60  ;;  %v1548_v60 = vmul.f32 %v1547_v51, %v1528_v41 }
 0x18c   : > { %v1572_v16 = vrot.slane %v1568_v5, 1 }
 0x18d   : > { %v1414_v9 = vadd.f32 %v1413_v59, %v1406_v1  ;;  %v1541_v59 = vrot.slane %v1537_v50, 1  ;;  %v1567_v1 = vmul.f32 %v1566_v55, %v1558_v19  ;;  %v1652_v55 = vstv %s2062_s6 }
 0x18f   : > { %v1425_v25 = vadd.f32 %v2805_v43, %v1414_v9  ;;  %v1489_v43 = vmul.f32 %v1487_v29, %v1470_v42  ;;  %v1553_v9 = vrot.slane %v1549_v58, 2  ;;  %v1543_v12 = vsel %vm339_vm0, %v1541_v59, %v1542_v47 }
 0x190   : > { %v1552_v42 = vrot.slane %v1548_v60, 2  ;;  %v1571_v20 = vrot.slane %v1567_v1, 1 }
 0x191   : > { %v1436_v3 = vadd.f32 %v2808_v45, %v1425_v25  ;;  %v1464_v45 = vsel %vm351_vm1, %v1462_v30, %v1463_v21  ;;  %v1493_v11 = vrot.slane %v1489_v43, 2  ;;  %v1582_v21 = vrot.slane %v1578_v24, 2 }
 0x192   : > { %v1573_v29 = vsel %vm339_vm0, %v1571_v20, %v1572_v16  ;;  %v1626_v30 = vstv %s3088_s22  ;;  %v1593_v43 = vmul.f32 %v2160_v10, %v1592_v49  ;;  %v1746_v49 = vstv %s3121_s9 }
 0x193   : > { %v1444_v32 = vadd.f32 %v1443_v53, %v1436_v3  ;;  %v1494_v46 = vsel %vm351_vm1, %v1492_v15, %v1493_v11  ;;  %v1563_v53 = vmul.f32 %v1562_v48, %v1558_v19  ;;  %v1650_v15 = vpop.permute.xlu1 %1649  ;;  %v2161_v48 = vld [vmem:[%s2396_s24 + $0x78] sm:$0xff]  ;;  %s1900_s24 = sshll.u32 %s2393_s21, 3 }
 0x194   : > { %s318_s19 = scalar_lea.vmem [#allocation6], %s1900_s24 }
 0x195   : > { %v1455_v31 = vadd.f32 %v1453_v34, %v1444_v32  ;;  %v1618_v32 = vpop.permute.xlu0 %1617  ;;  %s1783_s22 = sshll.u32 %s318_s19, 4  ;;  %s1784_s22 = int_to_ptr.vmem [resolvable:$true] %s1783_s22 }
 0x196   : > { %s2177_s6 = scalar_lea.vmem %s1784_s22, 128 }
 0x197   : > { %v1466_v54 = vadd.f32 %v1464_v45, %v1455_v31  ;;  %v1628_v31 = vmul.f32 %v1626_v30, %v1620_v62  ;;  %p2178_p11 = scmp.ne.s32.totalorder %s1784_s22, %s2177_s6 }
 0x199   : > { %v1474_v38 = vadd.f32 %v1473_v27, %v1466_v54  ;;  %v1627_v27 = vmul.f32 %v1626_v30, %v1618_v32  ;;  %v1637_v54 = vstv %s3091_s28  ;;  %v1632_v39 = vrot.slane %v1628_v31, 1  ;;  %p2179_p13 = pnand %p2178_p11, %p3188_p12 }
 0x19a   : > { %v1639_v40 = vmul.f32 %v1637_v54, %v1620_v62  ;;  %v1638_v26 = vmul.f32 %v1637_v54, %v1618_v32  ;;  %v1757_v31 = vstv %s2075_s11 }
 0x19b   : > { %v1485_v28 = vadd.f32 %v1483_v63, %v1474_v38  ;;  %v1656_v63 = vstv %s3096_s4  ;;  %v1648_v38 = vpop.permute.xlu0 %1647  ;;  %v1631_v41 = vrot.slane %v1627_v27, 1  ;;  %s1781_s4 = scalar_lea.hbm %s3181_s3, %s2077_s10  ;;  %p2180_p0 = pneg %p2179_p13 }
 0x19c   : > { %v1657_v36 = vmul.f32 %v1656_v63, %v1648_v38  ;;  %v1643_v51 = vrot.slane %v1639_v40, 2  ;;  %v1653_v60 = vmul.f32 %v1652_v55, %v1648_v38 }
 0x19d   : > { %v1496_v37 = vadd.f32 %v1494_v46, %v1485_v28  ;;  %v1623_v28 = vmul.f32 %v1622_v44, %v1618_v32  ;;  %v1658_v46 = vmul.f32 %v1656_v63, %v1650_v15  ;;  %v1633_v18 = vsel %vm339_vm0, %v1631_v41, %v1632_v39 }
 0x19e   : > { %v1661_v47 = vrot.slane %v1657_v36, 1  ;;  %v1742_v44 = vstv %s2073_s18 }
 0x19f   : > { %v1504_v52 = vadd.f32 %v1503_v22, %v1496_v37  ;;  %v1667_v37 = vstv %s3102_s5  ;;  %v1662_v19 = vrot.slane %v1658_v46, 1  ;;  %s1769_s5 = scalar_lea.sflag [#allocation3], %s2393_s21 }
 0x1a0   : > { %v1668_v58 = vmul.f32 %v1667_v37, %v1648_v38 }
 0x1a1   : > { %v1515_v0 = vadd.f32 %v2826_v8, %v1504_v52  ;;  %v1579_v8 = vmul.f32 %v1577_v56, %v1560_v57  ;;  %v1642_v52 = vrot.slane %v1638_v26, 2  ;;  %v1663_v1 = vsel %vm339_vm0, %v1661_v47, %v1662_v19 }
 0x1a3   : > { %v1526_v6 = vadd.f32 %v2830_v13, %v1515_v0  ;;  %v1554_v13 = vsel %vm351_vm1, %v1552_v42, %v1553_v9  ;;  %v1583_v3 = vrot.slane %v1579_v8, 2  ;;  %v1716_v9 = vstv %s3113_s29  ;;  %v1708_v42 = vpop.permute.xlu0 %1707 }
 0x1a4   : > { %v1717_v24 = vmul.f32 %v1716_v9, %v1708_v42 }
 0x1a5   : > { %v1534_v2 = vadd.f32 %v1533_v4, %v1526_v6  ;;  %v1584_v14 = vsel %vm351_vm1, %v1582_v21, %v1583_v3  ;;  %v1682_v4 = vstv %s3109_s27  ;;  %v1672_v6 = vrot.slane %v1668_v58, 2  ;;  %s2262_s27 = smov [#allocation6]  }
 0x1a6   : > { %v1721_v30 = vrot.slane %v1717_v24, 1  ;;  %s2181_s15 = sshll.u32 %s2262_s27, 4  ;;  %s2182_s15 = int_to_ptr.vmem [resolvable:$false] %s2181_s15 }
 0x1a7   : > { %v1545_v25 = vadd.f32 %v1543_v12, %v1534_v2  ;;  %v1710_v12 = vpop.permute.xlu1 %1709  ;;  %v1683_v2 = vmul.f32 %v2161_v48, %v1682_v4  ;;  %s2183_s29 = scalar_lea.vmem %s2182_s15, 256  ;;  %p2184_p1 = scmp.lt.s32.totalorder %s1784_s22, %s2182_s15 }
 0x1a8   : > { %v1718_v20 = vmul.f32 %v1716_v9, %v1710_v12  ;;  %p2185_p2 = scmp.lt.s32.totalorder %s2183_s29, %s2177_s6 }
 0x1a9   : > { %v1556_v33 = vadd.f32 %v1554_v13, %v1545_v25  ;;  %v1712_v13 = vstv %s3119_s8 }
 0x1aa   : > { %v1722_v21 = vrot.slane %v1718_v20, 1  ;;  %v1713_v10 = vmul.f32 %v1712_v13, %v1708_v42  ;;  %p2186_p3 = por %p2185_p2, %p2184_p1 }
 0x1ab   : > { %v1564_v34 = vadd.f32 %v1563_v53, %v1556_v33  ;;  %v1727_v53 = vstv %s3116_s7  ;;  %v1740_v3 = vpop.permute.xlu1 %1739 }
 0x1ac   : > { %v1728_v62 = vmul.f32 %v1727_v53, %v1708_v42  ;;  %p2187_p6 = pnand %p2186_p3, %p2180_p0 }
 0x1ad   : > { %v1575_v35 = vadd.f32 %v1573_v29, %v1564_v34  ;;  %v1738_v29 = vpop.permute.xlu0 %1737  ;;  %v1729_v34 = vmul.f32 %v1727_v53, %v1710_v12 }
 0x1ae   : > { %v1732_v54 = vrot.slane %v1728_v62, 2  ;;  %v1758_v39 = vmul.f32 %v1757_v31, %v1738_v29 }
 0x1af   : > { %v1586_v45 = vadd.f32 %v1584_v14, %v1575_v35  ;;  %v1747_v35 = vmul.f32 %v1746_v49, %v1738_v29  ;;  %v1733_v27 = vrot.slane %v1729_v34, 2 }
 0x1b1   : > { %v1594_v11 = vadd.f32 %v1593_v43, %v1586_v45  ;;  %v1748_v43 = vmul.f32 %v1746_v49, %v1740_v3  ;;  %v1723_v45 = vsel %vm339_vm0, %v1721_v30, %v1722_v21  ;;  %v1751_v38 = vrot.slane %v1747_v35, 1 }
 0x1b2   : > { %v1734_v41 = vsel %vm351_vm1, %v1732_v54, %v1733_v27 }
 0x1b3   : > { %v1605_v22 = vadd.f32 %v2871_v7, %v1594_v11  ;;  %v1669_v7 = vmul.f32 %v1667_v37, %v1650_v15  ;;  %v1752_v63 = vrot.slane %v1748_v43, 1  ;;  %v1759_v15 = vmul.f32 %v1757_v31, %v1740_v3 }
 0x1b5   : > { %v1616_v50 = vadd.f32 %v2874_v61, %v1605_v22  ;;  %v1644_v61 = vsel %vm351_vm1, %v1642_v52, %v1643_v51  ;;  %v1673_v5 = vrot.slane %v1669_v7, 2  ;;  %v1753_v22 = vsel %vm339_vm0, %v1751_v38, %v1752_v63 }
 0x1b7   : > { %v1624_v57 = vadd.f32 %v1623_v28, %v1616_v50  ;;  %v1674_v8 = vsel %vm351_vm1, %v1672_v6, %v1673_v5  ;;  %v1762_v28 = vrot.slane %v1758_v39, 2 }
 0x1b9   : > { %v1635_v59 = vadd.f32 %v1633_v18, %v1624_v57 }
 0x1bb   : > { %v1646_v0 = vadd.f32 %v1644_v61, %v1635_v59 }
 0x1bd   : > { %v1654_v56 = vadd.f32 %v1653_v60, %v1646_v0 }
 0x1bf   : > { %v1665_v16 = vadd.f32 %v1663_v1, %v1654_v56 }
 0x1c1   : > { %v1676_v25 = vadd.f32 %v1674_v8, %v1665_v16 }
 0x1c3   : > { %v1684_v33 = vadd.f32 %v1683_v2, %v1676_v25 }
 0x1c5   : > { %v1695_v32 = vadd.f32 %v2916_v17, %v1684_v33  ;;  %v1743_v17 = vmul.f32 %v1742_v44, %v1738_v29 }
 0x1c7   : > { %v1706_v14 = vadd.f32 %v2919_v23, %v1695_v32  ;;  %v1763_v23 = vrot.slane %v1759_v15, 2 }
 0x1c9   : > { %v1714_v11 = vadd.f32 %v1713_v10, %v1706_v14  ;;  %v1764_v50 = vsel %vm351_vm1, %v1762_v28, %v1763_v23 }
 0x1cb   : > { %v1725_v40 = vadd.f32 %v1723_v45, %v1714_v11 }
 0x1cd   : > { %v1736_v26 = vadd.f32 %v1734_v41, %v1725_v40 }
 0x1cf   : > { %v1744_v46 = vadd.f32 %v1743_v17, %v1736_v26 }
 0x1d1   : > { %v1755_v36 = vadd.f32 %v1753_v22, %v1744_v46 }
 0x1d3   : > { %v1766_v37 = vadd.f32 %v1764_v50, %v1755_v36 }
 0x1d5   : > { %1767 = vst [vmem:[%s318_s19] sm:$0xff] %v1766_v37 }
 0x1d6   : > { %2190 = shalt.err (!%p2187_p6)
}
 0x1d7   : > { %s2191_s7 = scalar_lea.hbm %s1781_s4, 128  ;;  %s2195_s9 = scalar_lea.hbm %s3181_s3, 256 }
 0x1d8   : > { %p2192_p7 = scmp.ne.s32.totalorder %s1781_s4, %s2191_s7  ;;  %p2196_p10 = scmp.lt.s32.totalorder %s1781_s4, %s3181_s3 }
 0x1d9   : > { %p2197_p4 = scmp.lt.s32.totalorder %s2195_s9, %s2191_s7 }
 0x1da   : > { %p2193_p8 = pnand %p2192_p7, %p3188_p12 }
 0x1db   : > { %p2198_p11 = por %p2197_p4, %p2196_p10 }
 0x1dc   : > { %p2194_p9 = pneg %p2193_p8 }
 0x1de   : > { %p2199_p13 = pnand %p2198_p11, %p2194_p9 }
 0x1e0   : > { %2202 = shalt.err (!%p2199_p13)
}
 0x1e1   : > { %2086 = dma.vmem_to_hbm [thread:$0]  (%p3188_p12), %s1784_s22, 128, %s1781_s4, %s1769_s5  }
 0x1e2 PF: > { %s1795_s24 = sand.u32 1, %s2237_s12   ;;  %p3189_p0 = scmp.ne.s32.totalorder %s3185_s26, 0 }
 0x1e3   : > { %s1796_s10 = scalar_lea.sflag [#allocation3], %s1795_s24 }
 0x1e4   : > { %p2093_p1 = pnand %p1893_p5, %p3189_p0 }
 0x1e6   : > { %p2094_p2 = pneg %p2093_p1 }
 0x1e8   : > { %2232 = dma.done.wait (%p2094_p2), %s1796_s10, 128  }
 0x1e9   : > { %2234 = vsyncadd (%p2094_p2), %s1796_s10, 4294967168  ;;  %s17_s17 = sadd.s32 1, %s2257_s17   ;;  %s3190_s12 = smov %s2241_s13 }
 0x1ea   : > { %p14_p3 = scmp.ge.s32.totalorder %s17_s17, 4   ;;  %s3191_s13 = smov %s2245_s14 }
 0x1eb   : > { %s3192_s14 = smov %s2337_s25  ;;  %s3193_s15 = smov %s2253_s16 }
 0x1ec   : > { %s3194_s16 = smov %s3196_s20  ;;  %16 = sbr.rel (!%p14_p3) target bundleno = 5 (0x5), region = 148 }
 0x1f1   :  { %1801 = vsyncpa [#allocation3], 1 }
 0x1f2   :  { %1803 = vsyncpa [#allocation3 + $0x1], 1 }
 0x1f3   :  { %1804 = vsyncpa [#allocation4], 1 }
 0x1f4   :  { %1806 = vsyncpa [#allocation4 + $0x1], 1 }

</bundles_post_ra>
